<compile_context>
chip_gen: v5e
topology: v5e:2x2
jax: 0.10.0
libtpu: 0.0.40
codegen_flags: <defaults>
</compile_context>

<pallas_src>
import functools

import jax
import jax.numpy as jnp
from jax.experimental import pallas as pl
from jax.experimental.pallas import tpu as pltpu


def _fused_forward_kernel(x_ref, w_stem_ref, b_stem_ref, w_head_ref,
                          b_head_ref, o_ref, acc_ref, *, inv_s, chunk_s,
                          sigmoid_dtype):
    """Stem (1x1 conv + SiLU) -> spatial-sum accumulate -> mean + fused heads.

    Grid: (N // tn, S // ts); axis 1 (spatial) is the reduction axis.
      x_ref:      (tn, ts, C)  bf16 input tile
      w_stem_ref: (C, F)       bf16 pointwise-conv weight
      b_stem_ref: (1, F)       f32  pointwise-conv bias
      w_head_ref: (F, Tp)      bf16 concatenated (padded) head weights
      b_head_ref: (1, Tp)      f32  concatenated (padded) head biases
      o_ref:      (tn, Tp)     f32  logits, resident across the spatial axis
      acc_ref:    (tn, F)      f32  scratch: spatial-sum accumulator
    """
    s_idx = pl.program_id(1)

    @pl.when(s_idx == 0)
    def _init():
        acc_ref[...] = jnp.zeros_like(acc_ref)

    tn, ts, c = x_ref.shape
    n_chunks = ts // chunk_s
    # Hoisted loads; reused by every chunk (JAX does not CSE broadcasts).
    w_stem = w_stem_ref[...]
    b_stem = b_stem_ref[...]

    def chunk_body(ci, carry):
        start = pl.multiple_of(ci * chunk_s, chunk_s)
        xc = x_ref[:, pl.ds(start, chunk_s), :]              # (tn, cs, C) bf16
        # chunk_s is a multiple of 8, so collapsing (tn, cs) is a
        # sublane-tile-aligned collapse; one large-M 2-D MXU matmul per chunk
        # keeps the live f32 intermediate bounded to (tn*cs, F).
        x2d = xc.reshape(tn * chunk_s, c)
        h = jnp.dot(x2d, w_stem,
                    preferred_element_type=jnp.float32)      # (tn*cs, F) f32
        h = h + b_stem                                       # bias (inside SiLU)
        sig = jax.nn.sigmoid(h.astype(sigmoid_dtype))        # EUP; bf16 on v6e+
        h = h * sig.astype(jnp.float32)                      # SiLU, f32
        acc_ref[...] += h.reshape(tn, chunk_s, -1).sum(axis=1)   # partial sum
        return carry

    jax.lax.fori_loop(0, n_chunks, chunk_body, 0, unroll=True)

    @pl.when(s_idx == pl.num_programs(1) - 1)
    def _finalize():
        pooled = acc_ref[...] * inv_s                        # mean over S, f32
        logits = jnp.dot(pooled.astype(w_head_ref.dtype), w_head_ref[...],
                         preferred_element_type=jnp.float32)
        o_ref[...] = (logits + b_head_ref[...]).astype(o_ref.dtype)


def _pick_tile(total, target, align):
    """Largest multiple-of-`align` divisor of `total` <= target; else `total`."""
    best = None
    t = align
    cap = min(target, total)
    while t <= cap:
        if total % t == 0:
            best = t
        t += align
    return best if best is not None else total


def _pick_tile_n(n):
    # Large batch tiles (few grid steps, MXU-shaped head matmul), but when the
    # batch allows, leave >= 2 iterations along the "parallel" axis so both
    # v7x TensorCores are busy.  Tiny batches: one full block.
    t = _pick_tile(n, min(n // 2, 128), 8)
    if t != n and n // t >= 2:
        return t
    return n


def _pick_chunk_s(tile_n, tile_s, feature_dim, budget_bytes=2 << 20):
    # Bound the live (tn*chunk_s, F) f32 intermediate to ~budget_bytes.
    rows = max(budget_bytes // max(tile_n * feature_dim * 4, 1), 8)
    return _pick_tile(tile_s, min(rows, tile_s), 8)


def _vmem_limit_bytes():
    # Generation-aware budget: ~75% of physical VMEM (48 MiB on v7x's 64 MiB
    # part, 96 MiB on v5e/v6e's 128 MiB parts).  Conservative fallback.
    try:
        phys = int(pltpu.get_tpu_info().vmem_capacity_bytes)
        return max(32 << 20, min((phys * 3) // 4, 112 << 20))
    except Exception:
        return 48 << 20


def _sigmoid_dtype():
    # bf16 EUP exists on v6e/v7x (~2x sigmoid throughput); v5e and older have
    # no bf16 EUP/VPU path, so keep f32 there.
    try:
        kind = jax.devices()[0].device_kind.lower()
    except Exception:
        return jnp.float32
    if any(tag in kind for tag in ("v2", "v3", "v4", "v5")):
        return jnp.float32
    return jnp.bfloat16


def custom_efficientnet_forward(x_nchw, params, labels_map, *,
                                tile_n=None, tile_s=None, chunk_s=None):
    """Run the tiled Pallas kernel and return a dict of per-label logits."""
    N, C, H, W = x_nchw.shape
    S = H * W
    # NCHW -> (N, H*W, C), bf16 for the MXU / halved HBM input traffic.
    x_nsc = (jnp.transpose(x_nchw, (0, 2, 3, 1))
             .reshape(N, S, C).astype(jnp.bfloat16))

    w_stem = params["w_stem"].astype(jnp.bfloat16)     # (C, F)
    b_stem = params["b_stem"].astype(jnp.float32)      # (1, F)
    w_head = params["w_head"]                           # (F, T)
    b_head = params["b_head"]                           # (1, T)
    F_dim = w_stem.shape[1]
    T = w_head.shape[1]

    # Pad concatenated head outputs to a multiple of 128 -> lane-dense store.
    T_pad = ((T + 127) // 128) * 128
    if T_pad != T:
        w_head = jnp.pad(w_head, ((0, 0), (0, T_pad - T)))
        b_head = jnp.pad(b_head, ((0, 0), (0, T_pad - T)))
    w_head = w_head.astype(jnp.bfloat16)
    b_head = b_head.astype(jnp.float32)

    if tile_n is None:
        tile_n = _pick_tile_n(N)
    if tile_s is None:
        tile_s = _pick_tile(S, 2048, 8)
    if chunk_s is None:
        chunk_s = _pick_chunk_s(tile_n, tile_s, F_dim)
    assert N % tile_n == 0 and S % tile_s == 0 and tile_s % chunk_s == 0

    grid = (N // tile_n, S // tile_s)
    kernel = functools.partial(_fused_forward_kernel, inv_s=1.0 / S,
                               chunk_s=chunk_s,
                               sigmoid_dtype=_sigmoid_dtype())

    flops = 2 * N * S * C * F_dim + 2 * N * F_dim * T_pad
    transcendentals = N * S * F_dim                      # sigmoid in SiLU
    bytes_accessed = (N * S * C * 2 + C * F_dim * 2 + F_dim * 4
                      + F_dim * T_pad * 2 + T_pad * 4 + N * T_pad * 4)

    def _call(single_buffer_consts):
        const_kwargs = ({"pipeline_mode": pl.Buffered(1)}
                        if single_buffer_consts else {})
        return pl.pallas_call(
            kernel,
            out_shape=jax.ShapeDtypeStruct((N, T_pad), jnp.float32),
            grid_spec=pltpu.PrefetchScalarGridSpec(
                num_scalar_prefetch=0,
                grid=grid,
                in_specs=[
                    pl.BlockSpec((tile_n, tile_s, C), lambda n, s: (n, s, 0)),
                    pl.BlockSpec((C, F_dim), lambda n, s: (0, 0),
                                 **const_kwargs),
                    pl.BlockSpec((1, F_dim), lambda n, s: (0, 0),
                                 **const_kwargs),
                    pl.BlockSpec((F_dim, T_pad), lambda n, s: (0, 0),
                                 **const_kwargs),
                    pl.BlockSpec((1, T_pad), lambda n, s: (0, 0),
                                 **const_kwargs),
                ],
                out_specs=pl.BlockSpec((tile_n, T_pad), lambda n, s: (n, 0)),
                scratch_shapes=[pltpu.VMEM((tile_n, F_dim), jnp.float32)],
            ),
            compiler_params=pltpu.CompilerParams(
                dimension_semantics=("parallel", "arbitrary"),
                vmem_limit_bytes=_vmem_limit_bytes(),
            ),
            cost_estimate=pl.CostEstimate(
                flops=flops,
                transcendentals=transcendentals,
                bytes_accessed=bytes_accessed,
            ),
        )(x_nsc, w_stem, b_stem, w_head, b_head)

    try:
        out = _call(single_buffer_consts=True)
    except Exception:
        # pl.Buffered(1) single-buffered constants is a pure VMEM-saving hint;
        # fall back to default double buffering if the hint is unsupported.
        out = _call(single_buffer_consts=False)

    # Strip lane padding, then split concatenated logits into the per-label
    # dict (matches the PyTorch forward's `result = {label: head_i(x) ...}`).
    logits = out[:, :T]
    result, off = {}, 0
    for label, classes in labels_map.items():
        n_class = len(classes)
        result[label] = logits[:, off:off + n_class]
        off += n_class
    return result


def init_params(key, in_channels, feature_dim, labels_map):
    """Deterministic parameter init (synthetic, no checkpoint)."""
    k1, k2, k3, k4 = jax.random.split(key, 4)
    total_classes = sum(len(v) for v in labels_map.values())
    return {
        "w_stem": jax.random.normal(k1, (in_channels, feature_dim),
                                    jnp.float32) * 0.1,
        "b_stem": jax.random.normal(k2, (1, feature_dim), jnp.float32) * 0.01,
        "w_head": jax.random.normal(k3, (feature_dim, total_classes),
                                    jnp.float32) * 0.1,
        "b_head": jax.random.normal(k4, (1, total_classes), jnp.float32) * 0.01,
    }


def _reference_forward(x_nchw, params, labels_map, *,
                       sigmoid_dtype=jnp.float32):
    """Pure-JAX reference with matching mixed precision (bf16 MXU in, f32 acc)."""
    N, C, H, W = x_nchw.shape
    x = jnp.transpose(x_nchw, (0, 2, 3, 1)).reshape(N, H * W, C)
    h = jnp.einsum("nsc,cf->nsf",
                   x.astype(jnp.bfloat16),
                   params["w_stem"].astype(jnp.bfloat16),
                   preferred_element_type=jnp.float32) + params["b_stem"]
    h = h * jax.nn.sigmoid(h.astype(sigmoid_dtype)).astype(jnp.float32)
    pooled = jnp.mean(h, axis=1)
    logits = jnp.dot(pooled.astype(jnp.bfloat16),
                     params["w_head"].astype(jnp.bfloat16),
                     preferred_element_type=jnp.float32) + params["b_head"]
    result, off = {}, 0
    for label, classes in labels_map.items():
        n = len(classes)
        result[label] = logits[:, off:off + n]
        off += n
    return result


if __name__ == "__main__":
    # Small synthetic shapes consistent with the module's forward:
    # batch=2, channels=4, spatial=16x16, feature_dim=32 (stand-in for 1280).
    N, C, H, W = 2, 4, 16, 16
    FEATURE_DIM = 32
    labels_map = {
        "color": ["red", "green", "blue"],                       # n_class = 3
        "shape": ["circle", "square", "triangle",
                  "hexagon", "star"],                            # n_class = 5
    }

    key = jax.random.PRNGKey(0)
    k_x, k_p = jax.random.split(key)
    x = jax.random.normal(k_x, (N, C, H, W), jnp.float32)
    params = init_params(k_p, C, FEATURE_DIM, labels_map)

    ref = _reference_forward(x, params, labels_map,
                             sigmoid_dtype=_sigmoid_dtype())

    # Run 1: auto tiles (single fat spatial step, trivial inner chunk loop).
    out_default = custom_efficientnet_forward(x, params, labels_map)
    # Run 2: force the 2-step spatial reduction AND the 2-chunk inner loop.
    out_tiled = custom_efficientnet_forward(x, params, labels_map,
                                            tile_s=128, chunk_s=64)

    for out in (out_default, out_tiled):
        out = jax.tree_util.tree_map(jax.block_until_ready, out)
        for label in labels_map:
            assert out[label].shape == (N, len(labels_map[label]))
            assert jnp.allclose(out[label], ref[label],
                                atol=2e-3, rtol=2e-3), label

    print("KERNEL_OK")
</pallas_src>

<mosaic_0001>
module attributes {stable_mosaic.version = 11 : i64} {
  func.func @_fused_forward_kernel(%arg0: i32, %arg1: i32, %arg2: memref<2x256x4xbf16, #tpu.memory_space<vmem>>, %arg3: memref<4x32xbf16, #tpu.memory_space<vmem>>, %arg4: memref<1x32xf32, #tpu.memory_space<vmem>>, %arg5: memref<32x128xbf16, #tpu.memory_space<vmem>>, %arg6: memref<1x128xf32, #tpu.memory_space<vmem>>, %arg7: memref<2x128xf32, #tpu.memory_space<vmem>>, %arg8: memref<2x32xf32, #tpu.memory_space<vmem>>) attributes {dimension_semantics = [#tpu.dimension_semantics<parallel>, #tpu.dimension_semantics<arbitrary>], iteration_bounds = array<i64: 1, 1>, scalar_prefetch = 0 : i64, scratch_operands = 1 : i64, tpu.core_type = #tpu.core_type<tc>, window_params = [{transform_indices = @transform_0, window_bounds = array<i64: 2, 256, 4>}, {pipeline_mode = #tpu.pipeline_mode<synchronous>, transform_indices = @transform_1, window_bounds = array<i64: 4, 32>}, {pipeline_mode = #tpu.pipeline_mode<synchronous>, transform_indices = @transform_2, window_bounds = array<i64: 1, 32>}, {pipeline_mode = #tpu.pipeline_mode<synchronous>, transform_indices = @transform_3, window_bounds = array<i64: 32, 128>}, {pipeline_mode = #tpu.pipeline_mode<synchronous>, transform_indices = @transform_4, window_bounds = array<i64: 1, 128>}, {transform_indices = @transform_5, window_bounds = array<i64: 2, 128>}]} {
    %c0_i32 = arith.constant 0 : i32
    %0 = arith.cmpi eq, %arg1, %c0_i32 : i32
    %1 = arith.extui %0 : i1 to i32
    %c0_i32_0 = arith.constant 0 : i32
    %2 = arith.cmpi ne, %1, %c0_i32_0 : i32
    scf.if %2 {
      %cst_15 = arith.constant 0.000000e+00 : f32
      %29 = vector.broadcast %cst_15 : f32 to vector<2x32xf32>
      %c0_16 = arith.constant 0 : index
      %c0_17 = arith.constant 0 : index
      %30 = vector.load %arg8[%c0_16, %c0_17] : memref<2x32xf32, #tpu.memory_space<vmem>>, vector<2x32xf32>
      tpu.vector_store %arg8[%c0_16, %c0_17], %29 {strides = array<i32>} : memref<2x32xf32, #tpu.memory_space<vmem>>, vector<2x32xf32>,
    } else {
    }
    %c0 = arith.constant 0 : index
    %c0_1 = arith.constant 0 : index
    %3 = vector.load %arg3[%c0, %c0_1] : memref<4x32xbf16, #tpu.memory_space<vmem>>, vector<4x32xbf16>
    %c0_2 = arith.constant 0 : index
    %c0_3 = arith.constant 0 : index
    %4 = vector.load %arg4[%c0_2, %c0_3] : memref<1x32xf32, #tpu.memory_space<vmem>>, vector<1x32xf32>
    %c0_i32_4 = arith.constant 0 : i32
    %c256_i32 = arith.constant 256 : i32
    %5 = arith.muli %c0_i32_4, %c256_i32 : i32
    %6 = tpu.assume_multiple %5, 256 : i32
    %c0_5 = arith.constant 0 : index
    %7 = arith.index_cast %6 : i32 to index
    %c0_6 = arith.constant 0 : index
    %8 = vector.load %arg2[%c0_5, %7, %c0_6] : memref<2x256x4xbf16, #tpu.memory_space<vmem>>, vector<2x256x4xbf16>
    %9 = vector.shape_cast %8 : vector<2x256x4xbf16> to vector<512x4xbf16>
    %cst = arith.constant dense<0.000000e+00> : vector<512x32xf32>
    %10 = tpu.matmul %9, %3, %cst {dimension_numbers = #tpu.dot_dimension_numbers<[1], [0], [0], [1], [0, 0, 1, 1], [], []>} : vector<512x4xbf16>, vector<4x32xbf16>, vector<512x32xf32> -> vector<512x32xf32>
    %11 = vector.broadcast %4 : vector<1x32xf32> to vector<512x32xf32>
    %12 = arith.addf %10, %11 : vector<512x32xf32>
    %13 = arith.truncf %12 : vector<512x32xf32> to vector<512x32xbf16>
    %14 = arith.negf %13 : vector<512x32xbf16>
    %15 = math.exp %14 : vector<512x32xbf16>
    %cst_7 = arith.constant 1.000000e+00 : bf16
    %16 = vector.broadcast %cst_7 : bf16 to vector<512x32xbf16>
    %17 = arith.addf %16, %15 : vector<512x32xbf16>
    %18 = arith.divf %16, %17 : vector<512x32xbf16>
    %19 = arith.extf %18 : vector<512x32xbf16> to vector<512x32xf32>
    %20 = arith.mulf %12, %19 : vector<512x32xf32>
    %c0_8 = arith.constant 0 : index
    %c0_9 = arith.constant 0 : index
    %21 = vector.load %arg8[%c0_8, %c0_9] : memref<2x32xf32, #tpu.memory_space<vmem>>, vector<2x32xf32>
    %22 = vector.shape_cast %20 : vector<512x32xf32> to vector<2x256x32xf32>
    %cst_10 = arith.constant dense<0.000000e+00> : vector<2x32xf32>
    %23 = vector.multi_reduction <add>, %22, %cst_10 [1] : vector<2x256x32xf32> to vector<2x32xf32>
    %24 = arith.addf %21, %23 : vector<2x32xf32>
    %c0_11 = arith.constant 0 : index
    %c0_12 = arith.constant 0 : index
    %25 = vector.load %arg8[%c0_11, %c0_12] : memref<2x32xf32, #tpu.memory_space<vmem>>, vector<2x32xf32>
    tpu.vector_store %arg8[%c0_11, %c0_12], %24 {strides = array<i32>} : memref<2x32xf32, #tpu.memory_space<vmem>>, vector<2x32xf32>,
    %c1_i32 = arith.constant 1 : i32
    %c0_i32_13 = arith.constant 0 : i32
    %26 = arith.cmpi eq, %arg1, %c0_i32_13 : i32
    %27 = arith.extui %26 : i1 to i32
    %c0_i32_14 = arith.constant 0 : i32
    %28 = arith.cmpi ne, %27, %c0_i32_14 : i32
    scf.if %28 {
      %c0_15 = arith.constant 0 : index
      %c0_16 = arith.constant 0 : index
      %29 = vector.load %arg8[%c0_15, %c0_16] : memref<2x32xf32, #tpu.memory_space<vmem>>, vector<2x32xf32>
      %cst_17 = arith.constant 3.906250e-03 : f32
      %30 = vector.broadcast %cst_17 : f32 to vector<2x32xf32>
      %31 = arith.mulf %29, %30 : vector<2x32xf32>
      %32 = arith.truncf %31 : vector<2x32xf32> to vector<2x32xbf16>
      %c0_18 = arith.constant 0 : index
      %c0_19 = arith.constant 0 : index
      %33 = vector.load %arg5[%c0_18, %c0_19] : memref<32x128xbf16, #tpu.memory_space<vmem>>, vector<32x128xbf16>
      %cst_20 = arith.constant dense<0.000000e+00> : vector<2x128xf32>
      %34 = tpu.matmul %32, %33, %cst_20 {dimension_numbers = #tpu.dot_dimension_numbers<[1], [0], [0], [1], [0, 0, 1, 1], [], []>} : vector<2x32xbf16>, vector<32x128xbf16>, vector<2x128xf32> -> vector<2x128xf32>
      %c0_21 = arith.constant 0 : index
      %c0_22 = arith.constant 0 : index
      %35 = vector.load %arg6[%c0_21, %c0_22] : memref<1x128xf32, #tpu.memory_space<vmem>>, vector<1x128xf32>
      %36 = vector.broadcast %35 : vector<1x128xf32> to vector<2x128xf32>
      %37 = arith.addf %34, %36 : vector<2x128xf32>
      %c0_23 = arith.constant 0 : index
      %c0_24 = arith.constant 0 : index
      %38 = vector.load %arg7[%c0_23, %c0_24] : memref<2x128xf32, #tpu.memory_space<vmem>>, vector<2x128xf32>
      tpu.vector_store %arg7[%c0_23, %c0_24], %37 {strides = array<i32>} : memref<2x128xf32, #tpu.memory_space<vmem>>, vector<2x128xf32>,
    } else {
    }
    return
  }
  func.func @transform_0(%arg0: i32, %arg1: i32) -> (i32, i32, i32) {
    %c0_i32 = arith.constant 0 : i32
    %c0_i32_0 = arith.constant 0 : i32
    return %arg0, %arg1, %c0_i32 : i32, i32, i32
  }
  func.func @transform_1(%arg0: i32, %arg1: i32) -> (i32, i32) {
    %c0_i32 = arith.constant 0 : i32
    %c0_i32_0 = arith.constant 0 : i32
    %c0_i32_1 = arith.constant 0 : i32
    return %c0_i32, %c0_i32_0 : i32, i32
  }
  func.func @transform_2(%arg0: i32, %arg1: i32) -> (i32, i32) {
    %c0_i32 = arith.constant 0 : i32
    %c0_i32_0 = arith.constant 0 : i32
    %c0_i32_1 = arith.constant 0 : i32
    return %c0_i32, %c0_i32_0 : i32, i32
  }
  func.func @transform_3(%arg0: i32, %arg1: i32) -> (i32, i32) {
    %c0_i32 = arith.constant 0 : i32
    %c0_i32_0 = arith.constant 0 : i32
    %c0_i32_1 = arith.constant 0 : i32
    return %c0_i32, %c0_i32_0 : i32, i32
  }
  func.func @transform_4(%arg0: i32, %arg1: i32) -> (i32, i32) {
    %c0_i32 = arith.constant 0 : i32
    %c0_i32_0 = arith.constant 0 : i32
    %c0_i32_1 = arith.constant 0 : i32
    return %c0_i32, %c0_i32_0 : i32, i32
  }
  func.func @transform_5(%arg0: i32, %arg1: i32) -> (i32, i32) {
    %c0_i32 = arith.constant 0 : i32
    %c0_i32_0 = arith.constant 0 : i32
    return %arg0, %c0_i32 : i32, i32
  }
}

module attributes {stable_mosaic.version = 11 : i64} {
  func.func @_fused_forward_kernel(%arg0: i32, %arg1: i32, %arg2: memref<2x256x4xbf16, #tpu.memory_space<vmem>>, %arg3: memref<4x32xbf16, #tpu.memory_space<vmem>>, %arg4: memref<1x32xf32, #tpu.memory_space<vmem>>, %arg5: memref<32x128xbf16, #tpu.memory_space<vmem>>, %arg6: memref<1x128xf32, #tpu.memory_space<vmem>>, %arg7: memref<2x128xf32, #tpu.memory_space<vmem>>, %arg8: memref<2x32xf32, #tpu.memory_space<vmem>>) attributes {dimension_semantics = [#tpu.dimension_semantics<parallel>, #tpu.dimension_semantics<arbitrary>], iteration_bounds = array<i64: 1, 1>, scalar_prefetch = 0 : i64, scratch_operands = 1 : i64, tpu.core_type = #tpu.core_type<tc>, window_params = [{transform_indices = @transform_0, window_bounds = array<i64: 2, 256, 4>}, {pipeline_mode = #tpu.pipeline_mode<synchronous>, transform_indices = @transform_1, window_bounds = array<i64: 4, 32>}, {pipeline_mode = #tpu.pipeline_mode<synchronous>, transform_indices = @transform_2, window_bounds = array<i64: 1, 32>}, {pipeline_mode = #tpu.pipeline_mode<synchronous>, transform_indices = @transform_3, window_bounds = array<i64: 32, 128>}, {pipeline_mode = #tpu.pipeline_mode<synchronous>, transform_indices = @transform_4, window_bounds = array<i64: 1, 128>}, {transform_indices = @transform_5, window_bounds = array<i64: 2, 128>}]} {
    %c0_i32 = arith.constant 0 : i32
    %0 = arith.cmpi eq, %arg1, %c0_i32 : i32
    %1 = arith.extui %0 : i1 to i32
    %c0_i32_0 = arith.constant 0 : i32
    %2 = arith.cmpi ne, %1, %c0_i32_0 : i32
    scf.if %2 {
      %cst_15 = arith.constant 0.000000e+00 : f32
      %29 = vector.broadcast %cst_15 : f32 to vector<2x32xf32>
      %c0_16 = arith.constant 0 : index
      %c0_17 = arith.constant 0 : index
      %30 = vector.load %arg8[%c0_16, %c0_17] : memref<2x32xf32, #tpu.memory_space<vmem>>, vector<2x32xf32>
      tpu.vector_store %arg8[%c0_16, %c0_17], %29 {strides = array<i32>} : memref<2x32xf32, #tpu.memory_space<vmem>>, vector<2x32xf32>,
    } else {
    }
    %c0 = arith.constant 0 : index
    %c0_1 = arith.constant 0 : index
    %3 = vector.load %arg3[%c0, %c0_1] : memref<4x32xbf16, #tpu.memory_space<vmem>>, vector<4x32xbf16>
    %c0_2 = arith.constant 0 : index
    %c0_3 = arith.constant 0 : index
    %4 = vector.load %arg4[%c0_2, %c0_3] : memref<1x32xf32, #tpu.memory_space<vmem>>, vector<1x32xf32>
    %c0_i32_4 = arith.constant 0 : i32
    %c256_i32 = arith.constant 256 : i32
    %5 = arith.muli %c0_i32_4, %c256_i32 : i32
    %6 = tpu.assume_multiple %5, 256 : i32
    %c0_5 = arith.constant 0 : index
    %7 = arith.index_cast %6 : i32 to index
    %c0_6 = arith.constant 0 : index
    %8 = vector.load %arg2[%c0_5, %7, %c0_6] : memref<2x256x4xbf16, #tpu.memory_space<vmem>>, vector<2x256x4xbf16>
    %9 = vector.shape_cast %8 : vector<2x256x4xbf16> to vector<512x4xbf16>
    %cst = arith.constant dense<0.000000e+00> : vector<512x32xf32>
    %10 = tpu.matmul %9, %3, %cst {dimension_numbers = #tpu.dot_dimension_numbers<[1], [0], [0], [1], [0, 0, 1, 1], [], []>} : vector<512x4xbf16>, vector<4x32xbf16>, vector<512x32xf32> -> vector<512x32xf32>
    %11 = vector.broadcast %4 : vector<1x32xf32> to vector<512x32xf32>
    %12 = arith.addf %10, %11 : vector<512x32xf32>
    %13 = arith.truncf %12 : vector<512x32xf32> to vector<512x32xbf16>
    %14 = arith.negf %13 : vector<512x32xbf16>
    %15 = math.exp %14 : vector<512x32xbf16>
    %cst_7 = arith.constant 1.000000e+00 : bf16
    %16 = vector.broadcast %cst_7 : bf16 to vector<512x32xbf16>
    %17 = arith.addf %16, %15 : vector<512x32xbf16>
    %18 = arith.divf %16, %17 : vector<512x32xbf16>
    %19 = arith.extf %18 : vector<512x32xbf16> to vector<512x32xf32>
    %20 = arith.mulf %12, %19 : vector<512x32xf32>
    %c0_8 = arith.constant 0 : index
    %c0_9 = arith.constant 0 : index
    %21 = vector.load %arg8[%c0_8, %c0_9] : memref<2x32xf32, #tpu.memory_space<vmem>>, vector<2x32xf32>
    %22 = vector.shape_cast %20 : vector<512x32xf32> to vector<2x256x32xf32>
    %cst_10 = arith.constant dense<0.000000e+00> : vector<2x32xf32>
    %23 = vector.multi_reduction <add>, %22, %cst_10 [1] : vector<2x256x32xf32> to vector<2x32xf32>
    %24 = arith.addf %21, %23 : vector<2x32xf32>
    %c0_11 = arith.constant 0 : index
    %c0_12 = arith.constant 0 : index
    %25 = vector.load %arg8[%c0_11, %c0_12] : memref<2x32xf32, #tpu.memory_space<vmem>>, vector<2x32xf32>
    tpu.vector_store %arg8[%c0_11, %c0_12], %24 {strides = array<i32>} : memref<2x32xf32, #tpu.memory_space<vmem>>, vector<2x32xf32>,
    %c1_i32 = arith.constant 1 : i32
    %c0_i32_13 = arith.constant 0 : i32
    %26 = arith.cmpi eq, %arg1, %c0_i32_13 : i32
    %27 = arith.extui %26 : i1 to i32
    %c0_i32_14 = arith.constant 0 : i32
    %28 = arith.cmpi ne, %27, %c0_i32_14 : i32
    scf.if %28 {
      %c0_15 = arith.constant 0 : index
      %c0_16 = arith.constant 0 : index
      %29 = vector.load %arg8[%c0_15, %c0_16] : memref<2x32xf32, #tpu.memory_space<vmem>>, vector<2x32xf32>
      %cst_17 = arith.constant 3.906250e-03 : f32
      %30 = vector.broadcast %cst_17 : f32 to vector<2x32xf32>
      %31 = arith.mulf %29, %30 : vector<2x32xf32>
      %32 = arith.truncf %31 : vector<2x32xf32> to vector<2x32xbf16>
      %c0_18 = arith.constant 0 : index
      %c0_19 = arith.constant 0 : index
      %33 = vector.load %arg5[%c0_18, %c0_19] : memref<32x128xbf16, #tpu.memory_space<vmem>>, vector<32x128xbf16>
      %cst_20 = arith.constant dense<0.000000e+00> : vector<2x128xf32>
      %34 = tpu.matmul %32, %33, %cst_20 {dimension_numbers = #tpu.dot_dimension_numbers<[1], [0], [0], [1], [0, 0, 1, 1], [], []>} : vector<2x32xbf16>, vector<32x128xbf16>, vector<2x128xf32> -> vector<2x128xf32>
      %c0_21 = arith.constant 0 : index
      %c0_22 = arith.constant 0 : index
      %35 = vector.load %arg6[%c0_21, %c0_22] : memref<1x128xf32, #tpu.memory_space<vmem>>, vector<1x128xf32>
      %36 = vector.broadcast %35 : vector<1x128xf32> to vector<2x128xf32>
      %37 = arith.addf %34, %36 : vector<2x128xf32>
      %c0_23 = arith.constant 0 : index
      %c0_24 = arith.constant 0 : index
      %38 = vector.load %arg7[%c0_23, %c0_24] : memref<2x128xf32, #tpu.memory_space<vmem>>, vector<2x128xf32>
      tpu.vector_store %arg7[%c0_23, %c0_24], %37 {strides = array<i32>} : memref<2x128xf32, #tpu.memory_space<vmem>>, vector<2x128xf32>,
    } else {
    }
    return
  }
  func.func @transform_0(%arg0: i32, %arg1: i32) -> (i32, i32, i32) {
    %c0_i32 = arith.constant 0 : i32
    %c0_i32_0 = arith.constant 0 : i32
    return %arg0, %arg1, %c0_i32 : i32, i32, i32
  }
  func.func @transform_1(%arg0: i32, %arg1: i32) -> (i32, i32) {
    %c0_i32 = arith.constant 0 : i32
    %c0_i32_0 = arith.constant 0 : i32
    %c0_i32_1 = arith.constant 0 : i32
    return %c0_i32, %c0_i32_0 : i32, i32
  }
  func.func @transform_2(%arg0: i32, %arg1: i32) -> (i32, i32) {
    %c0_i32 = arith.constant 0 : i32
    %c0_i32_0 = arith.constant 0 : i32
    %c0_i32_1 = arith.constant 0 : i32
    return %c0_i32, %c0_i32_0 : i32, i32
  }
  func.func @transform_3(%arg0: i32, %arg1: i32) -> (i32, i32) {
    %c0_i32 = arith.constant 0 : i32
    %c0_i32_0 = arith.constant 0 : i32
    %c0_i32_1 = arith.constant 0 : i32
    return %c0_i32, %c0_i32_0 : i32, i32
  }
  func.func @transform_4(%arg0: i32, %arg1: i32) -> (i32, i32) {
    %c0_i32 = arith.constant 0 : i32
    %c0_i32_0 = arith.constant 0 : i32
    %c0_i32_1 = arith.constant 0 : i32
    return %c0_i32, %c0_i32_0 : i32, i32
  }
  func.func @transform_5(%arg0: i32, %arg1: i32) -> (i32, i32) {
    %c0_i32 = arith.constant 0 : i32
    %c0_i32_0 = arith.constant 0 : i32
    return %arg0, %c0_i32 : i32, i32
  }
}

</mosaic_0001>

<bundles_post_ra>
// kernel: tpu_custom_call.1
= control target key start
LH: loop header
LB: loop body
LE: loop exit
PB: predicated region body
PF: predicated region fallthrough
CT: control target
= control target key end

     0   :  { %vm355_vm0 = vcmask 1041408   ;;  %vm258_vm1 = vcmask 31744   ;;  %s3503_s0 = inlined_call_operand.vmem [shape: bf16[2,256,4], index: 0, kind: input, shape index: {}]   ;;  %s3504_s1 = inlined_call_operand.vmem [shape: bf16[4,32], index: 1, kind: input, shape index: {}]   ;;  %s3505_s2 = inlined_call_operand.vmem [shape: f32[1,32], index: 2, kind: input, shape index: {}]   ;;  %s3506_s3 = inlined_call_operand.vmem [shape: bf16[32,128], index: 3, kind: input, shape index: {}]   ;;  %s3507_s4 = inlined_call_operand.vmem [shape: f32[1,128], index: 4, kind: input, shape index: {}]   ;;  %s3508_s5 = inlined_call_operand.hbm [shape: f32[2,128], index: 5, kind: output, shape index: {}]  }
   0x1   :  { %v29_v0 = vld [vmem:[%s3504_s1] sm:$0x3]  ;;  %v2072_v3 = vld [vmem:[%s3503_s0 + $0x70] sm:$0xff]  ;;  %v2081_v4 = vld [vmem:[%s3503_s0 + $0xb8] sm:$0xff] }
   0x2   :  { %v357_v1 = vsel %vm355_vm0, %v29_v0, 0  ;;  %v2058_v2 = vld [vmem:[%s3503_s0] sm:$0xff] }
   0x3   :  { %366 = vmatpush.bf16.msra.mxu0 %v357_v1  ;;  %2093 = vmatpush.bf16.msra.mxu2 %v357_v1 }
   0x4   :  { %2094 = vmatpush.bf16.msra.mxu3 %v357_v1  ;;  %2092 = vmatpush.bf16.msra.mxu1 %v357_v1 }
   0x5   :  { %10 = vsyncpa [#allocation4], 0  ;;  %v2059_v5 = vld [vmem:[%s3503_s0 + $0x8] sm:$0xff]  ;;  %v2073_v6 = vld [vmem:[%s3503_s0 + $0x78] sm:$0xff]  ;;  %vm1683_vm2 = vcmask 261120   ;;  %vm27_vm3 = vcmask 254976  }
   0x6   :  { %2017 = vmatmul.msk.bf16.vlgmr.msra.gmra.mxu0 %vm258_vm1, %v2058_v2  ;;  %2031 = vmatmul.msk.bf16.vlgmr.msra.gmra.mxu2 %vm258_vm1, %v2072_v3  ;;  %v2082_v7 = vld [vmem:[%s3503_s0 + $0xc0] sm:$0xff]  ;;  %v2067_v8 = vld [vmem:[%s3503_s0 + $0x48] sm:$0xff]  ;;  %v2060_v9 = vld [vmem:[%s3503_s0 + $0x10] sm:$0xff]  ;;  %vm1824_vm4 = vcmask 1041409   ;;  %s2514_s15 = smov [#allocation3]   ;;  %s1880_s19 = sshll.u32 %s3508_s5, 4  ;;  %s1881_s19 = int_to_ptr.hbm [resolvable:$true] %s1880_s19 }
   0x7   :  { %2040 = vmatmul.msk.bf16.vlgmr.msra.gmra.mxu3 %vm258_vm1, %v2081_v4  ;;  %2026 = vmatmul.msk.bf16.vlgmr.msra.gmra.mxu1 %vm258_vm1, %v2067_v8  ;;  %v2074_v10 = vld [vmem:[%s3503_s0 + $0x80] sm:$0xff]  ;;  %v2083_v11 = vld [vmem:[%s3503_s0 + $0xc8] sm:$0xff]  ;;  %v2068_v12 = vld [vmem:[%s3503_s0 + $0x50] sm:$0xff]  ;;  %s1878_s16 = sshll.u32 %s2514_s15, 4  ;;  %s1879_s16 = int_to_ptr.vmem [resolvable:$true] %s1878_s16 }
   0x8   :  { %v2061_v13 = vld [vmem:[%s3503_s0 + $0x18] sm:$0xff]  ;;  %v2075_v14 = vld [vmem:[%s3503_s0 + $0x88] sm:$0xff]  ;;  %v2084_v15 = vld [vmem:[%s3503_s0 + $0xd0] sm:$0xff] }
   0x9   :  { %v2069_v16 = vld [vmem:[%s3503_s0 + $0x58] sm:$0xff]  ;;  %v2062_v17 = vld [vmem:[%s3503_s0 + $0x20] sm:$0xff]  ;;  %v2076_v18 = vld [vmem:[%s3503_s0 + $0x90] sm:$0xff] }
   0xa   :  { %v2085_v19 = vld [vmem:[%s3503_s0 + $0xd8] sm:$0xff]  ;;  %v2070_v20 = vld [vmem:[%s3503_s0 + $0x60] sm:$0xff]  ;;  %v2063_v21 = vld [vmem:[%s3503_s0 + $0x28] sm:$0xff] }
   0xb   :  { %v2077_v22 = vld [vmem:[%s3503_s0 + $0x98] sm:$0xff]  ;;  %v2086_v23 = vld [vmem:[%s3503_s0 + $0xe0] sm:$0xff]  ;;  %v2071_v24 = vld [vmem:[%s3503_s0 + $0x68] sm:$0xff] }
   0xc   :  { %v2064_v25 = vld [vmem:[%s3503_s0 + $0x30] sm:$0xff]  ;;  %v2078_v26 = vld [vmem:[%s3503_s0 + $0xa0] sm:$0xff]  ;;  %v2087_v27 = vld [vmem:[%s3503_s0 + $0xe8] sm:$0xff] }
   0xd   :  { %v2065_v28 = vld [vmem:[%s3503_s0 + $0x38] sm:$0xff]  ;;  %v2079_v29 = vld [vmem:[%s3503_s0 + $0xa8] sm:$0xff]  ;;  %v2088_v30 = vld [vmem:[%s3503_s0 + $0xf0] sm:$0xff] }
   0xe   :  { %v2667_v31 = vld [vmem:[%s3505_s2] ss:$0 sm:$0xff]  ;;  %v2080_v33 = vld [vmem:[%s3503_s0 + $0xb0] sm:$0xff]  ;;  %v2089_v35 = vld [vmem:[%s3503_s0 + $0xf8] sm:$0xff] }
   0xf   :  { %v2066_v32 = vld [vmem:[%s3503_s0 + $0x40] sm:$0xff] }
  0x16   :  { %2018 = vmatmul.msk.bf16.gmra.mxu0 %vm258_vm1, %v2059_v5  ;;  %2032 = vmatmul.msk.bf16.gmra.mxu2 %vm258_vm1, %v2073_v6 }
  0x17   :  { %2041 = vmatmul.msk.bf16.gmra.mxu3 %vm258_vm1, %v2082_v7  ;;  %2027 = vmatmul.msk.bf16.gmra.mxu1 %vm258_vm1, %v2068_v12  ;;  %v2512_v7 = vmov 1065369472  }
  0x18   :  { %v2703_v8 = vunpack.c.h.bf16 %v2512_v7 }
  0x26   :  { %2019 = vmatmul.msk.bf16.gmra.mxu0 %vm258_vm1, %v2060_v9  ;;  %2033 = vmatmul.msk.bf16.gmra.mxu2 %vm258_vm1, %v2074_v10  ;;  %v2705_v9 = vunpack.c.l.bf16 %v2512_v7 }
  0x27   :  { %2042 = vmatmul.msk.bf16.gmra.mxu3 %vm258_vm1, %v2083_v11  ;;  %2028 = vmatmul.msk.bf16.gmra.mxu1 %vm258_vm1, %v2069_v16 }
  0x36   :  { %2020 = vmatmul.msk.bf16.gmra.mxu0 %vm258_vm1, %v2061_v13  ;;  %2034 = vmatmul.msk.bf16.gmra.mxu2 %vm258_vm1, %v2075_v14 }
  0x37   :  { %2043 = vmatmul.msk.bf16.gmra.mxu3 %vm258_vm1, %v2084_v15  ;;  %2029 = vmatmul.msk.bf16.gmra.mxu1 %vm258_vm1, %v2070_v20 }
  0x46   :  { %2021 = vmatmul.msk.bf16.gmra.mxu0 %vm258_vm1, %v2062_v17  ;;  %2035 = vmatmul.msk.bf16.gmra.mxu2 %vm258_vm1, %v2076_v18 }
  0x47   :  { %2044 = vmatmul.msk.bf16.gmra.mxu3 %vm258_vm1, %v2085_v19  ;;  %2030 = vmatmul.msk.bf16.gmra.mxu1 %vm258_vm1, %v2071_v24 }
  0x56   :  { %2022 = vmatmul.msk.bf16.gmra.mxu0 %vm258_vm1, %v2063_v21  ;;  %2036 = vmatmul.msk.bf16.gmra.mxu2 %vm258_vm1, %v2077_v22 }
  0x57   :  { %2045 = vmatmul.msk.bf16.gmra.mxu3 %vm258_vm1, %v2086_v23 }
  0x66   :  { %2023 = vmatmul.msk.bf16.gmra.mxu0 %vm258_vm1, %v2064_v25  ;;  %2037 = vmatmul.msk.bf16.gmra.mxu2 %vm258_vm1, %v2078_v26 }
  0x67   :  { %2046 = vmatmul.msk.bf16.gmra.mxu3 %vm258_vm1, %v2087_v27 }
  0x76   :  { %2024 = vmatmul.msk.bf16.gmra.mxu0 %vm258_vm1, %v2065_v28  ;;  %2038 = vmatmul.msk.bf16.gmra.mxu2 %vm258_vm1, %v2079_v29 }
  0x77   :  { %2047 = vmatmul.msk.bf16.gmra.mxu3 %vm258_vm1, %v2088_v30 }
  0x83   :  { %v368_v34 = vpop.f32.mrf.mxu0 }
  0x84   :  { %v2679_v36 = vadd.f32 %v2667_v31, %v368_v34 }
  0x86   :  { %v528_v37 = vpack.c.bf16 %v2679_v36, %v2679_v36  ;;  %2025 = vmatmul.msk.bf16.gmra.mxu0 %vm258_vm1, %v2066_v32  ;;  %2039 = vmatmul.msk.bf16.gmra.mxu2 %vm258_vm1, %v2080_v33 }
  0x87   :  { %2048 = vmatmul.msk.bf16.gmra.mxu3 %vm258_vm1, %v2089_v35 }
  0x88   :  { %v592_v38 = vxor.u32 2147516416, %v528_v37 }
  0x89   :  { %v438_v46 = vpop.f32.mrf.mxu2 }
  0x8a   :  { %v656_v39 = vunpack.c.l.bf16 %v592_v38  ;;  %v483_v27 = vpop.f32.mrf.mxu3  ;;  %v2716_v35 = vadd.f32 %v2667_v31, %v438_v46 }
  0x8b   :  { %v370_v40 = vpop.f32.mrf.mxu0  ;;  %v2719_v37 = vadd.f32 %v2667_v31, %v483_v27 }
  0x8c   :  { %v720_v41 = vmul.f32 1.442695, %v656_v39  ;;  %v2687_v42 = vadd.f32 %v2667_v31, %v370_v40 }
  0x8e   :  { %2100 = vpow2.f32 %v720_v41  ;;  %v529_v43 = vpack.c.bf16 %v2687_v42, %v2687_v42  ;;  %v556_v41 = vpack.c.bf16 %v2716_v35, %v2716_v35 }
  0x90   :  { %v593_v44 = vxor.u32 2147516416, %v529_v43  ;;  %v574_v43 = vpack.c.bf16 %v2719_v37, %v2719_v37 }
  0x91   :  { %v2696_v63 = vpop.f32.mrf.mxu2 }
  0x92   :  { %v657_v45 = vunpack.c.l.bf16 %v593_v44 }
  0x93   :  { %v373_v47 = vpop.f32.mrf.mxu0 }
  0x94   :  { %v2101_v48 = vpop.eup %2100  ;;  %v722_v49 = vmul.f32 1.442695, %v657_v45  ;;  %v2692_v50 = vadd.f32 %v2667_v31, %v373_v47 }
  0x95   :  { %v848_v51 = vpack.c.bf16 %v2101_v48, %v2101_v48 }
  0x96   :  { %2102 = vpow2.f32 %v722_v49  ;;  %v530_v52 = vpack.c.bf16 %v2692_v50, %v2692_v50 }
  0x97   :  { %v912_v53 = vunpack.c.l.bf16 %v848_v51 }
  0x98   :  { %v594_v54 = vxor.u32 2147516416, %v530_v52  ;;  %v620_v52 = vxor.u32 2147516416, %v556_v41 }
  0x99   :  { %v976_v55 = vadd.f32 1.0, %v912_v53  ;;  %v2707_v15 = vpop.f32.mrf.mxu2  ;;  %v638_v53 = vxor.u32 2147516416, %v574_v43 }
  0x9a   :  { %v658_v56 = vunpack.c.l.bf16 %v594_v54 }
  0x9b   :  { %v1040_v57 = vpack.c.bf16 %v976_v55, %v976_v55  ;;  %v375_v59 = vpop.f32.mrf.mxu0 }
  0x9c   :  { %v2103_v58 = vpop.eup %2102  ;;  %v724_v0 = vmul.f32 1.442695, %v658_v56  ;;  %v2699_v2 = vadd.f32 %v2667_v31, %v375_v59 }
  0x9d   :  { %v1106_v60 = vunpack.c.h.bf16 %v1040_v57  ;;  %v1107_v61 = vunpack.c.l.bf16 %v1040_v57  ;;  %v849_v62 = vpack.c.bf16 %v2103_v58, %v2103_v58 }
  0x9e   :  { %v531_v4 = vpack.c.bf16 %v2699_v2, %v2699_v2 }
  0x9f   :  { %2104 = vrcp.f32 %v1106_v60  ;;  %v913_v1 = vunpack.c.l.bf16 %v849_v62  ;;  %v684_v62 = vunpack.c.l.bf16 %v620_v52 }
  0xa0   :  { %2106 = vrcp.f32 %v1107_v61  ;;  %v595_v13 = vxor.u32 2147516416, %v531_v4  ;;  %v2741_v4 = vadd.f32 %v2667_v31, %v2696_v63 }
  0xa1   :  { %v977_v3 = vadd.f32 1.0, %v913_v1  ;;  %2108 = vpow2.f32 %v724_v0  ;;  %v2713_v32 = vpop.f32.mrf.mxu2  ;;  %v702_v0 = vunpack.c.l.bf16 %v638_v53  ;;  %v2768_v53 = vadd.f32 %v2667_v31, %v2707_v15 }
  0xa2   :  { %v659_v20 = vunpack.c.l.bf16 %v595_v13 }
  0xa3   :  { %v1041_v5 = vpack.c.bf16 %v977_v3, %v977_v3  ;;  %v378_v49 = vpop.f32.mrf.mxu0  ;;  %v558_v15 = vpack.c.bf16 %v2768_v53, %v2768_v53 }
  0xa4   :  { %v726_v23 = vmul.f32 1.442695, %v659_v20  ;;  %v2731_v58 = vadd.f32 %v2667_v31, %v378_v49 }
  0xa5   :  { %v2105_v6 = vpop.eup %2104  ;;  %v1113_v10 = vunpack.c.h.bf16 %v1041_v5  ;;  %v1114_v12 = vunpack.c.l.bf16 %v1041_v5 }
  0xa6   :  { %v2107_v11 = vpop.eup %2106  ;;  %v1109_v17 = vmul.f32 %v2105_v6, %v2703_v8  ;;  %v532_v60 = vpack.c.bf16 %v2731_v58, %v2731_v58  ;;  %v485_v6 = vpop.f32.mrf.mxu3 }
  0xa7   :  { %v2109_v14 = vpop.eup %2108  ;;  %v1111_v18 = vmul.f32 %v2107_v11, %v2705_v9  ;;  %2110 = vrcp.f32 %v1113_v10 }
  0xa8   :  { %v850_v16 = vpack.c.bf16 %v2109_v14, %v2109_v14  ;;  %2112 = vrcp.f32 %v1114_v12  ;;  %v596_v5 = vxor.u32 2147516416, %v532_v60  ;;  %v776_v14 = vmul.f32 1.442695, %v684_v62 }
  0xa9   :  { %v1112_v22 = vpack.c.bf16 %v1109_v17, %v1111_v18  ;;  %2114 = vpow2.f32 %v726_v23  ;;  %v448_v56 = vpop.f32.mrf.mxu2  ;;  %v557_v18 = vpack.c.bf16 %v2741_v4, %v2741_v4 }
  0xaa   :  { %v914_v19 = vunpack.c.l.bf16 %v850_v16  ;;  %v2737_v61 = vadd.f32 %v2667_v31, %v448_v56  ;;  %v660_v12 = vunpack.c.l.bf16 %v596_v5  ;;  %v812_v16 = vmul.f32 1.442695, %v702_v0 }
  0xab   :  { %v1554_v29 = vunpack.c.l.bf16 %v1112_v22  ;;  %v380_v20 = vpop.f32.mrf.mxu0 }
  0xac   :  { %v978_v21 = vadd.f32 1.0, %v914_v19  ;;  %v560_v13 = vpack.c.bf16 %v2737_v61, %v2737_v61  ;;  %v728_v63 = vmul.f32 1.442695, %v660_v12 }
  0xad   :  { %v2111_v24 = vpop.eup %2110  ;;  %v1618_v39 = vmul.f32 %v1554_v29, %v2679_v36 }
  0xae   :  { %v1042_v25 = vpack.c.bf16 %v978_v21, %v978_v21  ;;  %v2113_v26 = vpop.eup %2112  ;;  %v1116_v28 = vmul.f32 %v2111_v24, %v2703_v8  ;;  %v624_v19 = vxor.u32 2147516416, %v560_v13  ;;  %v2750_v24 = vadd.f32 %v2667_v31, %v485_v6 }
  0xaf   :  { %v1118_v30 = vmul.f32 %v2113_v26, %v2705_v9  ;;  %v2115_v45 = vpop.eup %2114  ;;  %v1684_v46 = vsel %vm1683_vm2, %v1618_v39, 0.0  ;;  %v621_v26 = vxor.u32 2147516416, %v557_v18  ;;  %v488_v39 = vpop.f32.mrf.mxu3 }
  0xb0   :  { %v1120_v33 = vunpack.c.h.bf16 %v1042_v25  ;;  %v1121_v34 = vunpack.c.l.bf16 %v1042_v25  ;;  %v851_v48 = vpack.c.bf16 %v2115_v45, %v2115_v45  ;;  %v688_v25 = vunpack.c.l.bf16 %v624_v19 }
  0xb1   :  { %v1119_v38 = vpack.c.bf16 %v1116_v28, %v1118_v30  ;;  %v450_v22 = vpop.f32.mrf.mxu2  ;;  %v2778_v12 = vadd.f32 %v2667_v31, %v488_v39 }
  0xb2   :  { %2116 = vrcp.f32 %v1120_v33  ;;  %v915_v55 = vunpack.c.l.bf16 %v851_v48  ;;  %v2756_v27 = vadd.f32 %v2667_v31, %v450_v22  ;;  %v784_v29 = vmul.f32 1.442695, %v688_v25 }
  0xb3   :  { %v1555_v40 = vunpack.c.l.bf16 %v1119_v38  ;;  %2118 = vrcp.f32 %v1121_v34  ;;  %v575_v38 = vpack.c.bf16 %v2750_v24, %v2750_v24  ;;  %v383_v56 = vpop.f32.mrf.mxu0  ;;  %v622_v22 = vxor.u32 2147516416, %v558_v15 }
  0xb4   :  { %v979_v59 = vadd.f32 1.0, %v915_v55  ;;  %v561_v41 = vpack.c.bf16 %v2756_v27, %v2756_v27  ;;  %v2772_v5 = vadd.f32 %v2667_v31, %v383_v56 }
  0xb5   :  { %v1619_v44 = vmul.f32 %v1555_v40, %v2687_v42  ;;  %v639_v52 = vxor.u32 2147516416, %v575_v38 }
  0xb6   :  { %v1043_v3 = vpack.c.bf16 %v979_v59, %v979_v59 }
  0xb7   :  { %v1685_v47 = vsel %vm1683_vm2, %v1619_v44, 0.0  ;;  %v685_v44 = vunpack.c.l.bf16 %v621_v26 }
  0xb8   :  { %v2117_v51 = vpop.eup %2116  ;;  %v1686_v36 = vadd.f32 %v1685_v47, %v1684_v46  ;;  %v1127_v10 = vunpack.c.h.bf16 %v1043_v3  ;;  %v1128_v11 = vunpack.c.l.bf16 %v1043_v3 }
  0xb9   :  { %v1123_v54 = vmul.f32 %v2117_v51, %v2703_v8  ;;  %v2119_v57 = vpop.eup %2118 }
  0xba   :  { %v1125_v42 = vmul.f32 %v2119_v57, %v2705_v9  ;;  %2120 = vrcp.f32 %v1127_v10  ;;  %v778_v57 = vmul.f32 1.442695, %v685_v44 }
  0xbb   :  { %2122 = vrcp.f32 %v1128_v11 }
  0xbc   :  { %v1126_v1 = vpack.c.bf16 %v1123_v54, %v1125_v42  ;;  %2124 = vpow2.f32 %v728_v63 }
  0xbd   :  { %2126 = vpow2.f32 %v776_v14 }
  0xbe   :  { %v1556_v7 = vunpack.c.l.bf16 %v1126_v1  ;;  %2128 = vpow2.f32 %v812_v16 }
  0xbf   :  { %2130 = vpow2.f32 %v784_v29 }
  0xc0   :  { %v1620_v17 = vmul.f32 %v1556_v7, %v2692_v50  ;;  %v2753_v50 = vadd.f32 %v2667_v31, %v380_v20  ;;  %v2121_v28 = vpop.eup %2120  ;;  %v703_v7 = vunpack.c.l.bf16 %v639_v52  ;;  %v534_v20 = vpack.c.bf16 %v2772_v5, %v2772_v5 }
  0xc1   :  { %v2123_v30 = vpop.eup %2122  ;;  %v1130_v33 = vmul.f32 %v2121_v28, %v2703_v8 }
  0xc2   :  { %v1687_v21 = vsel %vm1683_vm2, %v1620_v17, 0.0  ;;  %v533_v34 = vpack.c.bf16 %v2753_v50, %v2753_v50  ;;  %v1132_v40 = vmul.f32 %v2123_v30, %v2705_v9  ;;  %v2125_v43 = vpop.eup %2124  ;;  %v2782_v17 = vpop.f32.mrf.mxu3  ;;  %v598_v28 = vxor.u32 2147516416, %v534_v20 }
  0xc3   :  { %v1688_v23 = vadd.f32 %v1687_v21, %v1686_v36  ;;  %v2127_v46 = vpop.eup %2126  ;;  %v852_v48 = vpack.c.bf16 %v2125_v43, %v2125_v43  ;;  %v625_v36 = vxor.u32 2147516416, %v561_v41  ;;  %v814_v21 = vmul.f32 1.442695, %v703_v7 }
  0xc4   :  { %v597_v45 = vxor.u32 2147516416, %v533_v34  ;;  %v1133_v47 = vpack.c.bf16 %v1130_v33, %v1132_v40  ;;  %v2129_v49 = vpop.eup %2128  ;;  %v876_v60 = vpack.c.bf16 %v2127_v46, %v2127_v46  ;;  %v453_v34 = vpop.f32.mrf.mxu2  ;;  %v662_v40 = vunpack.c.l.bf16 %v598_v28 }
  0xc5   :  { %v916_v55 = vunpack.c.l.bf16 %v852_v48  ;;  %v689_v59 = vunpack.c.l.bf16 %v625_v36  ;;  %v894_v62 = vpack.c.bf16 %v2129_v49, %v2129_v49  ;;  %v2131_v6 = vpop.eup %2130  ;;  %v686_v41 = vunpack.c.l.bf16 %v622_v22 }
  0xc6   :  { %v661_v51 = vunpack.c.l.bf16 %v597_v45  ;;  %v1557_v54 = vunpack.c.l.bf16 %v1133_v47  ;;  %v940_v14 = vunpack.c.l.bf16 %v876_v60  ;;  %v2791_v48 = vadd.f32 %v2667_v31, %v453_v34 }
  0xc7   :  { %v980_v1 = vadd.f32 1.0, %v916_v55  ;;  %v786_v3 = vmul.f32 1.442695, %v689_v59  ;;  %v958_v16 = vunpack.c.l.bf16 %v894_v62 }
  0xc8   :  { %v730_v42 = vmul.f32 1.442695, %v661_v51  ;;  %v1621_v0 = vmul.f32 %v1557_v54, %v2699_v2  ;;  %v880_v2 = vpack.c.bf16 %v2131_v6, %v2131_v6  ;;  %v1004_v29 = vadd.f32 1.0, %v940_v14 }
  0xc9   :  { %v1044_v11 = vpack.c.bf16 %v980_v1, %v980_v1  ;;  %v1022_v30 = vadd.f32 1.0, %v958_v16  ;;  %v562_v6 = vpack.c.bf16 %v2791_v48, %v2791_v48 }
  0xca   :  { %2132 = vpow2.f32 %v730_v42  ;;  %v1689_v10 = vsel %vm1683_vm2, %v1621_v0, 0.0  ;;  %v944_v19 = vunpack.c.l.bf16 %v880_v2  ;;  %v2793_v51 = vpack.c.bf16 %v1004_v29, %v1004_v29  ;;  %v493_v60 = vpop.f32.mrf.mxu3 }
  0xcb   :  { %2134 = vpow2.f32 %v778_v57  ;;  %v2780_v13 = vadd.f32 %v1689_v10, %v1688_v23  ;;  %v1134_v18 = vunpack.c.h.bf16 %v1044_v11  ;;  %v1135_v63 = vunpack.c.l.bf16 %v1044_v11 }
  0xcc   :  { %2136 = vpow2.f32 %v786_v3  ;;  %v576_v23 = vpack.c.bf16 %v2778_v12, %v2778_v12  ;;  %v1008_v26 = vadd.f32 1.0, %v944_v19  ;;  %v2795_v36 = vpack.c.bf16 %v1022_v30, %v1022_v30 }
  0xcd   :  { %2138 = vrcp.f32 %v1134_v18  ;;  %v732_v57 = vmul.f32 1.442695, %v662_v40  ;;  %v780_v0 = vmul.f32 1.442695, %v686_v41  ;;  %v1302_v15 = vunpack.c.h.bf16 %v2793_v51 }
  0xce   :  { %2140 = vrcp.f32 %v1135_v63  ;;  %v1072_v39 = vpack.c.bf16 %v1008_v26, %v1008_v26  ;;  %v2788_v45 = vxor.u32 2147516416, %v576_v23  ;;  %v2805_v10 = vadd.f32 %v2667_v31, %v2713_v32 }
  0xcf   :  { %2142 = vpow2.f32 %v814_v21  ;;  %v1303_v14 = vunpack.c.l.bf16 %v2793_v51  ;;  %v626_v20 = vxor.u32 2147516416, %v562_v6  ;;  %v1428_v22 = vunpack.c.h.bf16 %v2795_v36 }
  0xd0   :  { %v2133_v25 = vpop.eup %2132  ;;  %v1330_v46 = vunpack.c.h.bf16 %v1072_v39  ;;  %v1331_v47 = vunpack.c.l.bf16 %v1072_v39  ;;  %v704_v1 = vunpack.c.l.bf16 %v2788_v45  ;;  %v559_v28 = vpack.c.bf16 %v2805_v10, %v2805_v10 }
  0xd1   :  { %v853_v33 = vpack.c.bf16 %v2133_v25, %v2133_v25  ;;  %v2135_v38 = vpop.eup %2134  ;;  %v1429_v25 = vunpack.c.l.bf16 %v2795_v36  ;;  %v690_v30 = vunpack.c.l.bf16 %v626_v20 }
  0xd2   :  { %v2137_v44 = vpop.eup %2136  ;;  %2144 = vrcp.f32 %v1330_v46  ;;  %v877_v42 = vpack.c.bf16 %v2135_v38, %v2135_v38 }
  0xd3   :  { %v917_v43 = vunpack.c.l.bf16 %v853_v33  ;;  %v2139_v49 = vpop.eup %2138  ;;  %v881_v56 = vpack.c.bf16 %v2137_v44, %v2137_v44  ;;  %2146 = vrcp.f32 %v1331_v47  ;;  %v2815_v33 = vadd.f32 %v2667_v31, %v2782_v17  ;;  %v495_v17 = vpop.f32.mrf.mxu3 }
  0xd4   :  { %v2141_v54 = vpop.eup %2140  ;;  %v1137_v55 = vmul.f32 %v2139_v49, %v2703_v8  ;;  %2148 = vpow2.f32 %v732_v57  ;;  %v941_v63 = vunpack.c.l.bf16 %v877_v42  ;;  %v788_v41 = vmul.f32 1.442695, %v690_v30 }
  0xd5   :  { %v981_v52 = vadd.f32 1.0, %v917_v43  ;;  %v1139_v59 = vmul.f32 %v2141_v54, %v2705_v9  ;;  %v945_v3 = vunpack.c.l.bf16 %v881_v56  ;;  %v2143_v7 = vpop.eup %2142  ;;  %v623_v49 = vxor.u32 2147516416, %v559_v28 }
  0xd6   :  { %v895_v26 = vpack.c.bf16 %v2143_v7, %v2143_v7  ;;  %v1005_v39 = vadd.f32 1.0, %v941_v63  ;;  %v2824_v54 = vadd.f32 %v2667_v31, %v493_v60  ;;  %v816_v60 = vmul.f32 1.442695, %v704_v1 }
  0xd7   :  { %v1045_v62 = vpack.c.bf16 %v981_v52, %v981_v52  ;;  %v1140_v11 = vpack.c.bf16 %v1137_v55, %v1139_v59  ;;  %v1009_v18 = vadd.f32 1.0, %v945_v3  ;;  %v577_v52 = vpack.c.bf16 %v2815_v33, %v2815_v33 }
  0xd8   :  { %v2145_v21 = vpop.eup %2144  ;;  %v959_v47 = vunpack.c.l.bf16 %v895_v26  ;;  %v2830_v42 = vpack.c.bf16 %v1005_v39, %v1005_v39 }
  0xd9   :  { %v1141_v2 = vunpack.c.h.bf16 %v1045_v62  ;;  %v1142_v16 = vunpack.c.l.bf16 %v1045_v62  ;;  %v1558_v19 = vunpack.c.l.bf16 %v1140_v11  ;;  %v1073_v23 = vpack.c.bf16 %v1009_v18, %v1009_v18  ;;  %v2147_v32 = vpop.eup %2146 }
  0xda   :  { %v2149_v43 = vpop.eup %2148  ;;  %v1333_v45 = vmul.f32 %v2145_v21, %v2703_v8  ;;  %v2833_v62 = vadd.f32 %v2667_v31, %v495_v17  ;;  %v687_v11 = vunpack.c.l.bf16 %v623_v49  ;;  %v1309_v1 = vunpack.c.h.bf16 %v2830_v42 }
  0xdb   :  { %2150 = vrcp.f32 %v1141_v2  ;;  %v1622_v29 = vmul.f32 %v1558_v19, %v2731_v58  ;;  %v1337_v34 = vunpack.c.h.bf16 %v1073_v23  ;;  %v1338_v38 = vunpack.c.l.bf16 %v1073_v23 }
  0xdc   :  { %2152 = vrcp.f32 %v1142_v16  ;;  %v1335_v58 = vmul.f32 %v2147_v32, %v2705_v9  ;;  %v854_v51 = vpack.c.bf16 %v2149_v43, %v2149_v43  ;;  %v641_v2 = vxor.u32 2147516416, %v577_v52  ;;  %v413_v16 = vpop.f32.mrf.mxu1 }
  0xdd   :  { %2154 = vpow2.f32 %v780_v0  ;;  %v1691_v40 = vsel %vm1683_vm2, %v1622_v29, 0.0  ;;  %v2839_v21 = vadd.f32 %v2667_v31, %v413_v16  ;;  %v579_v32 = vpack.c.bf16 %v2833_v62, %v2833_v62 }
  0xde   :  { %2156 = vrcp.f32 %v1302_v15  ;;  %v1692_v44 = vadd.f32 %v1691_v40, %v2780_v13  ;;  %v918_v56 = vunpack.c.l.bf16 %v854_v51  ;;  %v1336_v59 = vpack.c.bf16 %v1333_v45, %v1335_v58 }
  0xdf   :  { %2158 = vrcp.f32 %v1337_v34  ;;  %v1023_v15 = vadd.f32 1.0, %v959_v47  ;;  %v782_v39 = vmul.f32 1.442695, %v687_v11  ;;  %v705_v40 = vunpack.c.l.bf16 %v641_v2 }
  0xe0   :  { %2160 = vrcp.f32 %v1338_v38  ;;  %v982_v6 = vadd.f32 1.0, %v918_v56  ;;  %v643_v52 = vxor.u32 2147516416, %v579_v32 }
  0xe1   :  { %v2151_v46 = vpop.eup %2150  ;;  %2162 = vpow2.f32 %v788_v41 }
  0xe2   :  { %v2153_v36 = vpop.eup %2152  ;;  %v1144_v13 = vmul.f32 %v2151_v46, %v2703_v8  ;;  %2164 = vrcp.f32 %v1303_v14  ;;  %v578_v14 = vpack.c.bf16 %v2824_v54, %v2824_v54  ;;  %v1046_v20 = vpack.c.bf16 %v982_v6, %v982_v6  ;;  %v498_v6 = vpop.f32.mrf.mxu3 }
  0xe3   :  { %v1146_v55 = vmul.f32 %v2153_v36, %v2705_v9  ;;  %v2828_v57 = vpop.eup %2154  ;;  %2166 = vrcp.f32 %v1428_v22  ;;  %v546_v46 = vpack.c.bf16 %v2839_v21, %v2839_v21 }
  0xe4   :  { %v2157_v0 = vpop.eup %2156  ;;  %2168 = vrcp.f32 %v1429_v25  ;;  %v1586_v25 = vunpack.c.l.bf16 %v1336_v59  ;;  %v1148_v29 = vunpack.c.h.bf16 %v1046_v20  ;;  %v1149_v30 = vunpack.c.l.bf16 %v1046_v20 }
  0xe5   :  { %v1147_v3 = vpack.c.bf16 %v1144_v13, %v1146_v55  ;;  %v2159_v7 = vpop.eup %2158  ;;  %v642_v41 = vxor.u32 2147516416, %v578_v14  ;;  %v1305_v51 = vmul.f32 %v2157_v0, %v2703_v8  ;;  %v878_v36 = vpack.c.bf16 %v2828_v57, %v2828_v57 }
  0xe6   :  { %v2161_v18 = vpop.eup %2160  ;;  %v1340_v19 = vmul.f32 %v2159_v7, %v2703_v8  ;;  %2170 = vrcp.f32 %v1148_v29  ;;  %v1650_v49 = vmul.f32 %v1586_v25, %v2737_v61  ;;  %v818_v55 = vmul.f32 1.442695, %v705_v40 }
  0xe7   :  { %v1559_v63 = vunpack.c.l.bf16 %v1147_v3  ;;  %v2163_v22 = vpop.eup %2162  ;;  %v1342_v23 = vmul.f32 %v2161_v18, %v2705_v9  ;;  %2172 = vrcp.f32 %v1149_v30  ;;  %v706_v56 = vunpack.c.l.bf16 %v642_v41 }
  0xe8   :  { %v2165_v26 = vpop.eup %2164  ;;  %v882_v34 = vpack.c.bf16 %v2163_v22, %v2163_v22  ;;  %2174 = vpow2.f32 %v816_v60  ;;  %v1087_v61 = vpack.c.bf16 %v1023_v15, %v1023_v15  ;;  %v1753_v7 = vsel %vm1683_vm2, %v1650_v49, 0.0 }
  0xe9   :  { %v1623_v28 = vmul.f32 %v1559_v63, %v2753_v50  ;;  %v2167_v38 = vpop.eup %2166  ;;  %v1343_v43 = vpack.c.bf16 %v1340_v19, %v1342_v23  ;;  %v1307_v3 = vmul.f32 %v2165_v26, %v2705_v9  ;;  %2176 = vrcp.f32 %v1309_v1 }
  0xea   :  { %v2169_v45 = vpop.eup %2168  ;;  %v946_v47 = vunpack.c.l.bf16 %v882_v34  ;;  %2178 = vpow2.f32 %v782_v39  ;;  %v610_v11 = vxor.u32 2147516416, %v546_v46  ;;  %v707_v60 = vunpack.c.l.bf16 %v643_v52  ;;  %v385_v39 = vpop.f32.mrf.mxu0 }
  0xeb   :  { %v1693_v58 = vsel %vm1683_vm2, %v1623_v28, 0.0  ;;  %v1587_v50 = vunpack.c.l.bf16 %v1343_v43  ;;  %2180 = vpow2.f32 %v818_v55  ;;  %v2863_v15 = vadd.f32 %v2667_v31, %v498_v6 }
  0xec   :  { %v2850_v17 = vadd.f32 %v1693_v58, %v1692_v44  ;;  %v1010_v13 = vadd.f32 1.0, %v946_v47  ;;  %v2171_v57 = vpop.eup %2170  ;;  %v1310_v19 = vunpack.c.l.bf16 %v2830_v42  ;;  %v942_v20 = vunpack.c.l.bf16 %v878_v36 }
  0xed   :  { %v1651_v59 = vmul.f32 %v1587_v50, %v2756_v27  ;;  %v2173_v18 = vpop.eup %2172  ;;  %v820_v27 = vmul.f32 1.442695, %v706_v56  ;;  %v1151_v63 = vmul.f32 %v2171_v57, %v2703_v8  ;;  %v1431_v25 = vmul.f32 %v2167_v38, %v2703_v8 }
  0xee   :  { %v1074_v44 = vpack.c.bf16 %v1010_v13, %v1010_v13  ;;  %v1153_v22 = vmul.f32 %v2173_v18, %v2705_v9  ;;  %v2175_v1 = vpop.eup %2174  ;;  %v1435_v23 = vunpack.c.h.bf16 %v1087_v61  ;;  %v674_v32 = vunpack.c.l.bf16 %v610_v11 }
  0xef   :  { %v1754_v0 = vsel %vm1683_vm2, %v1651_v59, 0.0  ;;  %v2177_v26 = vpop.eup %2176  ;;  %v1308_v28 = vpack.c.bf16 %v1305_v51, %v1307_v3  ;;  %v1433_v29 = vmul.f32 %v2169_v45, %v2705_v9  ;;  %v822_v30 = vmul.f32 1.442695, %v707_v60  ;;  %v415_v59 = vpop.f32.mrf.mxu1 }
  0xf0   :  { %v2859_v2 = vadd.f32 %v1754_v0, %v1753_v7  ;;  %v1344_v14 = vunpack.c.h.bf16 %v1074_v44  ;;  %v1345_v16 = vunpack.c.l.bf16 %v1074_v44  ;;  %v1154_v34 = vpack.c.bf16 %v1151_v63, %v1153_v22  ;;  %v2179_v40 = vpop.eup %2178 }
  0xf1   :  { %v1436_v41 = vunpack.c.l.bf16 %v1087_v61  ;;  %v580_v42 = vpack.c.bf16 %v2863_v15, %v2863_v15  ;;  %v1006_v43 = vadd.f32 1.0, %v942_v20  ;;  %v896_v58 = vpack.c.bf16 %v2175_v1, %v2175_v1  ;;  %v2181_v46 = vpop.eup %2180  ;;  %v455_v20 = vpop.f32.mrf.mxu2 }
  0xf2   :  { %2182 = vrcp.f32 %v1344_v14  ;;  %v1560_v38 = vunpack.c.l.bf16 %v1154_v34  ;;  %v756_v47 = vmul.f32 1.442695, %v674_v32  ;;  %v2872_v49 = vadd.f32 %v2667_v31, %v385_v39 }
  0xf3   :  { %2184 = vrcp.f32 %v1345_v16  ;;  %v1582_v50 = vunpack.c.l.bf16 %v1308_v28  ;;  %v1434_v51 = vpack.c.bf16 %v1431_v25, %v1433_v29  ;;  %v879_v13 = vpack.c.bf16 %v2179_v40, %v2179_v40 }
  0xf4   :  { %2186 = vpow2.f32 %v820_v27  ;;  %v1624_v36 = vmul.f32 %v1560_v38, %v2772_v5  ;;  %v644_v56 = vxor.u32 2147516416, %v580_v42  ;;  %v1070_v3 = vpack.c.bf16 %v1006_v43, %v1006_v43 }
  0xf5   :  { %2188 = vrcp.f32 %v1310_v19  ;;  %v960_v61 = vunpack.c.l.bf16 %v896_v58  ;;  %v897_v0 = vpack.c.bf16 %v2181_v46, %v2181_v46  ;;  %v535_v5 = vpack.c.bf16 %v2872_v49, %v2872_v49 }
  0xf6   :  { %2190 = vrcp.f32 %v1435_v23  ;;  %v1695_v44 = vsel %vm1683_vm2, %v1624_v36, 0.0  ;;  %v1600_v60 = vunpack.c.l.bf16 %v1434_v51  ;;  %v2884_v16 = vadd.f32 %v2667_v31, %v415_v59 }
  0xf7   :  { %2192 = vpow2.f32 %v822_v30  ;;  %v2879_v11 = vadd.f32 %v1695_v44, %v2850_v17  ;;  %v1646_v27 = vmul.f32 %v1582_v50, %v2716_v35  ;;  %v943_v63 = vunpack.c.l.bf16 %v879_v13 }
  0xf8   :  { %v2183_v45 = vpop.eup %2182  ;;  %2194 = vrcp.f32 %v1436_v41  ;;  %v708_v19 = vunpack.c.l.bf16 %v644_v56  ;;  %v1312_v17 = vmul.f32 %v2177_v26, %v2703_v8  ;;  %v1024_v1 = vadd.f32 1.0, %v960_v61  ;;  %v500_v56 = vpop.f32.mrf.mxu3 }
  0xf9   :  { %v2185_v52 = vpop.eup %2184  ;;  %v1347_v55 = vmul.f32 %v2183_v45, %v2703_v8  ;;  %2196 = vpow2.f32 %v756_v47  ;;  %v1316_v28 = vunpack.c.h.bf16 %v1070_v3  ;;  %v1317_v29 = vunpack.c.l.bf16 %v1070_v3 }
  0xfa   :  { %v1349_v6 = vmul.f32 %v2185_v52, %v2705_v9  ;;  %v2187_v7 = vpop.eup %2186  ;;  %v961_v30 = vunpack.c.l.bf16 %v897_v0  ;;  %v599_v34 = vxor.u32 2147516416, %v535_v5  ;;  %v1664_v39 = vmul.f32 %v1600_v60, %v2719_v37  ;;  %v388_v60 = vpop.f32.mrf.mxu0 }
  0xfb   :  { %v2189_v57 = vpop.eup %2188  ;;  %v898_v25 = vpack.c.bf16 %v2187_v7, %v2187_v7  ;;  %v547_v35 = vpack.c.bf16 %v2884_v16, %v2884_v16  ;;  %v2893_v41 = vadd.f32 %v2667_v31, %v455_v20  ;;  %v1007_v43 = vadd.f32 1.0, %v943_v63 }
  0xfc   :  { %v1350_v14 = vpack.c.bf16 %v1347_v55, %v1349_v6  ;;  %v2191_v18 = vpop.eup %2190  ;;  %v1314_v26 = vmul.f32 %v2189_v57, %v2705_v9  ;;  %v824_v38 = vmul.f32 1.442695, %v708_v19  ;;  %v1088_v47 = vpack.c.bf16 %v1024_v1, %v1024_v1 }
  0xfd   :  { %v2193_v22 = vpop.eup %2192  ;;  %v1438_v46 = vmul.f32 %v2191_v18, %v2703_v8  ;;  %v962_v45 = vunpack.c.l.bf16 %v898_v25  ;;  %v1025_v50 = vadd.f32 1.0, %v961_v30  ;;  %v663_v36 = vunpack.c.l.bf16 %v599_v34 }
  0xfe   :  { %v1588_v23 = vunpack.c.l.bf16 %v1350_v14  ;;  %v2195_v32 = vpop.eup %2194  ;;  %v899_v58 = vpack.c.bf16 %v2193_v22, %v2193_v22  ;;  %2198 = vrcp.f32 %v1316_v28  ;;  %v611_v13 = vxor.u32 2147516416, %v547_v35 }
  0xff   :  { %v2197_v42 = vpop.eup %2196  ;;  %v563_v55 = vpack.c.bf16 %v2893_v41, %v2893_v41  ;;  %v1315_v59 = vpack.c.bf16 %v1312_v17, %v1314_v26  ;;  %v1071_v3 = vpack.c.bf16 %v1007_v43, %v1007_v43  ;;  %2200 = vpow2.f32 %v824_v38 }
 0x100   :  { %v1652_v40 = vmul.f32 %v1588_v23, %v2791_v48  ;;  %v1440_v48 = vmul.f32 %v2195_v32, %v2705_v9  ;;  %v866_v52 = vpack.c.bf16 %v2197_v42, %v2197_v42  ;;  %v963_v61 = vunpack.c.l.bf16 %v899_v58 }
 0x101   :  { %v2905_v44 = vsel %vm1683_vm2, %v1646_v27, 0.0  ;;  %2202 = vrcp.f32 %v1317_v29  ;;  %v1442_v6 = vunpack.c.h.bf16 %v1088_v47  ;;  %v1026_v7 = vadd.f32 1.0, %v962_v45 }
 0x102   :  { %v1756_v37 = vsel %vm1683_vm2, %v1652_v40, 0.0  ;;  %3524 = vst [vmem:[#allocation6_spill] sm:$0xff] %v2905_v44  ;;  %v1089_v0 = vpack.c.bf16 %v1025_v50, %v1025_v50  ;;  %v734_v5 = vmul.f32 1.442695, %v663_v36  ;;  %v2908_v57 = vadd.f32 %v2667_v31, %v500_v56  ;;  %v418_v50 = vpop.f32.mrf.mxu1  ;;  %v458_v36 = vpop.f32.mrf.mxu2 }
 0x103   :  { %v2900_v51 = vadd.f32 %v1756_v37, %v2859_v2  ;;  %v1441_v2 = vpack.c.bf16 %v1438_v46, %v1440_v48  ;;  %v1443_v14 = vunpack.c.l.bf16 %v1088_v47  ;;  %v930_v18 = vunpack.c.l.bf16 %v866_v52 }
 0x104   :  { %3525 = vst [vmem:[#allocation7_spill] sm:$0xff] %v2908_v57  ;;  %v675_v63 = vunpack.c.l.bf16 %v611_v13  ;;  %v627_v19 = vxor.u32 2147516416, %v563_v55  ;;  %v2911_v20 = vsel %vm1683_vm2, %v1664_v39, 0.0  ;;  %v1583_v22 = vunpack.c.l.bf16 %v1315_v59  ;;  %v2199_v1 = vpop.eup %2198 }
 0x105   :  { %v1323_v27 = vunpack.c.h.bf16 %v1071_v3  ;;  %v1027_v17 = vadd.f32 1.0, %v963_v61  ;;  %2204 = vrcp.f32 %v1442_v6  ;;  %v1324_v25 = vunpack.c.l.bf16 %v1071_v3  ;;  %v2201_v28 = vpop.eup %2200 }
 0x106   :  { %v1090_v23 = vpack.c.bf16 %v1026_v7, %v1026_v7  ;;  %v2914_v32 = vadd.f32 %v2667_v31, %v388_v60  ;;  %v1601_v29 = vunpack.c.l.bf16 %v1441_v2  ;;  %v1449_v30 = vunpack.c.h.bf16 %v1089_v0 }
 0x107   :  { %2206 = vpow2.f32 %v734_v5  ;;  %v581_v34 = vpack.c.bf16 %v2908_v57, %v2908_v57  ;;  %v2203_v40 = vpop.eup %2202  ;;  %v994_v39 = vadd.f32 1.0, %v930_v18  ;;  %v758_v35 = vmul.f32 1.442695, %v675_v63 }
 0x108   :  { %2208 = vrcp.f32 %v1443_v14  ;;  %v691_v42 = vunpack.c.l.bf16 %v627_v19  ;;  %v2919_v26 = vmul.f32 %v2199_v1, %v2703_v8  ;;  %v1450_v43 = vunpack.c.l.bf16 %v1089_v0  ;;  %v503_v19 = vpop.f32.mrf.mxu3 }
 0x109   :  { %2210 = vrcp.f32 %v1323_v27  ;;  %v1091_v58 = vpack.c.bf16 %v1027_v17, %v1027_v17  ;;  %v1456_v38 = vunpack.c.h.bf16 %v1090_v23  ;;  %v900_v46 = vpack.c.bf16 %v2201_v28, %v2201_v28 }
 0x10a   :  { %2212 = vrcp.f32 %v1324_v25  ;;  %v536_v47 = vpack.c.bf16 %v2914_v32, %v2914_v32  ;;  %v1321_v45 = vmul.f32 %v2203_v40, %v2705_v9  ;;  %v1457_v37 = vunpack.c.l.bf16 %v1090_v23  ;;  %v390_v23 = vpop.f32.mrf.mxu0  ;;  %v2942_v40 = vld [vmem:[%s3505_s2] ss:$0 sm:$0xff] }
 0x10b   :  { %2214 = vrcp.f32 %v1449_v30  ;;  %v645_v48 = vxor.u32 2147516416, %v581_v34  ;;  %v2205_v52 = vpop.eup %2204  ;;  %v1058_v13 = vpack.c.bf16 %v994_v39, %v994_v39  ;;  %v790_v55 = vmul.f32 1.442695, %v691_v42 }
 0x10c   :  { %2216 = vpow2.f32 %v758_v35  ;;  %v2925_v56 = vadd.f32 %v2667_v31, %v418_v50  ;;  %v1647_v3 = vmul.f32 %v1583_v22, %v2741_v4  ;;  %v1665_v61 = vmul.f32 %v1601_v29, %v2750_v24 }
 0x10d   :  { %v2207_v59 = vpop.eup %2206  ;;  %2218 = vrcp.f32 %v1450_v43  ;;  %v1463_v6 = vunpack.c.h.bf16 %v1091_v58  ;;  %v964_v2 = vunpack.c.l.bf16 %v900_v46  ;;  %v600_v0 = vxor.u32 2147516416, %v536_v47 }
 0x10e   :  { %v2209_v7 = vpop.eup %2208  ;;  %2220 = vrcp.f32 %v1456_v38  ;;  %v2930_v5 = vadd.f32 %v2667_v31, %v458_v36  ;;  %v1322_v14 = vpack.c.bf16 %v2919_v26, %v1321_v45  ;;  %v1464_v18 = vunpack.c.l.bf16 %v1091_v58 }
 0x10f   :  { %v2211_v60 = vpop.eup %2210  ;;  %2222 = vrcp.f32 %v1457_v37  ;;  %v709_v63 = vunpack.c.l.bf16 %v645_v48  ;;  %v1232_v4 = vunpack.c.h.bf16 %v1058_v13  ;;  %v855_v22 = vpack.c.bf16 %v2207_v59, %v2207_v59 }
 0x110   :  { %v2213_v27 = vpop.eup %2212  ;;  %2224 = vpow2.f32 %v790_v55  ;;  %v548_v24 = vpack.c.bf16 %v2925_v56, %v2925_v56  ;;  %v1445_v1 = vmul.f32 %v2205_v52, %v2703_v8  ;;  %v1447_v31 = vmul.f32 %v2209_v7, %v2705_v9 }
 0x111   :  { %v2215_v17 = vpop.eup %2214  ;;  %2226 = vrcp.f32 %v1463_v6  ;;  %v1233_v25 = vunpack.c.l.bf16 %v1058_v13  ;;  %v1028_v29 = vadd.f32 1.0, %v964_v2  ;;  %v664_v30 = vunpack.c.l.bf16 %v600_v0 }
 0x112   :  { %v2217_v28 = vpop.eup %2216  ;;  %v564_v34 = vpack.c.bf16 %v2930_v5, %v2930_v5  ;;  %v2945_v39 = vadd.f32 %v2942_v40, %v503_v19  ;;  %v2948_v42 = vsel %vm1683_vm2, %v1647_v3, 0.0  ;;  %v2951_v26 = vsel %vm1683_vm2, %v1665_v61, 0.0 }
 0x113   :  { %v2219_v35 = vpop.eup %2218  ;;  %3527 = vst [vmem:[#allocation9_spill] sm:$0xff] %v2948_v42  ;;  %2228 = vrcp.f32 %v1464_v18  ;;  %v826_v43 = vmul.f32 1.442695, %v709_v63  ;;  %v919_v38 = vunpack.c.l.bf16 %v855_v22  ;;  %v612_v46 = vxor.u32 2147516416, %v548_v24 }
 0x114   :  { %3526 = vst [vmem:[#allocation8_spill] sm:$0xff] %v2945_v39  ;;  %v2221_v58 = vpop.eup %2220  ;;  %2230 = vrcp.f32 %v1232_v4  ;;  %v2954_v47 = vadd.f32 %v2942_v40, %v390_v23  ;;  %v1584_v37 = vunpack.c.l.bf16 %v1322_v14  ;;  %v1448_v48 = vpack.c.bf16 %v1445_v1, %v1447_v31 }
 0x115   :  { %v2223_v45 = vpop.eup %2222  ;;  %2232 = vrcp.f32 %v1233_v25  ;;  %v867_v50 = vpack.c.bf16 %v2217_v28, %v2217_v28  ;;  %v1092_v52 = vpack.c.bf16 %v1028_v29, %v1028_v29  ;;  %v736_v13 = vmul.f32 1.442695, %v664_v30 }
 0x116   :  { %v2225_v36 = vpop.eup %2224  ;;  %v628_v55 = vxor.u32 2147516416, %v564_v34  ;;  %v582_v59 = vpack.c.bf16 %v2945_v39, %v2945_v39  ;;  %v1326_v61 = vmul.f32 %v2211_v60, %v2703_v8  ;;  %v1452_v6 = vmul.f32 %v2215_v17, %v2703_v8 }
 0x117   :  { %v2227_v3 = vpop.eup %2226  ;;  %v1454_v7 = vmul.f32 %v2219_v35, %v2705_v9  ;;  %2234 = vpow2.f32 %v826_v43  ;;  %v1328_v2 = vmul.f32 %v2213_v27, %v2705_v9  ;;  %v983_v0 = vadd.f32 1.0, %v919_v38 }
 0x118   :  { %v676_v14 = vunpack.c.l.bf16 %v612_v46  ;;  %v537_v18 = vpack.c.bf16 %v2954_v47, %v2954_v47  ;;  %v1459_v19 = vmul.f32 %v2221_v58, %v2703_v8  ;;  %v1461_v4 = vmul.f32 %v2223_v45, %v2705_v9 }
 0x119   :  { %v2229_v63 = vpop.eup %2228  ;;  %v931_v22 = vunpack.c.l.bf16 %v867_v50  ;;  %v883_v24 = vpack.c.bf16 %v2225_v36, %v2225_v36  ;;  %v1470_v1 = vunpack.c.h.bf16 %v1092_v52  ;;  %2236 = vpow2.f32 %v736_v13 }
 0x11a   :  { %v2231_v60 = vpop.eup %2230  ;;  %v692_v17 = vunpack.c.l.bf16 %v628_v55  ;;  %v646_v31 = vxor.u32 2147516416, %v582_v59  ;;  %v2967_v27 = vmul.f32 %v1584_v37, %v2768_v53  ;;  %v1602_v23 = vunpack.c.l.bf16 %v1448_v48  ;;  %v420_v53 = vpop.f32.mrf.mxu1 }
 0x11b   :  { %v2233_v25 = vpop.eup %2232  ;;  %v1455_v28 = vpack.c.bf16 %v1452_v6, %v1454_v7  ;;  %v1471_v29 = vunpack.c.l.bf16 %v1092_v52  ;;  %v1329_v30 = vpack.c.bf16 %v1326_v61, %v1328_v2  ;;  %v1047_v34 = vpack.c.bf16 %v983_v0, %v983_v0 }
 0x11c   :  { %3528 = vst [vmem:[#allocation10_spill] sm:$0xff] %v2967_v27  ;;  %v760_v35 = vmul.f32 1.442695, %v676_v14  ;;  %v601_v43 = vxor.u32 2147516416, %v537_v18  ;;  %v1462_v38 = vpack.c.bf16 %v1459_v19, %v1461_v4  ;;  %v1466_v46 = vmul.f32 %v2227_v3, %v2703_v8  ;;  %v460_v18 = vpop.f32.mrf.mxu2 }
 0x11d   :  { %v2235_v58 = vpop.eup %2234  ;;  %v995_v45 = vadd.f32 1.0, %v931_v22  ;;  %v947_v50 = vunpack.c.l.bf16 %v883_v24  ;;  %v1468_v36 = vmul.f32 %v2229_v63, %v2705_v9  ;;  %2238 = vrcp.f32 %v1470_v1 }
 0x11e   :  { %v792_v13 = vmul.f32 1.442695, %v692_v17  ;;  %v710_v55 = vunpack.c.l.bf16 %v646_v31  ;;  %v1603_v37 = vunpack.c.l.bf16 %v1455_v28  ;;  %v1235_v48 = vmul.f32 %v2231_v60, %v2703_v8 }
 0x11f   :  { %v1237_v52 = vmul.f32 %v2233_v25, %v2705_v9  ;;  %2240 = vrcp.f32 %v1471_v29  ;;  %v2237_v59 = vpop.eup %2236  ;;  %v1155_v61 = vunpack.c.h.bf16 %v1047_v34  ;;  %v901_v6 = vpack.c.bf16 %v2235_v58, %v2235_v58 }
 0x120   :  { %2242 = vpow2.f32 %v760_v35  ;;  %v665_v7 = vunpack.c.l.bf16 %v601_v43  ;;  %v1156_v3 = vunpack.c.l.bf16 %v1047_v34  ;;  %v1059_v2 = vpack.c.bf16 %v995_v45, %v995_v45 }
 0x121   :  { %v1011_v0 = vadd.f32 1.0, %v947_v50  ;;  %v2974_v14 = vadd.f32 %v2942_v40, %v420_v53  ;;  %v1604_v63 = vunpack.c.l.bf16 %v1462_v38  ;;  %v1469_v19 = vpack.c.bf16 %v1466_v46, %v1468_v36 }
 0x122   :  { %2244 = vpow2.f32 %v792_v13  ;;  %v828_v4 = vmul.f32 1.442695, %v710_v55  ;;  %v1666_v22 = vmul.f32 %v1602_v23, %v2778_v12  ;;  %v1585_v24 = vunpack.c.l.bf16 %v1329_v30 }
 0x123   :  { %v1238_v60 = vpack.c.bf16 %v1235_v48, %v1237_v52  ;;  %v856_v1 = vpack.c.bf16 %v2237_v59, %v2237_v59  ;;  %v2239_v17 = vpop.eup %2238  ;;  %2246 = vrcp.f32 %v1155_v61  ;;  %v965_v31 = vunpack.c.l.bf16 %v901_v6 }
 0x124   :  { %v738_v25 = vmul.f32 1.442695, %v665_v7  ;;  %v2978_v28 = vadd.f32 %v2942_v40, %v460_v18  ;;  %2248 = vrcp.f32 %v1156_v3  ;;  %v1239_v34 = vunpack.c.h.bf16 %v1059_v2  ;;  %v505_v18 = vpop.f32.mrf.mxu3 }
 0x125   :  { %v2241_v29 = vpop.eup %2240  ;;  %v1075_v35 = vpack.c.bf16 %v1011_v0, %v1011_v0  ;;  %v549_v43 = vpack.c.bf16 %v2974_v14, %v2974_v14  ;;  %v1667_v12 = vmul.f32 %v1603_v37, %v2815_v33  ;;  %v1668_v23 = vmul.f32 %v1604_v63, %v2824_v54  ;;  %v393_v63 = vpop.f32.mrf.mxu0 }
 0x126   :  { %v2243_v58 = vpop.eup %2242  ;;  %v1605_v30 = vunpack.c.l.bf16 %v1469_v19  ;;  %2250 = vpow2.f32 %v828_v4  ;;  %v1572_v38 = vunpack.c.l.bf16 %v1238_v60  ;;  %v1473_v46 = vmul.f32 %v2239_v17, %v2703_v8 }
 0x127   :  { %v1240_v45 = vunpack.c.l.bf16 %v1059_v2  ;;  %v920_v50 = vunpack.c.l.bf16 %v856_v1  ;;  %v1475_v13 = vmul.f32 %v2241_v29, %v2705_v9  ;;  %v1029_v55 = vadd.f32 1.0, %v965_v31 }
 0x128   :  { %v2245_v36 = vpop.eup %2244  ;;  %2252 = vpow2.f32 %v738_v25  ;;  %v565_v53 = vpack.c.bf16 %v2978_v28, %v2978_v28  ;;  %v1351_v48 = vunpack.c.h.bf16 %v1075_v35  ;;  %v868_v33 = vpack.c.bf16 %v2243_v58, %v2243_v58 }
 0x129   :  { %2254 = vrcp.f32 %v1239_v34  ;;  %v613_v37 = vxor.u32 2147516416, %v549_v43  ;;  %v2247_v54 = vpop.eup %2246  ;;  %v2989_v52 = vsel %vm1683_vm2, %v1666_v22, 0.0  ;;  %v2992_v59 = vmul.f32 %v1585_v24, %v2805_v10 }
 0x12a   :  { %v2995_v61 = vsel %vm1683_vm2, %v1667_v12, 0.0  ;;  %v1669_v6 = vmul.f32 %v1605_v30, %v2833_v62  ;;  %v2249_v7 = vpop.eup %2248  ;;  %2256 = vrcp.f32 %v1240_v45  ;;  %v1352_v3 = vunpack.c.l.bf16 %v1075_v35 }
 0x12b   :  { %3529 = vst [vmem:[#allocation11_spill] sm:$0xff] %v2992_v59  ;;  %v984_v2 = vadd.f32 1.0, %v920_v50  ;;  %v884_v0 = vpack.c.bf16 %v2245_v36, %v2245_v36  ;;  %v2999_v4 = vsel %vm1683_vm2, %v1668_v23, 0.0  ;;  %v1636_v22 = vmul.f32 %v1572_v38, %v2839_v21 }
 0x12c   :  { %3530 = vst [vmem:[#allocation12_spill] sm:$0xff] %v2995_v61  ;;  %v2251_v19 = vpop.eup %2250  ;;  %v3002_v10 = vpack.c.bf16 %v1029_v55, %v1029_v55  ;;  %v629_v24 = vxor.u32 2147516416, %v565_v53  ;;  %v1476_v60 = vpack.c.bf16 %v1473_v46, %v1475_v13  ;;  %2258 = vrcp.f32 %v1351_v48  ;;  %v463_v46 = vpop.f32.mrf.mxu2 }
 0x12d   :  { %3531 = vst [vmem:[#allocation13_spill] sm:$0xff] %v2999_v4  ;;  %v932_v1 = vunpack.c.l.bf16 %v868_v33  ;;  %v677_v62 = vunpack.c.l.bf16 %v613_v37  ;;  %v3005_v31 = vsel %vm1683_vm2, %v1669_v6, 0.0  ;;  %v1158_v25 = vmul.f32 %v2247_v54, %v2703_v8  ;;  %v423_v54 = vpop.f32.mrf.mxu1 }
 0x12e   :  { %v2253_v17 = vpop.eup %2252  ;;  %3532 = vst [vmem:[#allocation14_spill] sm:$0xff] %v3005_v31  ;;  %v1160_v29 = vmul.f32 %v2249_v7, %v2705_v9  ;;  %v3010_v34 = vadd.f32 %v2942_v40, %v505_v18  ;;  %2260 = vrcp.f32 %v1352_v3  ;;  %v1048_v21 = vpack.c.bf16 %v984_v2, %v984_v2 }
 0x12f   :  { %v2255_v35 = vpop.eup %2254  ;;  %v948_v43 = vunpack.c.l.bf16 %v884_v0  ;;  %v902_v58 = vpack.c.bf16 %v2251_v19, %v2251_v19  ;;  %v3013_v12 = vsel %vm1683_vm2, %v1636_v22, 0.0  ;;  %v1477_v23 = vunpack.c.h.bf16 %v3002_v10 }
 0x130   :  { %3533 = vst [vmem:[#allocation15_spill] sm:$0xff] %v3010_v34  ;;  %v693_v30 = vunpack.c.l.bf16 %v629_v24  ;;  %v3017_v38 = vadd.f32 %v2942_v40, %v393_v63  ;;  %v2257_v45 = vpop.eup %2256  ;;  %v3019_v50 = vunpack.c.l.bf16 %v1476_v60  ;;  %v996_v36 = vadd.f32 1.0, %v932_v1  ;;  %v395_v1 = vpop.f32.mrf.mxu0 }
 0x131   :  { %v857_v13 = vpack.c.bf16 %v2253_v17, %v2253_v17  ;;  %v762_v55 = vmul.f32 1.442695, %v677_v62  ;;  %v1161_v53 = vpack.c.bf16 %v1158_v25, %v1160_v29  ;;  %v1242_v48 = vmul.f32 %v2255_v35, %v2703_v8 }
 0x132   :  { %v1478_v33 = vunpack.c.l.bf16 %v3002_v10  ;;  %v583_v37 = vpack.c.bf16 %v3010_v34, %v3010_v34  ;;  %v2259_v6 = vpop.eup %2258  ;;  %v1162_v7 = vunpack.c.h.bf16 %v1048_v21  ;;  %v1012_v3 = vadd.f32 1.0, %v948_v43 }
 0x133   :  { %v966_v2 = vunpack.c.l.bf16 %v902_v58  ;;  %v3026_v0 = vadd.f32 %v2942_v40, %v463_v46  ;;  %v1244_v18 = vmul.f32 %v2257_v45, %v2705_v9  ;;  %2262 = vrcp.f32 %v1477_v23 }
 0x134   :  { %v794_v63 = vmul.f32 1.442695, %v693_v30  ;;  %v538_v19 = vpack.c.bf16 %v3017_v38, %v3017_v38  ;;  %v2261_v22 = vpop.eup %2260  ;;  %v1060_v10 = vpack.c.bf16 %v996_v36, %v996_v36  ;;  %v921_v24 = vunpack.c.l.bf16 %v857_v13 }
 0x135   :  { %2264 = vpow2.f32 %v762_v55  ;;  %v3032_v60 = vadd.f32 %v2942_v40, %v423_v54  ;;  %v1561_v62 = vunpack.c.l.bf16 %v1161_v53  ;;  %v1354_v17 = vmul.f32 %v2259_v6, %v2703_v8 }
 0x136   :  { %v1163_v25 = vunpack.c.l.bf16 %v1048_v21  ;;  %v647_v29 = vxor.u32 2147516416, %v583_v37  ;;  %2266 = vrcp.f32 %v1162_v7  ;;  %v1076_v35 = vpack.c.bf16 %v1012_v3, %v1012_v3 }
 0x137   :  { %v1030_v43 = vadd.f32 1.0, %v966_v2  ;;  %v566_v58 = vpack.c.bf16 %v3026_v0, %v3026_v0  ;;  %v1356_v23 = vmul.f32 %v2261_v22, %v2705_v9  ;;  %2268 = vpow2.f32 %v794_v63  ;;  %v425_v22 = vpop.f32.mrf.mxu1 }
 0x138   :  { %v602_v30 = vxor.u32 2147516416, %v538_v19  ;;  %v3039_v46 = vadd.f32 %v2942_v40, %v395_v1  ;;  %v1245_v45 = vpack.c.bf16 %v1242_v48, %v1244_v18  ;;  %v1246_v36 = vunpack.c.h.bf16 %v1060_v10 }
 0x139   :  { %v985_v13 = vadd.f32 1.0, %v921_v24  ;;  %v550_v21 = vpack.c.bf16 %v3032_v60, %v3032_v60  ;;  %v2263_v55 = vpop.eup %2262  ;;  %v1625_v53 = vmul.f32 %v1561_v62, %v2872_v49  ;;  %2270 = vrcp.f32 %v1163_v25 }
 0x13a   :  { %v1247_v37 = vunpack.c.l.bf16 %v1060_v10  ;;  %v711_v54 = vunpack.c.l.bf16 %v647_v29  ;;  %2272 = vrcp.f32 %v1478_v33  ;;  %v1358_v7 = vunpack.c.h.bf16 %v1076_v35 }
 0x13b   :  { %v2265_v6 = vpop.eup %2264  ;;  %v3044_v3 = vpack.c.bf16 %v1030_v43, %v1030_v43  ;;  %v630_v2 = vxor.u32 2147516416, %v566_v58  ;;  %v1357_v63 = vpack.c.bf16 %v1354_v17, %v1356_v23  ;;  %v1359_v19 = vunpack.c.l.bf16 %v1076_v35  ;;  %v508_v43 = vpop.f32.mrf.mxu3 }
 0x13c   :  { %v666_v48 = vunpack.c.l.bf16 %v602_v30  ;;  %v539_v18 = vpack.c.bf16 %v3039_v46, %v3039_v46  ;;  %v2267_v24 = vpop.eup %2266  ;;  %v1573_v1 = vunpack.c.l.bf16 %v1245_v45  ;;  %2274 = vrcp.f32 %v1246_v36 }
 0x13d   :  { %v1049_v49 = vpack.c.bf16 %v985_v13, %v985_v13  ;;  %v614_v62 = vxor.u32 2147516416, %v550_v21  ;;  %v2269_v10 = vpop.eup %2268  ;;  %v3049_v25 = vsel %vm1683_vm2, %v1625_v53, 0.0  ;;  %2276 = vrcp.f32 %v1247_v37 }
 0x13e   :  { %v869_v33 = vpack.c.bf16 %v2265_v6, %v2265_v6  ;;  %v830_v29 = vmul.f32 1.442695, %v711_v54  ;;  %2278 = vrcp.f32 %v1358_v7  ;;  %v1484_v17 = vunpack.c.h.bf16 %v3044_v3 }
 0x13f   :  { %v694_v35 = vunpack.c.l.bf16 %v630_v2  ;;  %v3053_v58 = vadd.f32 %v2942_v40, %v425_v22  ;;  %v2271_v23 = vpop.eup %2270  ;;  %v1589_v30 = vunpack.c.l.bf16 %v1357_v63  ;;  %2280 = vrcp.f32 %v1359_v19 }
 0x140   :  { %v740_v45 = vmul.f32 1.442695, %v666_v48  ;;  %v603_v36 = vxor.u32 2147516416, %v539_v18  ;;  %v2273_v13 = vpop.eup %2272  ;;  %v1165_v21 = vmul.f32 %v2267_v24, %v2703_v8  ;;  %v1169_v53 = vunpack.c.h.bf16 %v1049_v49 }
 0x141   :  { %v885_v37 = vpack.c.bf16 %v2269_v10, %v2269_v10  ;;  %v678_v6 = vunpack.c.l.bf16 %v614_v62  ;;  %v1170_v54 = vunpack.c.l.bf16 %v1049_v49  ;;  %v933_v7 = vunpack.c.l.bf16 %v869_v33 }
 0x142   :  { %2282 = vpow2.f32 %v830_v29  ;;  %v3057_v2 = vadd.f32 %v2942_v40, %v508_v43  ;;  %v2275_v59 = vpop.eup %2274  ;;  %v1167_v22 = vmul.f32 %v2271_v23, %v2705_v9  ;;  %v796_v63 = vmul.f32 1.442695, %v694_v35 }
 0x143   :  { %2284 = vrcp.f32 %v1484_v17  ;;  %v551_v19 = vpack.c.bf16 %v3053_v58, %v3053_v58  ;;  %v2277_v48 = vpop.eup %2276  ;;  %v1637_v18 = vmul.f32 %v1573_v1, %v2884_v16  ;;  %v1485_v24 = vunpack.c.l.bf16 %v3044_v3 }
 0x144   :  { %3534 = vst [vmem:[#allocation16_spill] sm:$0xff] %v3057_v2  ;;  %2286 = vpow2.f32 %v740_v45  ;;  %v667_v49 = vunpack.c.l.bf16 %v603_v36  ;;  %v2279_v62 = vpop.eup %2278  ;;  %v1480_v10 = vmul.f32 %v2263_v55, %v2703_v8  ;;  %v949_v33 = vunpack.c.l.bf16 %v885_v37  ;;  %v465_v45 = vpop.f32.mrf.mxu2 }
 0x145   :  { %2288 = vrcp.f32 %v1169_v53  ;;  %v764_v29 = vmul.f32 1.442695, %v678_v6  ;;  %v2281_v43 = vpop.eup %2280  ;;  %v1482_v17 = vmul.f32 %v2273_v13, %v2705_v9  ;;  %v997_v35 = vadd.f32 1.0, %v933_v7 }
 0x146   :  { %2290 = vrcp.f32 %v1170_v54  ;;  %v584_v23 = vpack.c.bf16 %v3057_v2, %v3057_v2  ;;  %v1653_v16 = vmul.f32 %v1589_v30, %v2893_v41  ;;  %v1168_v1 = vpack.c.bf16 %v1165_v21, %v1167_v22 }
 0x147   :  { %2292 = vpow2.f32 %v796_v63  ;;  %v615_v3 = vxor.u32 2147516416, %v551_v19  ;;  %v1249_v55 = vmul.f32 %v2275_v59, %v2703_v8  ;;  %v1251_v53 = vmul.f32 %v2277_v48, %v2705_v9 }
 0x148   :  { %v2283_v36 = vpop.eup %2282  ;;  %2294 = vrcp.f32 %v1485_v24  ;;  %v742_v37 = vmul.f32 1.442695, %v667_v49  ;;  %v1361_v13 = vmul.f32 %v2279_v62, %v2703_v8  ;;  %v1363_v54 = vmul.f32 %v2281_v43, %v2705_v9 }
 0x149   :  { %v2285_v6 = vpop.eup %2284  ;;  %v1013_v7 = vadd.f32 1.0, %v949_v33  ;;  %2296 = vpow2.f32 %v764_v29  ;;  %v1483_v41 = vpack.c.bf16 %v1480_v10, %v1482_v17  ;;  %v3073_v30 = vpack.c.bf16 %v997_v35, %v997_v35 }
 0x14a   :  { %v2287_v27 = vpop.eup %2286  ;;  %v648_v21 = vxor.u32 2147516416, %v584_v23  ;;  %v3076_v22 = vadd.f32 %v2942_v40, %v465_v45  ;;  %v3080_v63 = vmul.f32 %v3019_v50, %v2863_v15  ;;  %v3084_v19 = vadd.f32 %v3049_v25, %v2879_v11 }
 0x14b   :  { %v2289_v59 = vpop.eup %2288  ;;  %v903_v48 = vpack.c.bf16 %v2283_v36, %v2283_v36  ;;  %v679_v24 = vunpack.c.l.bf16 %v615_v3  ;;  %v3087_v62 = vsel %vm1683_vm2, %v1637_v18, 0.0  ;;  %v1562_v10 = vunpack.c.l.bf16 %v1168_v1 }
 0x14c   :  { %3535 = vst [vmem:[#allocation17_spill] sm:$0xff] %v3080_v63  ;;  %v2291_v49 = vpop.eup %2290  ;;  %v1252_v33 = vpack.c.bf16 %v1249_v55, %v1251_v53  ;;  %2298 = vpow2.f32 %v742_v37  ;;  %v1758_v43 = vsel %vm1683_vm2, %v1653_v16, 0.0  ;;  %v1364_v17 = vpack.c.bf16 %v1361_v13, %v1363_v54 }
 0x14d   :  { %v2293_v29 = vpop.eup %2292  ;;  %v1077_v35 = vpack.c.bf16 %v1013_v7, %v1013_v7  ;;  %v858_v15 = vpack.c.bf16 %v2287_v27, %v2287_v27  ;;  %v3090_v23 = vunpack.c.l.bf16 %v1483_v41  ;;  %v1253_v11 = vunpack.c.h.bf16 %v3073_v30 }
 0x14e   :  { %v2295_v50 = vpop.eup %2294  ;;  %v712_v25 = vunpack.c.l.bf16 %v648_v21  ;;  %v567_v3 = vpack.c.bf16 %v3076_v22, %v3076_v22  ;;  %v1172_v1 = vmul.f32 %v2289_v59, %v2703_v8  ;;  %v1174_v45 = vmul.f32 %v2291_v49, %v2705_v9 }
 0x14f   :  { %3536 = vst [vmem:[#allocation18_spill] sm:$0xff] %v3090_v23  ;;  %v2297_v18 = vpop.eup %2296  ;;  %v967_v36 = vunpack.c.l.bf16 %v903_v48  ;;  %v766_v55 = vmul.f32 1.442695, %v679_v24  ;;  %v1626_v16 = vmul.f32 %v1562_v10, %v2914_v32  ;;  %v1574_v53 = vunpack.c.l.bf16 %v1252_v33  ;;  %v398_v33 = vpop.f32.mrf.mxu0 }
 0x150   :  { %v1487_v27 = vmul.f32 %v2285_v6, %v2703_v8  ;;  %v886_v37 = vpack.c.bf16 %v2293_v29, %v2293_v29  ;;  %v1590_v13 = vunpack.c.l.bf16 %v1364_v17  ;;  %v1489_v54 = vmul.f32 %v2295_v50, %v2705_v9  ;;  %v510_v50 = vpop.f32.mrf.mxu3 }
 0x151   :  { %v1365_v7 = vunpack.c.h.bf16 %v1077_v35  ;;  %v922_v41 = vunpack.c.l.bf16 %v858_v15  ;;  %2300 = vrcp.f32 %v1253_v11  ;;  %v870_v42 = vpack.c.bf16 %v2297_v18, %v2297_v18 }
 0x152   :  { %v2299_v21 = vpop.eup %2298  ;;  %v832_v44 = vmul.f32 1.442695, %v712_v25  ;;  %v631_v59 = vxor.u32 2147516416, %v567_v3  ;;  %v1175_v2 = vpack.c.bf16 %v1172_v1, %v1174_v45  ;;  %v1366_v49 = vunpack.c.l.bf16 %v1077_v35 }
 0x153   :  { %v1031_v48 = vadd.f32 1.0, %v967_v36  ;;  %2302 = vpow2.f32 %v766_v55  ;;  %v1699_v32 = vsel %vm1683_vm2, %v1626_v16, 0.0  ;;  %v1638_v24 = vmul.f32 %v1574_v53, %v2925_v56  ;;  %v468_v56 = vpop.f32.mrf.mxu2 }
 0x154   :  { %v1254_v6 = vunpack.c.l.bf16 %v3073_v30  ;;  %v950_v10 = vunpack.c.l.bf16 %v886_v37  ;;  %v1490_v29 = vpack.c.bf16 %v1487_v27, %v1489_v54  ;;  %2304 = vrcp.f32 %v1365_v7 }
 0x155   :  { %v986_v17 = vadd.f32 1.0, %v922_v41  ;;  %v859_v15 = vpack.c.bf16 %v2299_v21, %v2299_v21  ;;  %v1654_v11 = vmul.f32 %v1590_v13, %v2930_v5  ;;  %v934_v25 = vunpack.c.l.bf16 %v870_v42 }
 0x156   :  { %2306 = vpow2.f32 %v832_v44  ;;  %v695_v35 = vunpack.c.l.bf16 %v631_v59  ;;  %v1563_v3 = vunpack.c.l.bf16 %v1175_v2  ;;  %v1095_v18 = vpack.c.bf16 %v1031_v48, %v1031_v48 }
 0x157   :  { %2308 = vrcp.f32 %v1366_v49  ;;  %v3105_v1 = vadd.f32 %v2942_v40, %v398_v33  ;;  %v2301_v30 = vpop.eup %2300  ;;  %v3108_v45 = vadd.f32 %v1758_v43, %v2900_v51  ;;  %v1014_v36 = vadd.f32 1.0, %v950_v10 }
 0x158   :  { %2310 = vrcp.f32 %v1254_v6  ;;  %v3111_v55 = vadd.f32 %v2942_v40, %v510_v50  ;;  %v3114_v44 = vadd.f32 %v1699_v32, %v3084_v19  ;;  %v3117_v42 = vsel %vm1683_vm2, %v1638_v24, 0.0 }
 0x159   :  { %v2303_v5 = vpop.eup %2302  ;;  %v1050_v2 = vpack.c.bf16 %v986_v17, %v986_v17  ;;  %v923_v16 = vunpack.c.l.bf16 %v859_v15  ;;  %v3119_v53 = vunpack.c.l.bf16 %v1490_v29  ;;  %v998_v27 = vadd.f32 1.0, %v934_v25  ;;  %v428_v29 = vpop.f32.mrf.mxu1 }
 0x15a   :  { %3537 = vst [vmem:[#allocation19_spill] sm:$0xff] %v3111_v55  ;;  %v798_v37 = vmul.f32 1.442695, %v695_v35  ;;  %v3122_v51 = vadd.f32 %v2942_v40, %v468_v56  ;;  %v2305_v43 = vpop.eup %2304  ;;  %v1760_v13 = vsel %vm1683_vm2, %v1654_v11, 0.0  ;;  %v1627_v54 = vmul.f32 %v1563_v3, %v2954_v47 }
 0x15b   :  { %3538 = vst [vmem:[#allocation20_spill] sm:$0xff] %v3119_v53  ;;  %v1491_v7 = vunpack.c.h.bf16 %v1095_v18  ;;  %v540_v19 = vpack.c.bf16 %v3105_v1, %v3105_v1  ;;  %v1256_v21 = vmul.f32 %v2301_v30, %v2703_v8  ;;  %v1078_v59 = vpack.c.bf16 %v1014_v36, %v1014_v36 }
 0x15c   :  { %v2307_v41 = vpop.eup %2306  ;;  %v871_v49 = vpack.c.bf16 %v2303_v5, %v2303_v5  ;;  %v585_v48 = vpack.c.bf16 %v3111_v55, %v3111_v55  ;;  %v1492_v24 = vunpack.c.l.bf16 %v1095_v18  ;;  %v1176_v6 = vunpack.c.h.bf16 %v1050_v2 }
 0x15d   :  { %v2309_v32 = vpop.eup %2308  ;;  %v1177_v10 = vunpack.c.l.bf16 %v1050_v2  ;;  %v987_v33 = vadd.f32 1.0, %v923_v16  ;;  %v1062_v47 = vpack.c.bf16 %v998_v27, %v998_v27  ;;  %2312 = vpow2.f32 %v798_v37 }
 0x15e   :  { %v2311_v17 = vpop.eup %2310  ;;  %v3132_v15 = vadd.f32 %v2942_v40, %v428_v29  ;;  %v568_v50 = vpack.c.bf16 %v3122_v51, %v3122_v51  ;;  %v1368_v11 = vmul.f32 %v2305_v43, %v2703_v8  ;;  %2314 = vrcp.f32 %v1491_v7 }
 0x15f   :  { %v904_v25 = vpack.c.bf16 %v2307_v41, %v2307_v41  ;;  %v604_v35 = vxor.u32 2147516416, %v540_v19  ;;  %v1370_v3 = vmul.f32 %v2309_v32, %v2705_v9  ;;  %v1372_v18 = vunpack.c.h.bf16 %v1078_v59 }
 0x160   :  { %v935_v56 = vunpack.c.l.bf16 %v871_v49  ;;  %v649_v30 = vxor.u32 2147516416, %v585_v48  ;;  %v1258_v36 = vmul.f32 %v2311_v17, %v2705_v9  ;;  %2316 = vrcp.f32 %v1176_v6 }
 0x161   :  { %v1373_v5 = vunpack.c.l.bf16 %v1078_v59  ;;  %v1051_v2 = vpack.c.bf16 %v987_v33, %v987_v33  ;;  %2318 = vrcp.f32 %v1177_v10  ;;  %v1260_v16 = vunpack.c.h.bf16 %v1062_v47 }
 0x162   :  { %v552_v27 = vpack.c.bf16 %v3132_v15, %v3132_v15  ;;  %v632_v37 = vxor.u32 2147516416, %v568_v50  ;;  %2320 = vrcp.f32 %v1492_v24  ;;  %v1261_v43 = vunpack.c.l.bf16 %v1062_v47  ;;  %v513_v50 = vpop.f32.mrf.mxu3 }
 0x163   :  { %v968_v7 = vunpack.c.l.bf16 %v904_v25  ;;  %v668_v19 = vunpack.c.l.bf16 %v604_v35  ;;  %v2313_v41 = vpop.eup %2312  ;;  %v1371_v32 = vpack.c.bf16 %v1368_v11, %v1370_v3  ;;  %2322 = vrcp.f32 %v1372_v18 }
 0x164   :  { %v999_v49 = vadd.f32 1.0, %v935_v56  ;;  %v713_v48 = vunpack.c.l.bf16 %v649_v30  ;;  %v2315_v29 = vpop.eup %2314  ;;  %v1701_v6 = vsel %vm1683_vm2, %v1627_v54, 0.0  ;;  %v1259_v59 = vpack.c.bf16 %v1256_v21, %v1258_v36 }
 0x165   :  { %2324 = vrcp.f32 %v1373_v5  ;;  %v1183_v10 = vunpack.c.h.bf16 %v1051_v2  ;;  %v1184_v33 = vunpack.c.l.bf16 %v1051_v2  ;;  %v616_v17 = vxor.u32 2147516416, %v552_v27  ;;  %v400_v2 = vpop.f32.mrf.mxu0 }
 0x166   :  { %2326 = vrcp.f32 %v1260_v16  ;;  %v696_v55 = vunpack.c.l.bf16 %v632_v37  ;;  %v2317_v24 = vpop.eup %2316  ;;  %v1032_v47 = vadd.f32 1.0, %v968_v7  ;;  %v887_v25 = vpack.c.bf16 %v2313_v41, %v2313_v41 }
 0x167   :  { %2328 = vrcp.f32 %v1261_v43  ;;  %v744_v35 = vmul.f32 1.442695, %v668_v19  ;;  %v2319_v11 = vpop.eup %2318  ;;  %v3143_v3 = vadd.f32 %v1760_v13, %v3108_v45  ;;  %v1591_v18 = vunpack.c.l.bf16 %v1371_v32 }
 0x168   :  { %v1063_v56 = vpack.c.bf16 %v999_v49, %v999_v49  ;;  %v834_v54 = vmul.f32 1.442695, %v713_v48  ;;  %v2321_v21 = vpop.eup %2320  ;;  %v3146_v30 = vadd.f32 %v1701_v6, %v3114_v44  ;;  %v1575_v36 = vunpack.c.l.bf16 %v1259_v59 }
 0x169   :  { %2330 = vrcp.f32 %v1183_v10  ;;  %v3149_v5 = vadd.f32 %v2942_v40, %v513_v50  ;;  %v2323_v16 = vpop.eup %2322  ;;  %v1179_v27 = vmul.f32 %v2317_v24, %v2703_v8  ;;  %v680_v37 = vunpack.c.l.bf16 %v616_v17 }
 0x16a   :  { %2332 = vrcp.f32 %v1184_v33  ;;  %v800_v45 = vmul.f32 1.442695, %v696_v55  ;;  %v1181_v43 = vmul.f32 %v2319_v11, %v2705_v9  ;;  %v1096_v7 = vpack.c.bf16 %v1032_v47, %v1032_v47  ;;  %v470_v11 = vpop.f32.mrf.mxu2 }
 0x16b   :  { %3539 = vst [vmem:[#allocation21_spill] sm:$0xff] %v3149_v5  ;;  %v2325_v13 = vpop.eup %2324  ;;  %v951_v19 = vunpack.c.l.bf16 %v887_v25  ;;  %2334 = vpow2.f32 %v744_v35  ;;  %v1655_v41 = vmul.f32 %v1591_v18, %v2978_v28  ;;  %v1267_v32 = vunpack.c.h.bf16 %v1063_v56 }
 0x16c   :  { %v2327_v44 = vpop.eup %2326  ;;  %2336 = vpow2.f32 %v834_v54  ;;  %v3155_v49 = vadd.f32 %v2942_v40, %v400_v2  ;;  %v1494_v6 = vmul.f32 %v2315_v29, %v2703_v8  ;;  %v1496_v59 = vmul.f32 %v2321_v21, %v2705_v9  ;;  %v430_v21 = vpop.f32.mrf.mxu1 }
 0x16d   :  { %v2329_v48 = vpop.eup %2328  ;;  %v1268_v55 = vunpack.c.l.bf16 %v1063_v56  ;;  %v586_v10 = vpack.c.bf16 %v3149_v5, %v3149_v5  ;;  %v1375_v33 = vmul.f32 %v2323_v16, %v2703_v8  ;;  %v1377_v17 = vmul.f32 %v2325_v13, %v2705_v9 }
 0x16e   :  { %v768_v50 = vmul.f32 1.442695, %v680_v37  ;;  %2338 = vpow2.f32 %v800_v45  ;;  %v1182_v24 = vpack.c.bf16 %v1179_v27, %v1181_v43  ;;  %v1263_v47 = vmul.f32 %v2327_v44, %v2703_v8 }
 0x16f   :  { %v2331_v28 = vpop.eup %2330  ;;  %v1498_v25 = vunpack.c.h.bf16 %v1096_v7  ;;  %v1015_v35 = vadd.f32 1.0, %v951_v19  ;;  %v1265_v18 = vmul.f32 %v2329_v48, %v2705_v9  ;;  %v1499_v56 = vunpack.c.l.bf16 %v1096_v7 }
 0x170   :  { %v2333_v29 = vpop.eup %2332  ;;  %2340 = vrcp.f32 %v1267_v32  ;;  %v541_v54 = vpack.c.bf16 %v3155_v49, %v3155_v49  ;;  %v1639_v16 = vmul.f32 %v1575_v36, %v2974_v14  ;;  %v1762_v37 = vsel %vm1683_vm2, %v1655_v41, 0.0 }
 0x171   :  { %v2335_v2 = vpop.eup %2334  ;;  %2342 = vrcp.f32 %v1268_v55  ;;  %v650_v27 = vxor.u32 2147516416, %v586_v10  ;;  %v1497_v13 = vpack.c.bf16 %v1494_v6, %v1496_v59  ;;  %v1378_v43 = vpack.c.bf16 %v1375_v33, %v1377_v17 }
 0x172   :  { %v2337_v45 = vpop.eup %2336  ;;  %2344 = vpow2.f32 %v768_v50  ;;  %v3170_v19 = vadd.f32 %v2942_v40, %v470_v11  ;;  %v1564_v7 = vunpack.c.l.bf16 %v1182_v24  ;;  %v1079_v44 = vpack.c.bf16 %v1015_v35, %v1015_v35 }
 0x173   :  { %2346 = vrcp.f32 %v1498_v25  ;;  %v3173_v32 = vadd.f32 %v2942_v40, %v430_v21  ;;  %v1266_v5 = vpack.c.bf16 %v1263_v47, %v1265_v18  ;;  %v860_v14 = vpack.c.bf16 %v2335_v2, %v2335_v2  ;;  %v403_v47 = vpop.f32.mrf.mxu0 }
 0x174   :  { %v2339_v48 = vpop.eup %2338  ;;  %2348 = vrcp.f32 %v1499_v56  ;;  %v605_v36 = vxor.u32 2147516416, %v541_v54  ;;  %v1186_v41 = vmul.f32 %v2331_v28, %v2703_v8  ;;  %v1188_v6 = vmul.f32 %v2333_v29, %v2705_v9 }
 0x175   :  { %v905_v59 = vpack.c.bf16 %v2337_v45, %v2337_v45  ;;  %v714_v55 = vunpack.c.l.bf16 %v650_v27  ;;  %v3178_v33 = vsel %vm1683_vm2, %v1639_v16, 0.0  ;;  %v1763_v17 = vadd.f32 %v1762_v37, %v3143_v3 }
 0x176   :  { %v2341_v10 = vpop.eup %2340  ;;  %v1592_v50 = vunpack.c.l.bf16 %v1378_v43  ;;  %v569_v24 = vpack.c.bf16 %v3170_v19, %v3170_v19  ;;  %v3183_v35 = vunpack.c.l.bf16 %v1497_v13  ;;  %v1379_v11 = vunpack.c.h.bf16 %v1079_v44 }
 0x177   :  { %v2343_v25 = vpop.eup %2342  ;;  %v888_v28 = vpack.c.bf16 %v2339_v48, %v2339_v48  ;;  %v553_v29 = vpack.c.bf16 %v3173_v32, %v3173_v32  ;;  %v1628_v56 = vmul.f32 %v1564_v7, %v3017_v38  ;;  %v1380_v54 = vunpack.c.l.bf16 %v1079_v44 }
 0x178   :  { %3540 = vst [vmem:[#allocation22_spill] sm:$0xff] %v3183_v35  ;;  %v2345_v18 = vpop.eup %2344  ;;  %v924_v21 = vunpack.c.l.bf16 %v860_v14  ;;  %v669_v2 = vunpack.c.l.bf16 %v605_v36  ;;  %v1576_v16 = vunpack.c.l.bf16 %v1266_v5  ;;  %v1189_v37 = vpack.c.bf16 %v1186_v41, %v1188_v6  ;;  %v473_v14 = vpop.f32.mrf.mxu2 }
 0x179   :  { %v2347_v3 = vpop.eup %2346  ;;  %v969_v27 = vunpack.c.l.bf16 %v905_v59  ;;  %v836_v45 = vmul.f32 1.442695, %v714_v55  ;;  %v1656_v13 = vmul.f32 %v1592_v50, %v3026_v0  ;;  %v1270_v35 = vmul.f32 %v2341_v10, %v2703_v8 }
 0x17a   :  { %v2349_v43 = vpop.eup %2348  ;;  %v1272_v48 = vmul.f32 %v2343_v25, %v2705_v9  ;;  %v633_v34 = vxor.u32 2147516416, %v569_v24  ;;  %2350 = vrcp.f32 %v1379_v11  ;;  %v872_v31 = vpack.c.bf16 %v2345_v18, %v2345_v18 }
 0x17b   :  { %v952_v53 = vunpack.c.l.bf16 %v888_v28  ;;  %v617_v38 = vxor.u32 2147516416, %v553_v29  ;;  %2352 = vrcp.f32 %v1380_v54  ;;  %v988_v7 = vadd.f32 1.0, %v924_v21  ;;  %v405_v29 = vpop.f32.mrf.mxu0  ;;  %v515_v21 = vpop.f32.mrf.mxu3 }
 0x17c   :  { %v746_v44 = vmul.f32 1.442695, %v669_v2  ;;  %v3192_v5 = vadd.f32 %v2942_v40, %v403_v47  ;;  %v1703_v36 = vsel %vm1683_vm2, %v1628_v56, 0.0  ;;  %v1565_v41 = vunpack.c.l.bf16 %v1189_v37 }
 0x17d   :  { %v1033_v0 = vadd.f32 1.0, %v969_v27  ;;  %2354 = vpow2.f32 %v836_v45  ;;  %v1640_v6 = vmul.f32 %v1576_v16, %v3032_v60  ;;  %v3197_v59 = vmul.f32 %v2347_v3, %v2703_v8 }
 0x17e   :  { %v3200_v55 = vmul.f32 %v2349_v43, %v2705_v9  ;;  %v697_v10 = vunpack.c.l.bf16 %v633_v34  ;;  %v1764_v50 = vsel %vm1683_vm2, %v1656_v13, 0.0  ;;  %v936_v24 = vunpack.c.l.bf16 %v872_v31  ;;  %v3210_v31 = vld [vmem:[%s3505_s2] ss:$0 sm:$0xff] }
 0x17f   :  { %3541 = vst [vmem:[#allocation23_spill] sm:$0xff] %v3197_v59  ;;  %v1016_v40 = vadd.f32 1.0, %v952_v53  ;;  %v681_v47 = vunpack.c.l.bf16 %v617_v38  ;;  %v1273_v25 = vpack.c.bf16 %v1270_v35, %v1272_v48  ;;  %v1052_v11 = vpack.c.bf16 %v988_v7, %v988_v7 }
 0x180   :  { %3542 = vst [vmem:[#allocation24_spill] sm:$0xff] %v3200_v55  ;;  %2356 = vpow2.f32 %v746_v44  ;;  %v542_v28 = vpack.c.bf16 %v3192_v5, %v3192_v5  ;;  %v2351_v60 = vpop.eup %2350  ;;  %v1704_v18 = vadd.f32 %v1703_v36, %v3146_v30  ;;  %v1629_v56 = vmul.f32 %v1565_v41, %v3039_v46 }
 0x181   :  { %v1097_v54 = vpack.c.bf16 %v1033_v0, %v1033_v0  ;;  %v3213_v34 = vadd.f32 %v3210_v31, %v473_v14  ;;  %v2353_v53 = vpop.eup %2352  ;;  %v3216_v35 = vsel %vm1683_vm2, %v1640_v6, 0.0  ;;  %v3218_v2 = vadd.f32 %v1764_v50, %v1763_v17 }
 0x182   :  { %v802_v46 = vmul.f32 1.442695, %v697_v10  ;;  %v1000_v16 = vadd.f32 1.0, %v936_v24  ;;  %v1080_v37 = vpack.c.bf16 %v1016_v40, %v1016_v40  ;;  %v770_v27 = vmul.f32 1.442695, %v681_v47  ;;  %v475_v10 = vpop.f32.mrf.mxu2 }
 0x183   :  { %v2355_v3 = vpop.eup %2354  ;;  %v3223_v45 = vadd.f32 %v3210_v31, %v405_v29  ;;  %v1577_v43 = vunpack.c.l.bf16 %v1273_v25  ;;  %v1190_v13 = vunpack.c.h.bf16 %v1052_v11  ;;  %v3226_v48 = vadd.f32 %v3210_v31, %v515_v21 }
 0x184   :  { %v606_v38 = vxor.u32 2147516416, %v542_v28  ;;  %v1705_v17 = vsel %vm1683_vm2, %v1629_v56, 0.0  ;;  %v1505_v7 = vunpack.c.h.bf16 %v1097_v54  ;;  %v1191_v44 = vunpack.c.l.bf16 %v1052_v11 }
 0x185   :  { %3543 = vst [vmem:[#allocation25_spill] sm:$0xff] %v3226_v48  ;;  %v570_v14 = vpack.c.bf16 %v3213_v34, %v3213_v34  ;;  %v1382_v41 = vmul.f32 %v2351_v60, %v2703_v8  ;;  %v1384_v0 = vmul.f32 %v2353_v53, %v2705_v9  ;;  %v906_v6 = vpack.c.bf16 %v2355_v3, %v2355_v3 }
 0x186   :  { %v2357_v36 = vpop.eup %2356  ;;  %2358 = vpow2.f32 %v802_v46  ;;  %v1064_v50 = vpack.c.bf16 %v1000_v16, %v1000_v16  ;;  %v1386_v24 = vunpack.c.h.bf16 %v1080_v37  ;;  %v543_v40 = vpack.c.bf16 %v3223_v45, %v3223_v45  ;;  %v433_v16 = vpop.f32.mrf.mxu1 }
 0x187   :  { %2360 = vpow2.f32 %v770_v27  ;;  %v1387_v47 = vunpack.c.l.bf16 %v1080_v37  ;;  %v587_v25 = vpack.c.bf16 %v3226_v48, %v3226_v48  ;;  %v670_v11 = vunpack.c.l.bf16 %v606_v38 }
 0x188   :  { %2362 = vrcp.f32 %v1190_v13  ;;  %v1641_v28 = vmul.f32 %v1577_v43, %v3053_v58  ;;  %v861_v29 = vpack.c.bf16 %v2357_v36, %v2357_v36  ;;  %v634_v60 = vxor.u32 2147516416, %v570_v14 }
 0x189   :  { %2364 = vrcp.f32 %v1191_v44  ;;  %v1506_v56 = vunpack.c.l.bf16 %v1097_v54  ;;  %v970_v21 = vunpack.c.l.bf16 %v906_v6  ;;  %v3239_v53 = vadd.f32 %v3210_v31, %v475_v10  ;;  %v408_v10 = vpop.f32.mrf.mxu0 }
 0x18a   :  { %2366 = vrcp.f32 %v1505_v7  ;;  %v1385_v46 = vpack.c.bf16 %v1382_v41, %v1384_v0  ;;  %v1274_v3 = vunpack.c.h.bf16 %v1064_v50  ;;  %v607_v37 = vxor.u32 2147516416, %v543_v40 }
 0x18b   :  { %2368 = vrcp.f32 %v1386_v24  ;;  %v651_v13 = vxor.u32 2147516416, %v587_v25  ;;  %v748_v38 = vmul.f32 1.442695, %v670_v11  ;;  %v3242_v58 = vadd.f32 %v3210_v31, %v433_v16 }
 0x18c   :  { %v2359_v27 = vpop.eup %2358  ;;  %2370 = vrcp.f32 %v1387_v47  ;;  %v3244_v44 = vadd.f32 %v1705_v17, %v1704_v18  ;;  %v1275_v54 = vunpack.c.l.bf16 %v1064_v50  ;;  %v925_v7 = vunpack.c.l.bf16 %v861_v29 }
 0x18d   :  { %3544 = vst [vmem:[#allocation26_spill] sm:$0xff] %v3242_v58  ;;  %v2361_v43 = vpop.eup %2360  ;;  %v698_v14 = vunpack.c.l.bf16 %v634_v60  ;;  %v3247_v41 = vsel %vm1683_vm2, %v1641_v28, 0.0  ;;  %2372 = vrcp.f32 %v1506_v56  ;;  %v1034_v0 = vadd.f32 1.0, %v970_v21  ;;  %v478_v28 = vpop.f32.mrf.mxu2 }
 0x18e   :  { %v2363_v36 = vpop.eup %2362  ;;  %3545 = vst [vmem:[#allocation27_spill] sm:$0xff] %v3247_v41  ;;  %v571_v6 = vpack.c.bf16 %v3239_v53, %v3239_v53  ;;  %v1593_v40 = vunpack.c.l.bf16 %v1385_v46  ;;  %2374 = vrcp.f32 %v1274_v3  ;;  %v889_v47 = vpack.c.bf16 %v2359_v27, %v2359_v27  ;;  %v435_v63 = vpop.f32.mrf.mxu1 }
 0x18f   :  { %v2365_v24 = vpop.eup %2364  ;;  %v671_v25 = vunpack.c.l.bf16 %v607_v37  ;;  %v873_v17 = vpack.c.bf16 %v2361_v43, %v2361_v43  ;;  %v715_v50 = vunpack.c.l.bf16 %v651_v13  ;;  %2376 = vpow2.f32 %v748_v38  ;;  %v3258_v38 = vpop.f32.mrf.mxu3 }
 0x190   :  { %v2367_v18 = vpop.eup %2366  ;;  %v554_v11 = vpack.c.bf16 %v3242_v58, %v3242_v58  ;;  %2378 = vrcp.f32 %v1275_v54  ;;  %v989_v60 = vadd.f32 1.0, %v925_v7  ;;  %v804_v56 = vmul.f32 1.442695, %v698_v14 }
 0x191   :  { %v2369_v29 = vpop.eup %2368  ;;  %v3254_v21 = vadd.f32 %v3210_v31, %v408_v10  ;;  %v1193_v46 = vmul.f32 %v2363_v36, %v2703_v8  ;;  %v1195_v3 = vmul.f32 %v2365_v24, %v2705_v9  ;;  %v1098_v37 = vpack.c.bf16 %v1034_v0, %v1034_v0 }
 0x192   :  { %v2371_v16 = vpop.eup %2370  ;;  %v635_v27 = vxor.u32 2147516416, %v571_v6  ;;  %v953_v13 = vunpack.c.l.bf16 %v889_v47  ;;  %v750_v43 = vmul.f32 1.442695, %v671_v25  ;;  %v3263_v54 = vadd.f32 %v3210_v31, %v478_v28 }
 0x193   :  { %v544_v30 = vpack.c.bf16 %v3254_v21, %v3254_v21  ;;  %v2373_v7 = vpop.eup %2372  ;;  %v3266_v14 = vmul.f32 %v2367_v18, %v2703_v8  ;;  %v937_v10 = vunpack.c.l.bf16 %v873_v17  ;;  %v838_v36 = vmul.f32 1.442695, %v715_v50 }
 0x194   :  { %v618_v48 = vxor.u32 2147516416, %v554_v11  ;;  %v2375_v24 = vpop.eup %2374  ;;  %v1389_v0 = vmul.f32 %v2369_v29, %v2703_v8  ;;  %v1391_v6 = vmul.f32 %v2371_v16, %v2705_v9  ;;  %v1053_v47 = vpack.c.bf16 %v989_v60, %v989_v60 }
 0x195   :  { %2380 = vpow2.f32 %v804_v56  ;;  %v2377_v25 = vpop.eup %2376  ;;  %v1657_v55 = vmul.f32 %v1593_v40, %v3076_v22  ;;  %v1196_v59 = vpack.c.bf16 %v1193_v46, %v1195_v3  ;;  %v1512_v28 = vunpack.c.h.bf16 %v1098_v37 }
 0x196   :  { %v699_v39 = vunpack.c.l.bf16 %v635_v27  ;;  %v2379_v23 = vpop.eup %2378  ;;  %v1017_v57 = vadd.f32 1.0, %v953_v13  ;;  %2382 = vpow2.f32 %v750_v43  ;;  %v608_v18 = vxor.u32 2147516416, %v544_v30 }
 0x197   :  { %v572_v17 = vpack.c.bf16 %v3263_v54, %v3263_v54  ;;  %v1513_v50 = vunpack.c.l.bf16 %v1098_v37  ;;  %v1001_v11 = vadd.f32 1.0, %v937_v10  ;;  %2384 = vpow2.f32 %v838_v36 }
 0x198   :  { %v682_v29 = vunpack.c.l.bf16 %v618_v48  ;;  %v1392_v16 = vpack.c.bf16 %v1389_v0, %v1391_v6  ;;  %v1197_v60 = vunpack.c.h.bf16 %v1053_v47  ;;  %v862_v56 = vpack.c.bf16 %v2377_v25, %v2377_v25 }
 0x199   :  { %v672_v4 = vunpack.c.l.bf16 %v608_v18  ;;  %v1277_v22 = vmul.f32 %v2375_v24, %v2703_v8  ;;  %2386 = vrcp.f32 %v1512_v28  ;;  %v806_v40 = vmul.f32 1.442695, %v699_v39  ;;  %v3278_v24 = vpop.f32.mrf.mxu3 }
 0x19a   :  { %v636_v46 = vxor.u32 2147516416, %v572_v17  ;;  %v1566_v27 = vunpack.c.l.bf16 %v1196_v59  ;;  %v1279_v30 = vmul.f32 %v2379_v23, %v2705_v9  ;;  %v1198_v13 = vunpack.c.l.bf16 %v1053_v47 }
 0x19b   :  { %v2381_v3 = vpop.eup %2380  ;;  %v1081_v43 = vpack.c.bf16 %v1017_v57, %v1017_v57  ;;  %2388 = vrcp.f32 %v1513_v50  ;;  %v1065_v37 = vpack.c.bf16 %v1001_v11, %v1001_v11  ;;  %v772_v10 = vmul.f32 1.442695, %v682_v29 }
 0x19c   :  { %v3276_v48 = vadd.f32 %v3210_v31, %v435_v63  ;;  %v2383_v36 = vpop.eup %2382  ;;  %v1594_v0 = vunpack.c.l.bf16 %v1392_v16  ;;  %2390 = vrcp.f32 %v1197_v60  ;;  %v926_v6 = vunpack.c.l.bf16 %v862_v56 }
 0x19d   :  { %v752_v39 = vmul.f32 1.442695, %v672_v4  ;;  %v2385_v25 = vpop.eup %2384  ;;  %v3281_v59 = vmul.f32 %v2373_v7, %v2705_v9  ;;  %v890_v23 = vpack.c.bf16 %v2381_v3, %v2381_v3  ;;  %2392 = vpow2.f32 %v806_v40  ;;  %v410_v40 = vpop.f32.mrf.mxu0 }
 0x19e   :  { %3546 = vst [vmem:[#allocation28_spill] sm:$0xff] %v3276_v48  ;;  %v700_v57 = vunpack.c.l.bf16 %v636_v46  ;;  %v1766_v47 = vsel %vm1683_vm2, %v1657_v55, 0.0  ;;  %v1630_v28 = vmul.f32 %v1566_v27, %v3105_v1  ;;  %2394 = vrcp.f32 %v1198_v13 }
 0x19f   :  { %v1393_v63 = vunpack.c.h.bf16 %v1081_v43  ;;  %v3285_v18 = vpop.eup %2386  ;;  %v1281_v17 = vunpack.c.h.bf16 %v1065_v37  ;;  %2396 = vpow2.f32 %v772_v10  ;;  %v863_v50 = vpack.c.bf16 %v2383_v36, %v2383_v36 }
 0x1a0   :  { %v555_v4 = vpack.c.bf16 %v3276_v48, %v3276_v48  ;;  %v1280_v11 = vpack.c.bf16 %v1277_v22, %v1279_v30  ;;  %v1658_v7 = vmul.f32 %v1594_v0, %v3122_v51  ;;  %v990_v29 = vadd.f32 1.0, %v926_v6  ;;  %v480_v48 = vpop.f32.mrf.mxu2 }
 0x1a1   :  { %2398 = vpow2.f32 %v752_v39  ;;  %v3290_v16 = vpop.eup %2388  ;;  %v1282_v55 = vunpack.c.l.bf16 %v1065_v37  ;;  %v907_v60 = vpack.c.bf16 %v2385_v25, %v2385_v25  ;;  %v954_v1 = vunpack.c.l.bf16 %v890_v23 }
 0x1a2   :  { %3547 = vst [vmem:[#allocation29_spill] sm:$0xff] %v3290_v16  ;;  %v808_v56 = vmul.f32 1.442695, %v700_v57  ;;  %v2391_v46 = vpop.eup %2390  ;;  %v1767_v3 = vadd.f32 %v1766_v47, %v3218_v2  ;;  %v1394_v27 = vunpack.c.l.bf16 %v1081_v43  ;;  %2400 = vrcp.f32 %v1393_v63 }
 0x1a3   :  { %v3295_v13 = vadd.f32 %v3210_v31, %v3258_v38  ;;  %v2393_v22 = vpop.eup %2392  ;;  %v1707_v51 = vsel %vm1683_vm2, %v1630_v28, 0.0  ;;  %2402 = vrcp.f32 %v1281_v17  ;;  %v927_v30 = vunpack.c.l.bf16 %v863_v50  ;;  %v523_v28 = vpop.f32.mrf.mxu3 }
 0x1a4   :  { %v619_v10 = vxor.u32 2147516416, %v555_v4  ;;  %v2395_v37 = vpop.eup %2394  ;;  %v1768_v36 = vsel %vm1683_vm2, %v1658_v7, 0.0  ;;  %v1054_v0 = vpack.c.bf16 %v990_v29, %v990_v29  ;;  %2404 = vpow2.f32 %v808_v56 }
 0x1a5   :  { %3548 = vst [vmem:[#allocation30_spill] sm:$0xff] %v3295_v13  ;;  %v3300_v6 = vadd.f32 %v3210_v31, %v410_v40  ;;  %v2397_v2 = vpop.eup %2396  ;;  %v3302_v43 = vunpack.c.l.bf16 %v1280_v11  ;;  %2406 = vrcp.f32 %v1282_v55  ;;  %v971_v38 = vunpack.c.l.bf16 %v907_v60 }
 0x1a6   :  { %v1018_v39 = vadd.f32 1.0, %v954_v1  ;;  %v3305_v23 = vadd.f32 %v1707_v51, %v3244_v44  ;;  %2408 = vrcp.f32 %v1394_v27  ;;  %v588_v57 = vpack.c.bf16 %v3295_v13, %v3295_v13 }
 0x1a7   :  { %v2399_v25 = vpop.eup %2398  ;;  %v891_v47 = vpack.c.bf16 %v2393_v22, %v2393_v22  ;;  %v3309_v63 = vadd.f32 %v1768_v36, %v1767_v3  ;;  %v991_v17 = vadd.f32 1.0, %v927_v30  ;;  %v683_v50 = vunpack.c.l.bf16 %v619_v10 }
 0x1a8   :  { %v864_v4 = vpack.c.bf16 %v2399_v25, %v2399_v25  ;;  %v2401_v11 = vpop.eup %2400  ;;  %v3312_v7 = vmul.f32 %v2391_v46, %v2703_v8  ;;  %v1204_v29 = vunpack.c.h.bf16 %v1054_v0  ;;  %v874_v55 = vpack.c.bf16 %v2397_v2, %v2397_v2 }
 0x1a9   :  { %v545_v44 = vpack.c.bf16 %v3300_v6, %v3300_v6  ;;  %v3316_v60 = vpop.eup %2402  ;;  %v3319_v1 = vmul.f32 %v2395_v37, %v2705_v9  ;;  %v3321_v56 = vadd.f32 1.0, %v971_v38  ;;  %v1205_v40 = vunpack.c.l.bf16 %v1054_v0 }
 0x1aa   :  { %v1082_v3 = vpack.c.bf16 %v1018_v39, %v1018_v39  ;;  %v2405_v27 = vpop.eup %2404  ;;  %v652_v22 = vxor.u32 2147516416, %v588_v57  ;;  %v955_v51 = vunpack.c.l.bf16 %v891_v47  ;;  %v928_v30 = vunpack.c.l.bf16 %v864_v4 }
 0x1ab   :  { %v609_v46 = vxor.u32 2147516416, %v545_v44  ;;  %v2407_v10 = vpop.eup %2406  ;;  %v3324_v36 = vmul.f32 %v2401_v11, %v2703_v8  ;;  %v1055_v2 = vpack.c.bf16 %v991_v17, %v991_v17  ;;  %v774_v25 = vmul.f32 1.442695, %v683_v50 }
 0x1ac   :  { %v892_v13 = vpack.c.bf16 %v2405_v27, %v2405_v27  ;;  %v2409_v61 = vpop.eup %2408  ;;  %2410 = vrcp.f32 %v1204_v29  ;;  %v938_v37 = vunpack.c.l.bf16 %v874_v55  ;;  %v3328_v0 = vadd.f32 %v3210_v31, %v3278_v24 }
 0x1ad   :  { %v992_v38 = vadd.f32 1.0, %v928_v30  ;;  %2412 = vrcp.f32 %v1205_v40  ;;  %v1400_v39 = vunpack.c.h.bf16 %v1082_v3  ;;  %v1401_v57 = vunpack.c.l.bf16 %v1082_v3 }
 0x1ae   :  { %3549 = vst [vmem:[#allocation31_spill] sm:$0xff] %v3328_v0  ;;  %v956_v47 = vunpack.c.l.bf16 %v892_v13  ;;  %v1019_v4 = vadd.f32 1.0, %v955_v51  ;;  %v673_v11 = vunpack.c.l.bf16 %v609_v46  ;;  %v3331_v17 = vadd.f32 %v3210_v31, %v480_v48  ;;  %v525_v13 = vpop.f32.mrf.mxu3 }
 0x1af   :  { %v1056_v44 = vpack.c.bf16 %v992_v38, %v992_v38  ;;  %v1398_v50 = vmul.f32 %v2409_v61, %v2705_v9  ;;  %v716_v27 = vunpack.c.l.bf16 %v652_v22  ;;  %v1211_v29 = vunpack.c.h.bf16 %v1055_v2 }
 0x1b0   :  { %2414 = vpow2.f32 %v774_v25  ;;  %v1020_v55 = vadd.f32 1.0, %v956_v47  ;;  %v3335_v24 = vadd.f32 %v3210_v31, %v523_v28  ;;  %v754_v30 = vmul.f32 1.442695, %v673_v11 }
 0x1b1   :  { %v573_v40 = vpack.c.bf16 %v3331_v17, %v3331_v17  ;;  %v1002_v3 = vadd.f32 1.0, %v938_v37  ;;  %2416 = vrcp.f32 %v1400_v39  ;;  %v1212_v51 = vunpack.c.l.bf16 %v1055_v2 }
 0x1b2   :  { %3550 = vst [vmem:[#allocation32_spill] sm:$0xff] %v3335_v24  ;;  %v589_v48 = vpack.c.bf16 %v3328_v0, %v3328_v0  ;;  %v2411_v46 = vpop.eup %2410  ;;  %2418 = vrcp.f32 %v1401_v57  ;;  %v1083_v61 = vpack.c.bf16 %v1019_v4, %v1019_v4  ;;  %v1218_v22 = vunpack.c.h.bf16 %v1056_v44 }
 0x1b3   :  { %v637_v25 = vxor.u32 2147516416, %v573_v40  ;;  %v2413_v38 = vpop.eup %2412  ;;  %v1203_v28 = vpack.c.bf16 %v3312_v7, %v3319_v1  ;;  %2420 = vrcp.f32 %v1211_v29  ;;  %v1219_v47 = vunpack.c.l.bf16 %v1056_v44 }
 0x1b4   :  { %v3344_v11 = vadd.f32 %v3210_v31, %v525_v13  ;;  %v1084_v37 = vpack.c.bf16 %v1020_v55, %v1020_v55  ;;  %v590_v2 = vpack.c.bf16 %v3335_v24, %v3335_v24  ;;  %2422 = vpow2.f32 %v754_v30 }
 0x1b5   :  { %v701_v39 = vunpack.c.l.bf16 %v637_v25  ;;  %v1399_v57 = vpack.c.bf16 %v3324_v36, %v1398_v50  ;;  %v3349_v4 = vpack.c.bf16 %v1002_v3, %v1002_v3  ;;  %v840_v40 = vmul.f32 1.442695, %v716_v27 }
 0x1b6   :  { %3551 = vst [vmem:[#allocation33_spill] sm:$0xff] %v3344_v11  ;;  %v2415_v0 = vpop.eup %2414  ;;  %2424 = vrcp.f32 %v1212_v51  ;;  %v1407_v58 = vunpack.c.h.bf16 %v1083_v61  ;;  %v653_v7 = vxor.u32 2147516416, %v589_v48  ;;  %v3353_v31 = vmul.f32 %v3316_v60, %v2703_v8 }
 0x1b7   :  { %2426 = vrcp.f32 %v1218_v22  ;;  %v810_v1 = vmul.f32 1.442695, %v701_v39  ;;  %v2417_v44 = vpop.eup %2416  ;;  %v1408_v29 = vunpack.c.l.bf16 %v1083_v61  ;;  %v591_v55 = vpack.c.bf16 %v3344_v11, %v3344_v11 }
 0x1b8   :  { %2428 = vrcp.f32 %v1219_v47  ;;  %v2419_v30 = vpop.eup %2418  ;;  %v3358_v36 = vmul.f32 %v2407_v10, %v2705_v9  ;;  %v1414_v50 = vunpack.c.h.bf16 %v1084_v37  ;;  %v654_v27 = vxor.u32 2147516416, %v590_v2 }
 0x1b9   :  { %2430 = vpow2.f32 %v810_v1  ;;  %v2421_v13 = vpop.eup %2420  ;;  %v1567_v3 = vunpack.c.l.bf16 %v1203_v28  ;;  %v1595_v51 = vunpack.c.l.bf16 %v1399_v57  ;;  %v1415_v48 = vunpack.c.l.bf16 %v1084_v37 }
 0x1ba   :  { %2432 = vpow2.f32 %v840_v40  ;;  %v2423_v22 = vpop.eup %2422  ;;  %v1288_v60 = vunpack.c.h.bf16 %v3349_v4  ;;  %v875_v61 = vpack.c.bf16 %v2415_v0, %v2415_v0  ;;  %v717_v25 = vunpack.c.l.bf16 %v653_v7 }
 0x1bb   :  { %2434 = vrcp.f32 %v1407_v58  ;;  %v3363_v39 = vpack.c.bf16 %v3321_v56, %v3321_v56  ;;  %v865_v10 = vpack.c.bf16 %v2423_v22, %v2423_v22  ;;  %v655_v2 = vxor.u32 2147516416, %v591_v55 }
 0x1bc   :  { %v2425_v47 = vpop.eup %2424  ;;  %2436 = vrcp.f32 %v1408_v29  ;;  %v1207_v28 = vmul.f32 %v2411_v46, %v2703_v8  ;;  %v1209_v57 = vmul.f32 %v2413_v38, %v2705_v9  ;;  %v718_v37 = vunpack.c.l.bf16 %v654_v27 }
 0x1bd   :  { %v2427_v1 = vpop.eup %2426  ;;  %2438 = vrcp.f32 %v1414_v50  ;;  %v1631_v0 = vmul.f32 %v1567_v3, %v3155_v49  ;;  %v1659_v58 = vmul.f32 %v1595_v51, %v3170_v19  ;;  %v929_v7 = vunpack.c.l.bf16 %v865_v10 }
 0x1be   :  { %v2429_v40 = vpop.eup %2428  ;;  %2440 = vrcp.f32 %v1415_v48  ;;  %v1214_v56 = vmul.f32 %v2421_v13, %v2703_v8  ;;  %v939_v29 = vunpack.c.l.bf16 %v875_v61  ;;  %v842_v55 = vmul.f32 1.442695, %v717_v25 }
 0x1bf   :  { %v2431_v11 = vpop.eup %2430  ;;  %2442 = vrcp.f32 %v1288_v60  ;;  %v1216_v46 = vmul.f32 %v2425_v47, %v2705_v9  ;;  %v993_v24 = vadd.f32 1.0, %v929_v7  ;;  %v719_v50 = vunpack.c.l.bf16 %v655_v2 }
 0x1c0   :  { %v2433_v22 = vpop.eup %2432  ;;  %v893_v38 = vpack.c.bf16 %v2431_v11, %v2431_v11  ;;  %v1210_v41 = vpack.c.bf16 %v1207_v28, %v1209_v57  ;;  %v1403_v49 = vmul.f32 %v2417_v44, %v2703_v8  ;;  %v1405_v19 = vmul.f32 %v2419_v30, %v2705_v9 }
 0x1c1   :  { %v2435_v27 = vpop.eup %2434  ;;  %v844_v3 = vmul.f32 1.442695, %v718_v37  ;;  %v1221_v48 = vmul.f32 %v2427_v1, %v2703_v8  ;;  %v1223_v13 = vmul.f32 %v2429_v40, %v2705_v9  ;;  %v1057_v60 = vpack.c.bf16 %v993_v24, %v993_v24 }
 0x1c2   :  { %v2437_v51 = vpop.eup %2436  ;;  %v957_v61 = vunpack.c.l.bf16 %v893_v38  ;;  %v1289_v47 = vunpack.c.l.bf16 %v3349_v4  ;;  %v908_v10 = vpack.c.bf16 %v2433_v22, %v2433_v22  ;;  %v1003_v11 = vadd.f32 1.0, %v939_v29 }
 0x1c3   :  { %v2439_v25 = vpop.eup %2438  ;;  %2444 = vpow2.f32 %v842_v55  ;;  %v1217_v28 = vpack.c.bf16 %v1214_v56, %v1216_v46  ;;  %v1225_v57 = vunpack.c.h.bf16 %v1057_v60  ;;  %v1226_v44 = vunpack.c.l.bf16 %v1057_v60 }
 0x1c4   :  { %v2441_v2 = vpop.eup %2440  ;;  %v846_v7 = vmul.f32 1.442695, %v719_v50  ;;  %v1410_v37 = vmul.f32 %v2435_v27, %v2703_v8  ;;  %v1412_v1 = vmul.f32 %v2437_v51, %v2705_v9  ;;  %2446 = vpow2.f32 %v844_v3 }
 0x1c5   :  { %v3376_v30 = vpop.eup %2442  ;;  %v1021_v24 = vadd.f32 1.0, %v957_v61  ;;  %v1568_v40 = vunpack.c.l.bf16 %v1210_v41  ;;  %v1406_v38 = vpack.c.bf16 %v1403_v49, %v1405_v19  ;;  %v1224_v16 = vpack.c.bf16 %v1221_v48, %v1223_v13 }
 0x1c6   :  { %2448 = vrcp.f32 %v1225_v57  ;;  %v1417_v4 = vmul.f32 %v2439_v25, %v2703_v8  ;;  %v1419_v29 = vmul.f32 %v2441_v2, %v2705_v9  ;;  %v1709_v55 = vsel %vm1683_vm2, %v1631_v0, 0.0 }
 0x1c7   :  { %2450 = vrcp.f32 %v1226_v44  ;;  %v1085_v56 = vpack.c.bf16 %v1021_v24, %v1021_v24  ;;  %v1569_v22 = vunpack.c.l.bf16 %v1217_v28  ;;  %v1067_v46 = vpack.c.bf16 %v1003_v11, %v1003_v11 }
 0x1c8   :  { %2452 = vpow2.f32 %v846_v7  ;;  %v972_v27 = vunpack.c.l.bf16 %v908_v10  ;;  %v1413_v51 = vpack.c.bf16 %v1410_v37, %v1412_v1  ;;  %v1632_v41 = vmul.f32 %v1568_v40, %v3192_v5 }
 0x1c9   :  { %v2445_v50 = vpop.eup %2444  ;;  %v1421_v3 = vunpack.c.h.bf16 %v1085_v56  ;;  %v1422_v60 = vunpack.c.l.bf16 %v1085_v56  ;;  %2454 = vrcp.f32 %v1289_v47  ;;  %v1596_v49 = vunpack.c.l.bf16 %v1406_v38 }
 0x1ca   :  { %v1570_v19 = vunpack.c.l.bf16 %v1224_v16  ;;  %v2447_v48 = vpop.eup %2446  ;;  %v1710_v13 = vadd.f32 %v1709_v55, %v3305_v23  ;;  %v1770_v61 = vsel %vm1683_vm2, %v1659_v58, 0.0  ;;  %v1420_v25 = vpack.c.bf16 %v1417_v4, %v1419_v29 }
 0x1cb   :  { %2456 = vrcp.f32 %v1421_v3  ;;  %v1633_v11 = vmul.f32 %v1569_v22, %v3223_v45  ;;  %v1295_v2 = vunpack.c.h.bf16 %v1067_v46  ;;  %v909_v10 = vpack.c.bf16 %v2445_v50, %v2445_v50 }
 0x1cc   :  { %v2449_v0 = vpop.eup %2448  ;;  %2458 = vrcp.f32 %v1422_v60  ;;  %v1036_v57 = vadd.f32 1.0, %v972_v27  ;;  %v1296_v44 = vunpack.c.l.bf16 %v1067_v46  ;;  %v1597_v5 = vunpack.c.l.bf16 %v1413_v51 }
 0x1cd   :  { %v2451_v28 = vpop.eup %2450  ;;  %v1228_v47 = vmul.f32 %v2449_v0, %v2703_v8  ;;  %v1711_v7 = vsel %vm1683_vm2, %v1632_v41, 0.0  ;;  %v1660_v23 = vmul.f32 %v1596_v49, %v3213_v34  ;;  %v1634_v58 = vmul.f32 %v1570_v19, %v3254_v21 }
 0x1ce   :  { %v2453_v16 = vpop.eup %2452  ;;  %v1230_v37 = vmul.f32 %v2451_v28, %v2705_v9  ;;  %v1598_v1 = vunpack.c.l.bf16 %v1420_v25  ;;  %v910_v45 = vpack.c.bf16 %v2447_v48, %v2447_v48  ;;  %v1713_v40 = vsel %vm1683_vm2, %v1633_v11, 0.0 }
 0x1cf   :  { %v2455_v24 = vpop.eup %2454  ;;  %2460 = vrcp.f32 %v1295_v2  ;;  %v973_v38 = vunpack.c.l.bf16 %v909_v10  ;;  %v2513_v29 = vmov 0.0   ;;  %v1712_v55 = vadd.f32 %v1711_v7, %v1710_v13 }
 0x1d0   :  { %v1231_v4 = vpack.c.bf16 %v1228_v47, %v1230_v37  ;;  %28 = vst.msk [vmem:[#allocation2] sm:$0x3] %vm27_vm3, %v2513_v29  ;;  %2462 = vrcp.f32 %v1296_v44  ;;  %v1661_v34 = vmul.f32 %v1597_v5, %v3239_v53  ;;  %v911_v21 = vpack.c.bf16 %v2453_v16, %v2453_v16 }
 0x1d1   :  { %v2457_v56 = vpop.eup %2456  ;;  %v1772_v46 = vsel %vm1683_vm2, %v1660_v23, 0.0  ;;  %v1715_v50 = vsel %vm1683_vm2, %v1634_v58, 0.0  ;;  %v1714_v3 = vadd.f32 %v1713_v40, %v1712_v55  ;;  %v1662_v60 = vmul.f32 %v1598_v1, %v3263_v54 }
 0x1d2   :  { %v2459_v22 = vpop.eup %2458  ;;  %v1571_v27 = vunpack.c.l.bf16 %v1231_v4  ;;  %v1424_v51 = vmul.f32 %v2457_v56, %v2703_v8  ;;  %v974_v41 = vunpack.c.l.bf16 %v910_v45  ;;  %v1287_v19 = vpack.c.bf16 %v3353_v31, %v3358_v36 }
 0x1d3   :  { %v1426_v49 = vmul.f32 %v2459_v22, %v2705_v9  ;;  %v1771_v53 = vadd.f32 %v1770_v61, %v3309_v63  ;;  %v1037_v48 = vadd.f32 1.0, %v973_v38  ;;  %v1774_v25 = vsel %vm1683_vm2, %v1661_v34, 0.0 }
 0x1d4   :  { %v1635_v13 = vmul.f32 %v1571_v27, %v3300_v6  ;;  %v1716_v0 = vadd.f32 %v1715_v50, %v1714_v3  ;;  %v975_v2 = vunpack.c.l.bf16 %v911_v21  ;;  %v1519_v28 = vunpack.c.h.bf16 %v3363_v39 }
 0x1d5   :  { %v1427_v11 = vpack.c.bf16 %v1424_v51, %v1426_v49  ;;  %v2461_v10 = vpop.eup %2460  ;;  %v1773_v54 = vadd.f32 %v1772_v46, %v1771_v53  ;;  %v1100_v44 = vpack.c.bf16 %v1036_v57, %v1036_v57  ;;  %v1776_v31 = vsel %vm1683_vm2, %v1662_v60, 0.0 }
 0x1d6   :  { %v1717_v5 = vsel %vm1683_vm2, %v1635_v13, 0.0  ;;  %v2463_v47 = vpop.eup %2462  ;;  %v1038_v36 = vadd.f32 1.0, %v974_v41  ;;  %v1520_v6 = vunpack.c.l.bf16 %v3363_v39  ;;  %v1291_v16 = vmul.f32 %v3376_v30, %v2703_v8 }
 0x1d7   :  { %v1718_v63 = vadd.f32 %v1717_v5, %v1716_v0  ;;  %v1599_v61 = vunpack.c.l.bf16 %v1427_v11  ;;  %v1293_v7 = vmul.f32 %v2455_v24, %v2705_v9  ;;  %v1775_v23 = vadd.f32 %v1774_v25, %v1773_v54  ;;  %v3555_v11 = vld [vmem:[#allocation12_spill] sm:$0xff] }
 0x1d8   :  { %v1101_v58 = vpack.c.bf16 %v1037_v48, %v1037_v48  ;;  %v1039_v1 = vadd.f32 1.0, %v975_v2  ;;  %v1579_v45 = vunpack.c.l.bf16 %v1287_v19  ;;  %v1298_v40 = vmul.f32 %v2461_v10, %v2703_v8  ;;  %v3552_v48 = vld [vmem:[#allocation29_spill] sm:$0xff]  ;;  %v3556_v5 = vld [vmem:[#allocation28_spill] sm:$0xff] }
 0x1d9   :  { %v1720_v37 = vadd.f32 %v3013_v12, %v1718_v63  ;;  %v1663_v57 = vmul.f32 %v1599_v61, %v3331_v17  ;;  %v1300_v38 = vmul.f32 %v2463_v47, %v2705_v9  ;;  %v1777_v4 = vadd.f32 %v1776_v31, %v1775_v23  ;;  %v3557_v31 = vld [vmem:[#allocation13_spill] sm:$0xff] }
 0x1da   :  { %v1526_v29 = vunpack.c.h.bf16 %v1100_v44  ;;  %v1102_v39 = vpack.c.bf16 %v1038_v36, %v1038_v36  ;;  %2464 = vrcp.f32 %v1519_v28  ;;  %v1294_v24 = vpack.c.bf16 %v1291_v16, %v1293_v7  ;;  %v3558_v61 = vld [vmem:[#allocation17_spill] sm:$0xff]  ;;  %v3559_v16 = vld [vmem:[#allocation7_spill] sm:$0xff]  ;;  %v3560_v7 = vld [vmem:[#allocation18_spill] sm:$0xff] }
 0x1db   :  { %v1722_v56 = vadd.f32 %v3087_v62, %v1720_v37  ;;  %v1778_v30 = vsel %vm1683_vm2, %v1663_v57, 0.0  ;;  %v1527_v55 = vunpack.c.l.bf16 %v1100_v44  ;;  %2466 = vrcp.f32 %v1520_v6  ;;  %v3562_v37 = vld [vmem:[#allocation20_spill] sm:$0xff] }
 0x1dc   :  { %v1779_v34 = vadd.f32 %v1778_v30, %v1777_v4  ;;  %v1533_v12 = vunpack.c.h.bf16 %v1101_v58  ;;  %v1103_v21 = vpack.c.bf16 %v1039_v1, %v1039_v1  ;;  %v1511_v22 = vpack.c.bf16 %v3266_v14, %v3281_v59  ;;  %v3566_v30 = vld [vmem:[#allocation14_spill] sm:$0xff] }
 0x1dd   :  { %v1724_v17 = vadd.f32 %v3117_v42, %v1722_v56  ;;  %v1301_v46 = vpack.c.bf16 %v1298_v40, %v1300_v38  ;;  %v1534_v50 = vunpack.c.l.bf16 %v1101_v58  ;;  %v1642_v62 = vmul.f32 %v3302_v43, %v3132_v15  ;;  %v3561_v58 = vld [vmem:[#allocation8_spill] sm:$0xff]  ;;  %v3563_v40 = vld [vmem:[#allocation23_spill] sm:$0xff] }
 0x1de   :  { %v1781_v27 = vadd.f32 %v2911_v20, %v1779_v34  ;;  %2468 = vrcp.f32 %v1526_v29  ;;  %v1540_v51 = vunpack.c.h.bf16 %v1102_v39  ;;  %v1580_v60 = vunpack.c.l.bf16 %v1294_v24  ;;  %v3564_v38 = vld [vmem:[#allocation24_spill] sm:$0xff]  ;;  %v3567_v34 = vld [vmem:[#allocation15_spill] sm:$0xff] }
 0x1df   :  { %v1726_v3 = vadd.f32 %v3178_v33, %v1724_v17  ;;  %2470 = vrcp.f32 %v1527_v55  ;;  %v1541_v41 = vunpack.c.l.bf16 %v1102_v39  ;;  %v1643_v49 = vmul.f32 %v1579_v45, %v3173_v32 }
 0x1e0   :  { %v1783_v42 = vadd.f32 %v2951_v26, %v1781_v27  ;;  %2472 = vrcp.f32 %v1533_v12  ;;  %v1547_v59 = vunpack.c.h.bf16 %v1103_v21  ;;  %v2465_v19 = vpop.eup %2464  ;;  %v1581_v20 = vunpack.c.l.bf16 %v1301_v46  ;;  %v3553_v26 = vld [vmem:[#allocation27_spill] sm:$0xff]  ;;  %v3568_v12 = vld [vmem:[#allocation22_spill] sm:$0xff] }
 0x1e1   :  { %v1728_v14 = vadd.f32 %v3216_v35, %v1726_v3  ;;  %2474 = vrcp.f32 %v1534_v50  ;;  %v1548_v43 = vunpack.c.l.bf16 %v1103_v21  ;;  %v2467_v53 = vpop.eup %2466  ;;  %v1515_v33 = vmul.f32 %v3285_v18, %v2703_v8  ;;  %v3554_v35 = vld [vmem:[#allocation26_spill] sm:$0xff] }
 0x1e2   :  { %v1785_v15 = vadd.f32 %v2989_v52, %v1783_v42  ;;  %v1517_v13 = vmul.f32 %v3552_v48, %v2705_v9  ;;  %2476 = vrcp.f32 %v1540_v51  ;;  %v1731_v25 = vsel %vm1683_vm2, %v1642_v62, 0.0 }
 0x1e3   :  { %v1730_v32 = vadd.f32 %v3553_v26, %v1728_v14  ;;  %v1644_v0 = vmul.f32 %v1580_v60, %v3554_v35  ;;  %2478 = vrcp.f32 %v1541_v41  ;;  %v1733_v52 = vsel %vm1683_vm2, %v1643_v49, 0.0  ;;  %v3570_v26 = vld [vmem:[#allocation6_spill] sm:$0xff]  ;;  %v3571_v35 = vld [vmem:[#allocation19_spill] sm:$0xff] }
 0x1e4   :  { %v1787_v2 = vadd.f32 %v3555_v11, %v1785_v15  ;;  %v2469_v10 = vpop.eup %2468  ;;  %v1522_v28 = vmul.f32 %v2465_v19, %v2703_v8  ;;  %2480 = vrcp.f32 %v1547_v59  ;;  %v1524_v44 = vmul.f32 %v2467_v53, %v2705_v9  ;;  %v3569_v15 = vld [vmem:[#allocation16_spill] sm:$0xff] }
 0x1e5   :  { %v1732_v54 = vadd.f32 %v1731_v25, %v1730_v32  ;;  %v2471_v18 = vpop.eup %2470  ;;  %v1645_v47 = vmul.f32 %v1581_v20, %v3556_v5  ;;  %2482 = vrcp.f32 %v1548_v43  ;;  %v1792_v6 = vsel %vm1683_vm2, %v3558_v61, 0.0 }
 0x1e6   :  { %v1789_v36 = vadd.f32 %v3557_v31, %v1787_v2  ;;  %v2473_v63 = vpop.eup %2472  ;;  %v1671_v23 = vmul.f32 %v3560_v7, %v3559_v16  ;;  %v1672_v57 = vmul.f32 %v3562_v37, %v3561_v58  ;;  %v3565_v4 = vpack.c.bf16 %v3563_v40, %v3564_v38  ;;  %v2091_v7 = vld [vmem:[%s3506_s3 + $0x8] sm:$0xff]  ;;  %v3576_v37 = vld [vmem:[#allocation25_spill] sm:$0xff] }
 0x1e7   :  { %v1734_v1 = vadd.f32 %v1733_v52, %v1732_v54  ;;  %v2475_v45 = vpop.eup %2474  ;;  %v1518_v39 = vpack.c.bf16 %v1515_v33, %v1517_v13  ;;  %v1735_v56 = vsel %vm1683_vm2, %v1644_v0, 0.0  ;;  %v1673_v17 = vmul.f32 %v3568_v12, %v3567_v34  ;;  %v3572_v52 = vld [vmem:[#allocation9_spill] sm:$0xff]  ;;  %1865 = vmatpush.bf16.msrb.mxu1 %v2091_v7  ;;  %v3578_v34 = vld [vmem:[#allocation31_spill] sm:$0xff] }
 0x1e8   :  { %v1610_v29 = vunpack.c.l.bf16 %v3565_v4  ;;  %v1791_v24 = vadd.f32 %v3566_v30, %v1789_v36  ;;  %v2477_v55 = vpop.eup %2476  ;;  %v1529_v21 = vmul.f32 %v2469_v10, %v2703_v8  ;;  %v1531_v46 = vmul.f32 %v2471_v18, %v2705_v9  ;;  %v3574_v36 = vld [vmem:[#allocation21_spill] sm:$0xff] }
 0x1e9   :  { %v1736_v50 = vadd.f32 %v1735_v56, %v1734_v1  ;;  %v2479_v27 = vpop.eup %2478  ;;  %v1611_v62 = vunpack.c.l.bf16 %v1511_v22  ;;  %v1525_v51 = vpack.c.bf16 %v1522_v28, %v1524_v44  ;;  %v1737_v3 = vsel %vm1683_vm2, %v1645_v47, 0.0  ;;  %v3573_v44 = vld [vmem:[#allocation10_spill] sm:$0xff] }
 0x1ea   :  { %v1793_v60 = vadd.f32 %v1792_v6, %v1791_v24  ;;  %v2481_v41 = vpop.eup %2480  ;;  %v1794_v42 = vsel %vm1683_vm2, %v1671_v23, 0.0  ;;  %v1536_v49 = vmul.f32 %v2473_v63, %v2703_v8  ;;  %v1538_v14 = vmul.f32 %v2475_v45, %v2705_v9  ;;  %v3575_v23 = vld [vmem:[#allocation11_spill] sm:$0xff]  ;;  %v2090_v38 = vld [vmem:[%s3506_s3] sm:$0xff] }
 0x1eb   :  { %v1738_v59 = vadd.f32 %v1737_v3, %v1736_v50  ;;  %v2483_v19 = vpop.eup %2482  ;;  %v1796_v20 = vsel %vm1683_vm2, %v1672_v57, 0.0  ;;  %v1674_v43 = vmul.f32 %v1610_v29, %v3569_v15  ;;  %v1612_v53 = vunpack.c.l.bf16 %v1518_v39  ;;  %v3577_v39 = vld [vmem:[#allocation30_spill] sm:$0xff]  ;;  %1866 = vmatpush.bf16.msrb.mxu1 %v2090_v38 }
 0x1ec   :  { %v1795_v33 = vadd.f32 %v1794_v42, %v1793_v60  ;;  %v1532_v22 = vpack.c.bf16 %v1529_v21, %v1531_v46  ;;  %v1543_v48 = vmul.f32 %v2477_v55, %v2703_v8  ;;  %v1545_v13 = vmul.f32 %v2479_v27, %v2705_v9  ;;  %v3579_v27 = vld [vmem:[#allocation32_spill] sm:$0xff]  ;;  %v3580_v60 = vld [vmem:[#allocation33_spill] sm:$0xff] }
 0x1ed   :  { %v1740_v32 = vadd.f32 %v3570_v26, %v1738_v59  ;;  %v1798_v25 = vsel %vm1683_vm2, %v1673_v17, 0.0  ;;  %v1675_v0 = vmul.f32 %v1611_v62, %v3571_v35  ;;  %v1613_v11 = vunpack.c.l.bf16 %v1525_v51 }
 0x1ee   :  { %v1797_v2 = vadd.f32 %v1796_v20, %v1795_v33  ;;  %v1539_v10 = vpack.c.bf16 %v1536_v49, %v1538_v14  ;;  %v1550_v54 = vmul.f32 %v2481_v41, %v2703_v8  ;;  %v1552_v18 = vmul.f32 %v2483_v19, %v2705_v9 }
 0x1ef   :  { %v1742_v28 = vadd.f32 %v3572_v52, %v1740_v32  ;;  %v1743_v5 = vsel %vm1683_vm2, %v3573_v44, 0.0  ;;  %v1800_v47 = vsel %vm1683_vm2, %v1674_v43, 0.0  ;;  %v1676_v63 = vmul.f32 %v1612_v53, %v3574_v36  ;;  %v1682_v32 = vld [vmem:[#allocation2] sm:$0x3] }
 0x1f0   :  { %v1799_v31 = vadd.f32 %v1798_v25, %v1797_v2  ;;  %v1614_v61 = vunpack.c.l.bf16 %v1532_v22  ;;  %v1546_v6 = vpack.c.bf16 %v1543_v48, %v1545_v13  ;;  %v1745_v8 = vsel %vm1683_vm2, %v3575_v23, 0.0 }
 0x1f1   :  { %v1744_v16 = vadd.f32 %v1743_v5, %v1742_v28  ;;  %v1802_v9 = vsel %vm1683_vm2, %v1675_v0, 0.0  ;;  %v1677_v57 = vmul.f32 %v1613_v11, %v3576_v37  ;;  %v1615_v1 = vunpack.c.l.bf16 %v1539_v10  ;;  %v2099_v28 = vld [vmem:[%s3507_s4] ss:$0 sm:$0xff] }
 0x1f2   :  { %v1801_v58 = vadd.f32 %v1800_v47, %v1799_v31  ;;  %v1553_v45 = vpack.c.bf16 %v1550_v54, %v1552_v18  ;;  %v1804_v29 = vsel %vm1683_vm2, %v1676_v63, 0.0  ;;  %v1678_v56 = vmul.f32 %v1614_v61, %v3577_v39 }
 0x1f3   :  { %v1746_v40 = vadd.f32 %v1745_v8, %v1744_v16  ;;  %v1616_v30 = vunpack.c.l.bf16 %v1546_v6  ;;  %v1806_v55 = vsel %vm1683_vm2, %v1677_v57, 0.0  ;;  %v1679_v12 = vmul.f32 %v1615_v1, %v3578_v34 }
 0x1f4   :  { %v1803_v4 = vadd.f32 %v1802_v9, %v1801_v58  ;;  %v1617_v17 = vunpack.c.l.bf16 %v1553_v45  ;;  %v1808_v50 = vsel %vm1683_vm2, %v1678_v56, 0.0 }
 0x1f5   :  { %v1747_v21 = vrot.slane %v1746_v40, 4  ;;  %v1680_v62 = vmul.f32 %v1616_v30, %v3579_v27  ;;  %v1810_v3 = vsel %vm1683_vm2, %v1679_v12, 0.0 }
 0x1f6   :  { %v1805_v24 = vadd.f32 %v1804_v29, %v1803_v4  ;;  %v1681_v41 = vmul.f32 %v1617_v17, %v3580_v60 }
 0x1f7   :  { %v1748_v42 = vadd.f32 %v1747_v21, %v1746_v40  ;;  %v1812_v14 = vsel %vm1683_vm2, %v1680_v62, 0.0 }
 0x1f8   :  { %v1807_v46 = vadd.f32 %v1806_v55, %v1805_v24  ;;  %v1814_v19 = vsel %vm1683_vm2, %v1681_v41, 0.0 }
 0x1f9   :  { %v1749_v20 = vrot.slane %v1748_v42, 2 }
 0x1fa   :  { %v1809_v51 = vadd.f32 %v1808_v50, %v1807_v46 }
 0x1fb   :  { %v1750_v53 = vadd.f32 %v1749_v20, %v1748_v42 }
 0x1fc   :  { %v1811_v49 = vadd.f32 %v1810_v3, %v1809_v51 }
 0x1fd   :  { %v1751_v48 = vrot.slane %v1750_v53, 1 }
 0x1fe   :  { %v1813_v59 = vadd.f32 %v1812_v14, %v1811_v49 }
 0x1ff   :  { %v1752_v25 = vadd.f32 %v1751_v48, %v1750_v53 }
 0x200   :  { %v1815_v15 = vadd.f32 %v1814_v19, %v1813_v59 }
 0x202   :  { %v1816_v43 = vrot.slane %v1815_v15, 4 }
 0x204   :  { %v1817_v33 = vadd.f32 %v1816_v43, %v1815_v15 }
 0x206   :  { %v1818_v22 = vrot.slane %v1817_v33, 2 }
 0x208   :  { %v1819_v13 = vadd.f32 %v1818_v22, %v1817_v33 }
 0x20a   :  { %v1820_v26 = vrot.slane %v1819_v13, 1 }
 0x20c   :  { %v1821_v35 = vadd.f32 %v1820_v26, %v1819_v13 }
 0x20e   :  { %v1825_v0 = vsel %vm1824_vm4, %v1821_v35, %v1752_v25 }
 0x20f   :  { %v1827_v11 = vadd.f32 %v1825_v0, %v1682_v32 }
 0x211   :  { %1829 = vst.msk [vmem:[#allocation2] sm:$0x3] %vm27_vm3, %v1827_v11 }
 0x218   :  { %v1833_v2 = vld [vmem:[#allocation2] sm:$0x3] }
 0x219   :  { %v1834_v10 = vmul.f32 0.00390625, %v1833_v2 }
 0x21b   :  { %v1835_v52 = vpack.c.bf16 %v1834_v10, %v1834_v10 }
 0x21d   :  { %2057 = vmatmul.msk.bf16.vlgmr.msrb.gmra.mxu1 %vm1683_vm2, %v1835_v52 }
 0x29a   :  { %v1868_v54 = vpop.f32.mrf.mxu1 }
 0x29b   :  { %v1869_v18 = vadd.f32 %v2099_v28, %v1868_v54 }
 0x29d   :  { %1872 = vst [vmem:[#allocation3] sm:$0x3] %v1869_v18 }
 0x29e   :  { %1883 = dma.vmem_to_hbm [thread:$0]  %s1879_s16, 32, %s1881_s19, [#allocation4]  }
 0x2a2   :  { %v1870_v44 = vpop.f32.mrf.mxu1 }
 0x2a3   :  { %2510 = dma.done.wait [#allocation4], 32  }
 0x2a4   :  { %2511 = vsyncadd [#allocation4], 4294967264 }
 0x2a5   :  { %1888 = vsyncpa [#allocation4], 1 }

// kernel: tpu_custom_call.1
= control target key start
LH: loop header
LB: loop body
LE: loop exit
PB: predicated region body
PF: predicated region fallthrough
CT: control target
= control target key end

     0   :  { %vm355_vm0 = vcmask 1041408   ;;  %vm258_vm1 = vcmask 31744   ;;  %s3503_s0 = inlined_call_operand.vmem [shape: bf16[2,256,4], index: 0, kind: input, shape index: {}]   ;;  %s3504_s1 = inlined_call_operand.vmem [shape: bf16[4,32], index: 1, kind: input, shape index: {}]   ;;  %s3505_s2 = inlined_call_operand.vmem [shape: f32[1,32], index: 2, kind: input, shape index: {}]   ;;  %s3506_s3 = inlined_call_operand.vmem [shape: bf16[32,128], index: 3, kind: input, shape index: {}]   ;;  %s3507_s4 = inlined_call_operand.vmem [shape: f32[1,128], index: 4, kind: input, shape index: {}]   ;;  %s3508_s5 = inlined_call_operand.hbm [shape: f32[2,128], index: 5, kind: output, shape index: {}]  }
   0x1   :  { %v29_v0 = vld [vmem:[%s3504_s1] sm:$0x3]  ;;  %v2072_v3 = vld [vmem:[%s3503_s0 + $0x70] sm:$0xff]  ;;  %v2081_v4 = vld [vmem:[%s3503_s0 + $0xb8] sm:$0xff] }
   0x2   :  { %v357_v1 = vsel %vm355_vm0, %v29_v0, 0  ;;  %v2058_v2 = vld [vmem:[%s3503_s0] sm:$0xff] }
   0x3   :  { %366 = vmatpush.bf16.msra.mxu0 %v357_v1  ;;  %2093 = vmatpush.bf16.msra.mxu2 %v357_v1 }
   0x4   :  { %2094 = vmatpush.bf16.msra.mxu3 %v357_v1  ;;  %2092 = vmatpush.bf16.msra.mxu1 %v357_v1 }
   0x5   :  { %10 = vsyncpa [#allocation4], 0  ;;  %v2059_v5 = vld [vmem:[%s3503_s0 + $0x8] sm:$0xff]  ;;  %v2073_v6 = vld [vmem:[%s3503_s0 + $0x78] sm:$0xff]  ;;  %vm1683_vm2 = vcmask 261120   ;;  %vm27_vm3 = vcmask 254976  }
   0x6   :  { %2017 = vmatmul.msk.bf16.vlgmr.msra.gmra.mxu0 %vm258_vm1, %v2058_v2  ;;  %2031 = vmatmul.msk.bf16.vlgmr.msra.gmra.mxu2 %vm258_vm1, %v2072_v3  ;;  %v2082_v7 = vld [vmem:[%s3503_s0 + $0xc0] sm:$0xff]  ;;  %v2067_v8 = vld [vmem:[%s3503_s0 + $0x48] sm:$0xff]  ;;  %v2060_v9 = vld [vmem:[%s3503_s0 + $0x10] sm:$0xff]  ;;  %vm1824_vm4 = vcmask 1041409   ;;  %s2514_s15 = smov [#allocation3]   ;;  %s1880_s19 = sshll.u32 %s3508_s5, 4  ;;  %s1881_s19 = int_to_ptr.hbm [resolvable:$true] %s1880_s19 }
   0x7   :  { %2040 = vmatmul.msk.bf16.vlgmr.msra.gmra.mxu3 %vm258_vm1, %v2081_v4  ;;  %2026 = vmatmul.msk.bf16.vlgmr.msra.gmra.mxu1 %vm258_vm1, %v2067_v8  ;;  %v2074_v10 = vld [vmem:[%s3503_s0 + $0x80] sm:$0xff]  ;;  %v2083_v11 = vld [vmem:[%s3503_s0 + $0xc8] sm:$0xff]  ;;  %v2068_v12 = vld [vmem:[%s3503_s0 + $0x50] sm:$0xff]  ;;  %s1878_s16 = sshll.u32 %s2514_s15, 4  ;;  %s1879_s16 = int_to_ptr.vmem [resolvable:$true] %s1878_s16 }
   0x8   :  { %v2061_v13 = vld [vmem:[%s3503_s0 + $0x18] sm:$0xff]  ;;  %v2075_v14 = vld [vmem:[%s3503_s0 + $0x88] sm:$0xff]  ;;  %v2084_v15 = vld [vmem:[%s3503_s0 + $0xd0] sm:$0xff] }
   0x9   :  { %v2069_v16 = vld [vmem:[%s3503_s0 + $0x58] sm:$0xff]  ;;  %v2062_v17 = vld [vmem:[%s3503_s0 + $0x20] sm:$0xff]  ;;  %v2076_v18 = vld [vmem:[%s3503_s0 + $0x90] sm:$0xff] }
   0xa   :  { %v2085_v19 = vld [vmem:[%s3503_s0 + $0xd8] sm:$0xff]  ;;  %v2070_v20 = vld [vmem:[%s3503_s0 + $0x60] sm:$0xff]  ;;  %v2063_v21 = vld [vmem:[%s3503_s0 + $0x28] sm:$0xff] }
   0xb   :  { %v2077_v22 = vld [vmem:[%s3503_s0 + $0x98] sm:$0xff]  ;;  %v2086_v23 = vld [vmem:[%s3503_s0 + $0xe0] sm:$0xff]  ;;  %v2071_v24 = vld [vmem:[%s3503_s0 + $0x68] sm:$0xff] }
   0xc   :  { %v2064_v25 = vld [vmem:[%s3503_s0 + $0x30] sm:$0xff]  ;;  %v2078_v26 = vld [vmem:[%s3503_s0 + $0xa0] sm:$0xff]  ;;  %v2087_v27 = vld [vmem:[%s3503_s0 + $0xe8] sm:$0xff] }
   0xd   :  { %v2065_v28 = vld [vmem:[%s3503_s0 + $0x38] sm:$0xff]  ;;  %v2079_v29 = vld [vmem:[%s3503_s0 + $0xa8] sm:$0xff]  ;;  %v2088_v30 = vld [vmem:[%s3503_s0 + $0xf0] sm:$0xff] }
   0xe   :  { %v2667_v31 = vld [vmem:[%s3505_s2] ss:$0 sm:$0xff]  ;;  %v2080_v33 = vld [vmem:[%s3503_s0 + $0xb0] sm:$0xff]  ;;  %v2089_v35 = vld [vmem:[%s3503_s0 + $0xf8] sm:$0xff] }
   0xf   :  { %v2066_v32 = vld [vmem:[%s3503_s0 + $0x40] sm:$0xff] }
  0x16   :  { %2018 = vmatmul.msk.bf16.gmra.mxu0 %vm258_vm1, %v2059_v5  ;;  %2032 = vmatmul.msk.bf16.gmra.mxu2 %vm258_vm1, %v2073_v6 }
  0x17   :  { %2041 = vmatmul.msk.bf16.gmra.mxu3 %vm258_vm1, %v2082_v7  ;;  %2027 = vmatmul.msk.bf16.gmra.mxu1 %vm258_vm1, %v2068_v12  ;;  %v2512_v7 = vmov 1065369472  }
  0x18   :  { %v2703_v8 = vunpack.c.h.bf16 %v2512_v7 }
  0x26   :  { %2019 = vmatmul.msk.bf16.gmra.mxu0 %vm258_vm1, %v2060_v9  ;;  %2033 = vmatmul.msk.bf16.gmra.mxu2 %vm258_vm1, %v2074_v10  ;;  %v2705_v9 = vunpack.c.l.bf16 %v2512_v7 }
  0x27   :  { %2042 = vmatmul.msk.bf16.gmra.mxu3 %vm258_vm1, %v2083_v11  ;;  %2028 = vmatmul.msk.bf16.gmra.mxu1 %vm258_vm1, %v2069_v16 }
  0x36   :  { %2020 = vmatmul.msk.bf16.gmra.mxu0 %vm258_vm1, %v2061_v13  ;;  %2034 = vmatmul.msk.bf16.gmra.mxu2 %vm258_vm1, %v2075_v14 }
  0x37   :  { %2043 = vmatmul.msk.bf16.gmra.mxu3 %vm258_vm1, %v2084_v15  ;;  %2029 = vmatmul.msk.bf16.gmra.mxu1 %vm258_vm1, %v2070_v20 }
  0x46   :  { %2021 = vmatmul.msk.bf16.gmra.mxu0 %vm258_vm1, %v2062_v17  ;;  %2035 = vmatmul.msk.bf16.gmra.mxu2 %vm258_vm1, %v2076_v18 }
  0x47   :  { %2044 = vmatmul.msk.bf16.gmra.mxu3 %vm258_vm1, %v2085_v19  ;;  %2030 = vmatmul.msk.bf16.gmra.mxu1 %vm258_vm1, %v2071_v24 }
  0x56   :  { %2022 = vmatmul.msk.bf16.gmra.mxu0 %vm258_vm1, %v2063_v21  ;;  %2036 = vmatmul.msk.bf16.gmra.mxu2 %vm258_vm1, %v2077_v22 }
  0x57   :  { %2045 = vmatmul.msk.bf16.gmra.mxu3 %vm258_vm1, %v2086_v23 }
  0x66   :  { %2023 = vmatmul.msk.bf16.gmra.mxu0 %vm258_vm1, %v2064_v25  ;;  %2037 = vmatmul.msk.bf16.gmra.mxu2 %vm258_vm1, %v2078_v26 }
  0x67   :  { %2046 = vmatmul.msk.bf16.gmra.mxu3 %vm258_vm1, %v2087_v27 }
  0x76   :  { %2024 = vmatmul.msk.bf16.gmra.mxu0 %vm258_vm1, %v2065_v28  ;;  %2038 = vmatmul.msk.bf16.gmra.mxu2 %vm258_vm1, %v2079_v29 }
  0x77   :  { %2047 = vmatmul.msk.bf16.gmra.mxu3 %vm258_vm1, %v2088_v30 }
  0x83   :  { %v368_v34 = vpop.f32.mrf.mxu0 }
  0x84   :  { %v2679_v36 = vadd.f32 %v2667_v31, %v368_v34 }
  0x86   :  { %v528_v37 = vpack.c.bf16 %v2679_v36, %v2679_v36  ;;  %2025 = vmatmul.msk.bf16.gmra.mxu0 %vm258_vm1, %v2066_v32  ;;  %2039 = vmatmul.msk.bf16.gmra.mxu2 %vm258_vm1, %v2080_v33 }
  0x87   :  { %2048 = vmatmul.msk.bf16.gmra.mxu3 %vm258_vm1, %v2089_v35 }
  0x88   :  { %v592_v38 = vxor.u32 2147516416, %v528_v37 }
  0x89   :  { %v438_v46 = vpop.f32.mrf.mxu2 }
  0x8a   :  { %v656_v39 = vunpack.c.l.bf16 %v592_v38  ;;  %v483_v27 = vpop.f32.mrf.mxu3  ;;  %v2716_v35 = vadd.f32 %v2667_v31, %v438_v46 }
  0x8b   :  { %v370_v40 = vpop.f32.mrf.mxu0  ;;  %v2719_v37 = vadd.f32 %v2667_v31, %v483_v27 }
  0x8c   :  { %v720_v41 = vmul.f32 1.442695, %v656_v39  ;;  %v2687_v42 = vadd.f32 %v2667_v31, %v370_v40 }
  0x8e   :  { %2100 = vpow2.f32 %v720_v41  ;;  %v529_v43 = vpack.c.bf16 %v2687_v42, %v2687_v42  ;;  %v556_v41 = vpack.c.bf16 %v2716_v35, %v2716_v35 }
  0x90   :  { %v593_v44 = vxor.u32 2147516416, %v529_v43  ;;  %v574_v43 = vpack.c.bf16 %v2719_v37, %v2719_v37 }
  0x91   :  { %v2696_v63 = vpop.f32.mrf.mxu2 }
  0x92   :  { %v657_v45 = vunpack.c.l.bf16 %v593_v44 }
  0x93   :  { %v373_v47 = vpop.f32.mrf.mxu0 }
  0x94   :  { %v2101_v48 = vpop.eup %2100  ;;  %v722_v49 = vmul.f32 1.442695, %v657_v45  ;;  %v2692_v50 = vadd.f32 %v2667_v31, %v373_v47 }
  0x95   :  { %v848_v51 = vpack.c.bf16 %v2101_v48, %v2101_v48 }
  0x96   :  { %2102 = vpow2.f32 %v722_v49  ;;  %v530_v52 = vpack.c.bf16 %v2692_v50, %v2692_v50 }
  0x97   :  { %v912_v53 = vunpack.c.l.bf16 %v848_v51 }
  0x98   :  { %v594_v54 = vxor.u32 2147516416, %v530_v52  ;;  %v620_v52 = vxor.u32 2147516416, %v556_v41 }
  0x99   :  { %v976_v55 = vadd.f32 1.0, %v912_v53  ;;  %v2707_v15 = vpop.f32.mrf.mxu2  ;;  %v638_v53 = vxor.u32 2147516416, %v574_v43 }
  0x9a   :  { %v658_v56 = vunpack.c.l.bf16 %v594_v54 }
  0x9b   :  { %v1040_v57 = vpack.c.bf16 %v976_v55, %v976_v55  ;;  %v375_v59 = vpop.f32.mrf.mxu0 }
  0x9c   :  { %v2103_v58 = vpop.eup %2102  ;;  %v724_v0 = vmul.f32 1.442695, %v658_v56  ;;  %v2699_v2 = vadd.f32 %v2667_v31, %v375_v59 }
  0x9d   :  { %v1106_v60 = vunpack.c.h.bf16 %v1040_v57  ;;  %v1107_v61 = vunpack.c.l.bf16 %v1040_v57  ;;  %v849_v62 = vpack.c.bf16 %v2103_v58, %v2103_v58 }
  0x9e   :  { %v531_v4 = vpack.c.bf16 %v2699_v2, %v2699_v2 }
  0x9f   :  { %2104 = vrcp.f32 %v1106_v60  ;;  %v913_v1 = vunpack.c.l.bf16 %v849_v62  ;;  %v684_v62 = vunpack.c.l.bf16 %v620_v52 }
  0xa0   :  { %2106 = vrcp.f32 %v1107_v61  ;;  %v595_v13 = vxor.u32 2147516416, %v531_v4  ;;  %v2741_v4 = vadd.f32 %v2667_v31, %v2696_v63 }
  0xa1   :  { %v977_v3 = vadd.f32 1.0, %v913_v1  ;;  %2108 = vpow2.f32 %v724_v0  ;;  %v2713_v32 = vpop.f32.mrf.mxu2  ;;  %v702_v0 = vunpack.c.l.bf16 %v638_v53  ;;  %v2768_v53 = vadd.f32 %v2667_v31, %v2707_v15 }
  0xa2   :  { %v659_v20 = vunpack.c.l.bf16 %v595_v13 }
  0xa3   :  { %v1041_v5 = vpack.c.bf16 %v977_v3, %v977_v3  ;;  %v378_v49 = vpop.f32.mrf.mxu0  ;;  %v558_v15 = vpack.c.bf16 %v2768_v53, %v2768_v53 }
  0xa4   :  { %v726_v23 = vmul.f32 1.442695, %v659_v20  ;;  %v2731_v58 = vadd.f32 %v2667_v31, %v378_v49 }
  0xa5   :  { %v2105_v6 = vpop.eup %2104  ;;  %v1113_v10 = vunpack.c.h.bf16 %v1041_v5  ;;  %v1114_v12 = vunpack.c.l.bf16 %v1041_v5 }
  0xa6   :  { %v2107_v11 = vpop.eup %2106  ;;  %v1109_v17 = vmul.f32 %v2105_v6, %v2703_v8  ;;  %v532_v60 = vpack.c.bf16 %v2731_v58, %v2731_v58  ;;  %v485_v6 = vpop.f32.mrf.mxu3 }
  0xa7   :  { %v2109_v14 = vpop.eup %2108  ;;  %v1111_v18 = vmul.f32 %v2107_v11, %v2705_v9  ;;  %2110 = vrcp.f32 %v1113_v10 }
  0xa8   :  { %v850_v16 = vpack.c.bf16 %v2109_v14, %v2109_v14  ;;  %2112 = vrcp.f32 %v1114_v12  ;;  %v596_v5 = vxor.u32 2147516416, %v532_v60  ;;  %v776_v14 = vmul.f32 1.442695, %v684_v62 }
  0xa9   :  { %v1112_v22 = vpack.c.bf16 %v1109_v17, %v1111_v18  ;;  %2114 = vpow2.f32 %v726_v23  ;;  %v448_v56 = vpop.f32.mrf.mxu2  ;;  %v557_v18 = vpack.c.bf16 %v2741_v4, %v2741_v4 }
  0xaa   :  { %v914_v19 = vunpack.c.l.bf16 %v850_v16  ;;  %v2737_v61 = vadd.f32 %v2667_v31, %v448_v56  ;;  %v660_v12 = vunpack.c.l.bf16 %v596_v5  ;;  %v812_v16 = vmul.f32 1.442695, %v702_v0 }
  0xab   :  { %v1554_v29 = vunpack.c.l.bf16 %v1112_v22  ;;  %v380_v20 = vpop.f32.mrf.mxu0 }
  0xac   :  { %v978_v21 = vadd.f32 1.0, %v914_v19  ;;  %v560_v13 = vpack.c.bf16 %v2737_v61, %v2737_v61  ;;  %v728_v63 = vmul.f32 1.442695, %v660_v12 }
  0xad   :  { %v2111_v24 = vpop.eup %2110  ;;  %v1618_v39 = vmul.f32 %v1554_v29, %v2679_v36 }
  0xae   :  { %v1042_v25 = vpack.c.bf16 %v978_v21, %v978_v21  ;;  %v2113_v26 = vpop.eup %2112  ;;  %v1116_v28 = vmul.f32 %v2111_v24, %v2703_v8  ;;  %v624_v19 = vxor.u32 2147516416, %v560_v13  ;;  %v2750_v24 = vadd.f32 %v2667_v31, %v485_v6 }
  0xaf   :  { %v1118_v30 = vmul.f32 %v2113_v26, %v2705_v9  ;;  %v2115_v45 = vpop.eup %2114  ;;  %v1684_v46 = vsel %vm1683_vm2, %v1618_v39, 0.0  ;;  %v621_v26 = vxor.u32 2147516416, %v557_v18  ;;  %v488_v39 = vpop.f32.mrf.mxu3 }
  0xb0   :  { %v1120_v33 = vunpack.c.h.bf16 %v1042_v25  ;;  %v1121_v34 = vunpack.c.l.bf16 %v1042_v25  ;;  %v851_v48 = vpack.c.bf16 %v2115_v45, %v2115_v45  ;;  %v688_v25 = vunpack.c.l.bf16 %v624_v19 }
  0xb1   :  { %v1119_v38 = vpack.c.bf16 %v1116_v28, %v1118_v30  ;;  %v450_v22 = vpop.f32.mrf.mxu2  ;;  %v2778_v12 = vadd.f32 %v2667_v31, %v488_v39 }
  0xb2   :  { %2116 = vrcp.f32 %v1120_v33  ;;  %v915_v55 = vunpack.c.l.bf16 %v851_v48  ;;  %v2756_v27 = vadd.f32 %v2667_v31, %v450_v22  ;;  %v784_v29 = vmul.f32 1.442695, %v688_v25 }
  0xb3   :  { %v1555_v40 = vunpack.c.l.bf16 %v1119_v38  ;;  %2118 = vrcp.f32 %v1121_v34  ;;  %v575_v38 = vpack.c.bf16 %v2750_v24, %v2750_v24  ;;  %v383_v56 = vpop.f32.mrf.mxu0  ;;  %v622_v22 = vxor.u32 2147516416, %v558_v15 }
  0xb4   :  { %v979_v59 = vadd.f32 1.0, %v915_v55  ;;  %v561_v41 = vpack.c.bf16 %v2756_v27, %v2756_v27  ;;  %v2772_v5 = vadd.f32 %v2667_v31, %v383_v56 }
  0xb5   :  { %v1619_v44 = vmul.f32 %v1555_v40, %v2687_v42  ;;  %v639_v52 = vxor.u32 2147516416, %v575_v38 }
  0xb6   :  { %v1043_v3 = vpack.c.bf16 %v979_v59, %v979_v59 }
  0xb7   :  { %v1685_v47 = vsel %vm1683_vm2, %v1619_v44, 0.0  ;;  %v685_v44 = vunpack.c.l.bf16 %v621_v26 }
  0xb8   :  { %v2117_v51 = vpop.eup %2116  ;;  %v1686_v36 = vadd.f32 %v1685_v47, %v1684_v46  ;;  %v1127_v10 = vunpack.c.h.bf16 %v1043_v3  ;;  %v1128_v11 = vunpack.c.l.bf16 %v1043_v3 }
  0xb9   :  { %v1123_v54 = vmul.f32 %v2117_v51, %v2703_v8  ;;  %v2119_v57 = vpop.eup %2118 }
  0xba   :  { %v1125_v42 = vmul.f32 %v2119_v57, %v2705_v9  ;;  %2120 = vrcp.f32 %v1127_v10  ;;  %v778_v57 = vmul.f32 1.442695, %v685_v44 }
  0xbb   :  { %2122 = vrcp.f32 %v1128_v11 }
  0xbc   :  { %v1126_v1 = vpack.c.bf16 %v1123_v54, %v1125_v42  ;;  %2124 = vpow2.f32 %v728_v63 }
  0xbd   :  { %2126 = vpow2.f32 %v776_v14 }
  0xbe   :  { %v1556_v7 = vunpack.c.l.bf16 %v1126_v1  ;;  %2128 = vpow2.f32 %v812_v16 }
  0xbf   :  { %2130 = vpow2.f32 %v784_v29 }
  0xc0   :  { %v1620_v17 = vmul.f32 %v1556_v7, %v2692_v50  ;;  %v2753_v50 = vadd.f32 %v2667_v31, %v380_v20  ;;  %v2121_v28 = vpop.eup %2120  ;;  %v703_v7 = vunpack.c.l.bf16 %v639_v52  ;;  %v534_v20 = vpack.c.bf16 %v2772_v5, %v2772_v5 }
  0xc1   :  { %v2123_v30 = vpop.eup %2122  ;;  %v1130_v33 = vmul.f32 %v2121_v28, %v2703_v8 }
  0xc2   :  { %v1687_v21 = vsel %vm1683_vm2, %v1620_v17, 0.0  ;;  %v533_v34 = vpack.c.bf16 %v2753_v50, %v2753_v50  ;;  %v1132_v40 = vmul.f32 %v2123_v30, %v2705_v9  ;;  %v2125_v43 = vpop.eup %2124  ;;  %v2782_v17 = vpop.f32.mrf.mxu3  ;;  %v598_v28 = vxor.u32 2147516416, %v534_v20 }
  0xc3   :  { %v1688_v23 = vadd.f32 %v1687_v21, %v1686_v36  ;;  %v2127_v46 = vpop.eup %2126  ;;  %v852_v48 = vpack.c.bf16 %v2125_v43, %v2125_v43  ;;  %v625_v36 = vxor.u32 2147516416, %v561_v41  ;;  %v814_v21 = vmul.f32 1.442695, %v703_v7 }
  0xc4   :  { %v597_v45 = vxor.u32 2147516416, %v533_v34  ;;  %v1133_v47 = vpack.c.bf16 %v1130_v33, %v1132_v40  ;;  %v2129_v49 = vpop.eup %2128  ;;  %v876_v60 = vpack.c.bf16 %v2127_v46, %v2127_v46  ;;  %v453_v34 = vpop.f32.mrf.mxu2  ;;  %v662_v40 = vunpack.c.l.bf16 %v598_v28 }
  0xc5   :  { %v916_v55 = vunpack.c.l.bf16 %v852_v48  ;;  %v689_v59 = vunpack.c.l.bf16 %v625_v36  ;;  %v894_v62 = vpack.c.bf16 %v2129_v49, %v2129_v49  ;;  %v2131_v6 = vpop.eup %2130  ;;  %v686_v41 = vunpack.c.l.bf16 %v622_v22 }
  0xc6   :  { %v661_v51 = vunpack.c.l.bf16 %v597_v45  ;;  %v1557_v54 = vunpack.c.l.bf16 %v1133_v47  ;;  %v940_v14 = vunpack.c.l.bf16 %v876_v60  ;;  %v2791_v48 = vadd.f32 %v2667_v31, %v453_v34 }
  0xc7   :  { %v980_v1 = vadd.f32 1.0, %v916_v55  ;;  %v786_v3 = vmul.f32 1.442695, %v689_v59  ;;  %v958_v16 = vunpack.c.l.bf16 %v894_v62 }
  0xc8   :  { %v730_v42 = vmul.f32 1.442695, %v661_v51  ;;  %v1621_v0 = vmul.f32 %v1557_v54, %v2699_v2  ;;  %v880_v2 = vpack.c.bf16 %v2131_v6, %v2131_v6  ;;  %v1004_v29 = vadd.f32 1.0, %v940_v14 }
  0xc9   :  { %v1044_v11 = vpack.c.bf16 %v980_v1, %v980_v1  ;;  %v1022_v30 = vadd.f32 1.0, %v958_v16  ;;  %v562_v6 = vpack.c.bf16 %v2791_v48, %v2791_v48 }
  0xca   :  { %2132 = vpow2.f32 %v730_v42  ;;  %v1689_v10 = vsel %vm1683_vm2, %v1621_v0, 0.0  ;;  %v944_v19 = vunpack.c.l.bf16 %v880_v2  ;;  %v2793_v51 = vpack.c.bf16 %v1004_v29, %v1004_v29  ;;  %v493_v60 = vpop.f32.mrf.mxu3 }
  0xcb   :  { %2134 = vpow2.f32 %v778_v57  ;;  %v2780_v13 = vadd.f32 %v1689_v10, %v1688_v23  ;;  %v1134_v18 = vunpack.c.h.bf16 %v1044_v11  ;;  %v1135_v63 = vunpack.c.l.bf16 %v1044_v11 }
  0xcc   :  { %2136 = vpow2.f32 %v786_v3  ;;  %v576_v23 = vpack.c.bf16 %v2778_v12, %v2778_v12  ;;  %v1008_v26 = vadd.f32 1.0, %v944_v19  ;;  %v2795_v36 = vpack.c.bf16 %v1022_v30, %v1022_v30 }
  0xcd   :  { %2138 = vrcp.f32 %v1134_v18  ;;  %v732_v57 = vmul.f32 1.442695, %v662_v40  ;;  %v780_v0 = vmul.f32 1.442695, %v686_v41  ;;  %v1302_v15 = vunpack.c.h.bf16 %v2793_v51 }
  0xce   :  { %2140 = vrcp.f32 %v1135_v63  ;;  %v1072_v39 = vpack.c.bf16 %v1008_v26, %v1008_v26  ;;  %v2788_v45 = vxor.u32 2147516416, %v576_v23  ;;  %v2805_v10 = vadd.f32 %v2667_v31, %v2713_v32 }
  0xcf   :  { %2142 = vpow2.f32 %v814_v21  ;;  %v1303_v14 = vunpack.c.l.bf16 %v2793_v51  ;;  %v626_v20 = vxor.u32 2147516416, %v562_v6  ;;  %v1428_v22 = vunpack.c.h.bf16 %v2795_v36 }
  0xd0   :  { %v2133_v25 = vpop.eup %2132  ;;  %v1330_v46 = vunpack.c.h.bf16 %v1072_v39  ;;  %v1331_v47 = vunpack.c.l.bf16 %v1072_v39  ;;  %v704_v1 = vunpack.c.l.bf16 %v2788_v45  ;;  %v559_v28 = vpack.c.bf16 %v2805_v10, %v2805_v10 }
  0xd1   :  { %v853_v33 = vpack.c.bf16 %v2133_v25, %v2133_v25  ;;  %v2135_v38 = vpop.eup %2134  ;;  %v1429_v25 = vunpack.c.l.bf16 %v2795_v36  ;;  %v690_v30 = vunpack.c.l.bf16 %v626_v20 }
  0xd2   :  { %v2137_v44 = vpop.eup %2136  ;;  %2144 = vrcp.f32 %v1330_v46  ;;  %v877_v42 = vpack.c.bf16 %v2135_v38, %v2135_v38 }
  0xd3   :  { %v917_v43 = vunpack.c.l.bf16 %v853_v33  ;;  %v2139_v49 = vpop.eup %2138  ;;  %v881_v56 = vpack.c.bf16 %v2137_v44, %v2137_v44  ;;  %2146 = vrcp.f32 %v1331_v47  ;;  %v2815_v33 = vadd.f32 %v2667_v31, %v2782_v17  ;;  %v495_v17 = vpop.f32.mrf.mxu3 }
  0xd4   :  { %v2141_v54 = vpop.eup %2140  ;;  %v1137_v55 = vmul.f32 %v2139_v49, %v2703_v8  ;;  %2148 = vpow2.f32 %v732_v57  ;;  %v941_v63 = vunpack.c.l.bf16 %v877_v42  ;;  %v788_v41 = vmul.f32 1.442695, %v690_v30 }
  0xd5   :  { %v981_v52 = vadd.f32 1.0, %v917_v43  ;;  %v1139_v59 = vmul.f32 %v2141_v54, %v2705_v9  ;;  %v945_v3 = vunpack.c.l.bf16 %v881_v56  ;;  %v2143_v7 = vpop.eup %2142  ;;  %v623_v49 = vxor.u32 2147516416, %v559_v28 }
  0xd6   :  { %v895_v26 = vpack.c.bf16 %v2143_v7, %v2143_v7  ;;  %v1005_v39 = vadd.f32 1.0, %v941_v63  ;;  %v2824_v54 = vadd.f32 %v2667_v31, %v493_v60  ;;  %v816_v60 = vmul.f32 1.442695, %v704_v1 }
  0xd7   :  { %v1045_v62 = vpack.c.bf16 %v981_v52, %v981_v52  ;;  %v1140_v11 = vpack.c.bf16 %v1137_v55, %v1139_v59  ;;  %v1009_v18 = vadd.f32 1.0, %v945_v3  ;;  %v577_v52 = vpack.c.bf16 %v2815_v33, %v2815_v33 }
  0xd8   :  { %v2145_v21 = vpop.eup %2144  ;;  %v959_v47 = vunpack.c.l.bf16 %v895_v26  ;;  %v2830_v42 = vpack.c.bf16 %v1005_v39, %v1005_v39 }
  0xd9   :  { %v1141_v2 = vunpack.c.h.bf16 %v1045_v62  ;;  %v1142_v16 = vunpack.c.l.bf16 %v1045_v62  ;;  %v1558_v19 = vunpack.c.l.bf16 %v1140_v11  ;;  %v1073_v23 = vpack.c.bf16 %v1009_v18, %v1009_v18  ;;  %v2147_v32 = vpop.eup %2146 }
  0xda   :  { %v2149_v43 = vpop.eup %2148  ;;  %v1333_v45 = vmul.f32 %v2145_v21, %v2703_v8  ;;  %v2833_v62 = vadd.f32 %v2667_v31, %v495_v17  ;;  %v687_v11 = vunpack.c.l.bf16 %v623_v49  ;;  %v1309_v1 = vunpack.c.h.bf16 %v2830_v42 }
  0xdb   :  { %2150 = vrcp.f32 %v1141_v2  ;;  %v1622_v29 = vmul.f32 %v1558_v19, %v2731_v58  ;;  %v1337_v34 = vunpack.c.h.bf16 %v1073_v23  ;;  %v1338_v38 = vunpack.c.l.bf16 %v1073_v23 }
  0xdc   :  { %2152 = vrcp.f32 %v1142_v16  ;;  %v1335_v58 = vmul.f32 %v2147_v32, %v2705_v9  ;;  %v854_v51 = vpack.c.bf16 %v2149_v43, %v2149_v43  ;;  %v641_v2 = vxor.u32 2147516416, %v577_v52  ;;  %v413_v16 = vpop.f32.mrf.mxu1 }
  0xdd   :  { %2154 = vpow2.f32 %v780_v0  ;;  %v1691_v40 = vsel %vm1683_vm2, %v1622_v29, 0.0  ;;  %v2839_v21 = vadd.f32 %v2667_v31, %v413_v16  ;;  %v579_v32 = vpack.c.bf16 %v2833_v62, %v2833_v62 }
  0xde   :  { %2156 = vrcp.f32 %v1302_v15  ;;  %v1692_v44 = vadd.f32 %v1691_v40, %v2780_v13  ;;  %v918_v56 = vunpack.c.l.bf16 %v854_v51  ;;  %v1336_v59 = vpack.c.bf16 %v1333_v45, %v1335_v58 }
  0xdf   :  { %2158 = vrcp.f32 %v1337_v34  ;;  %v1023_v15 = vadd.f32 1.0, %v959_v47  ;;  %v782_v39 = vmul.f32 1.442695, %v687_v11  ;;  %v705_v40 = vunpack.c.l.bf16 %v641_v2 }
  0xe0   :  { %2160 = vrcp.f32 %v1338_v38  ;;  %v982_v6 = vadd.f32 1.0, %v918_v56  ;;  %v643_v52 = vxor.u32 2147516416, %v579_v32 }
  0xe1   :  { %v2151_v46 = vpop.eup %2150  ;;  %2162 = vpow2.f32 %v788_v41 }
  0xe2   :  { %v2153_v36 = vpop.eup %2152  ;;  %v1144_v13 = vmul.f32 %v2151_v46, %v2703_v8  ;;  %2164 = vrcp.f32 %v1303_v14  ;;  %v578_v14 = vpack.c.bf16 %v2824_v54, %v2824_v54  ;;  %v1046_v20 = vpack.c.bf16 %v982_v6, %v982_v6  ;;  %v498_v6 = vpop.f32.mrf.mxu3 }
  0xe3   :  { %v1146_v55 = vmul.f32 %v2153_v36, %v2705_v9  ;;  %v2828_v57 = vpop.eup %2154  ;;  %2166 = vrcp.f32 %v1428_v22  ;;  %v546_v46 = vpack.c.bf16 %v2839_v21, %v2839_v21 }
  0xe4   :  { %v2157_v0 = vpop.eup %2156  ;;  %2168 = vrcp.f32 %v1429_v25  ;;  %v1586_v25 = vunpack.c.l.bf16 %v1336_v59  ;;  %v1148_v29 = vunpack.c.h.bf16 %v1046_v20  ;;  %v1149_v30 = vunpack.c.l.bf16 %v1046_v20 }
  0xe5   :  { %v1147_v3 = vpack.c.bf16 %v1144_v13, %v1146_v55  ;;  %v2159_v7 = vpop.eup %2158  ;;  %v642_v41 = vxor.u32 2147516416, %v578_v14  ;;  %v1305_v51 = vmul.f32 %v2157_v0, %v2703_v8  ;;  %v878_v36 = vpack.c.bf16 %v2828_v57, %v2828_v57 }
  0xe6   :  { %v2161_v18 = vpop.eup %2160  ;;  %v1340_v19 = vmul.f32 %v2159_v7, %v2703_v8  ;;  %2170 = vrcp.f32 %v1148_v29  ;;  %v1650_v49 = vmul.f32 %v1586_v25, %v2737_v61  ;;  %v818_v55 = vmul.f32 1.442695, %v705_v40 }
  0xe7   :  { %v1559_v63 = vunpack.c.l.bf16 %v1147_v3  ;;  %v2163_v22 = vpop.eup %2162  ;;  %v1342_v23 = vmul.f32 %v2161_v18, %v2705_v9  ;;  %2172 = vrcp.f32 %v1149_v30  ;;  %v706_v56 = vunpack.c.l.bf16 %v642_v41 }
  0xe8   :  { %v2165_v26 = vpop.eup %2164  ;;  %v882_v34 = vpack.c.bf16 %v2163_v22, %v2163_v22  ;;  %2174 = vpow2.f32 %v816_v60  ;;  %v1087_v61 = vpack.c.bf16 %v1023_v15, %v1023_v15  ;;  %v1753_v7 = vsel %vm1683_vm2, %v1650_v49, 0.0 }
  0xe9   :  { %v1623_v28 = vmul.f32 %v1559_v63, %v2753_v50  ;;  %v2167_v38 = vpop.eup %2166  ;;  %v1343_v43 = vpack.c.bf16 %v1340_v19, %v1342_v23  ;;  %v1307_v3 = vmul.f32 %v2165_v26, %v2705_v9  ;;  %2176 = vrcp.f32 %v1309_v1 }
  0xea   :  { %v2169_v45 = vpop.eup %2168  ;;  %v946_v47 = vunpack.c.l.bf16 %v882_v34  ;;  %2178 = vpow2.f32 %v782_v39  ;;  %v610_v11 = vxor.u32 2147516416, %v546_v46  ;;  %v707_v60 = vunpack.c.l.bf16 %v643_v52  ;;  %v385_v39 = vpop.f32.mrf.mxu0 }
  0xeb   :  { %v1693_v58 = vsel %vm1683_vm2, %v1623_v28, 0.0  ;;  %v1587_v50 = vunpack.c.l.bf16 %v1343_v43  ;;  %2180 = vpow2.f32 %v818_v55  ;;  %v2863_v15 = vadd.f32 %v2667_v31, %v498_v6 }
  0xec   :  { %v2850_v17 = vadd.f32 %v1693_v58, %v1692_v44  ;;  %v1010_v13 = vadd.f32 1.0, %v946_v47  ;;  %v2171_v57 = vpop.eup %2170  ;;  %v1310_v19 = vunpack.c.l.bf16 %v2830_v42  ;;  %v942_v20 = vunpack.c.l.bf16 %v878_v36 }
  0xed   :  { %v1651_v59 = vmul.f32 %v1587_v50, %v2756_v27  ;;  %v2173_v18 = vpop.eup %2172  ;;  %v820_v27 = vmul.f32 1.442695, %v706_v56  ;;  %v1151_v63 = vmul.f32 %v2171_v57, %v2703_v8  ;;  %v1431_v25 = vmul.f32 %v2167_v38, %v2703_v8 }
  0xee   :  { %v1074_v44 = vpack.c.bf16 %v1010_v13, %v1010_v13  ;;  %v1153_v22 = vmul.f32 %v2173_v18, %v2705_v9  ;;  %v2175_v1 = vpop.eup %2174  ;;  %v1435_v23 = vunpack.c.h.bf16 %v1087_v61  ;;  %v674_v32 = vunpack.c.l.bf16 %v610_v11 }
  0xef   :  { %v1754_v0 = vsel %vm1683_vm2, %v1651_v59, 0.0  ;;  %v2177_v26 = vpop.eup %2176  ;;  %v1308_v28 = vpack.c.bf16 %v1305_v51, %v1307_v3  ;;  %v1433_v29 = vmul.f32 %v2169_v45, %v2705_v9  ;;  %v822_v30 = vmul.f32 1.442695, %v707_v60  ;;  %v415_v59 = vpop.f32.mrf.mxu1 }
  0xf0   :  { %v2859_v2 = vadd.f32 %v1754_v0, %v1753_v7  ;;  %v1344_v14 = vunpack.c.h.bf16 %v1074_v44  ;;  %v1345_v16 = vunpack.c.l.bf16 %v1074_v44  ;;  %v1154_v34 = vpack.c.bf16 %v1151_v63, %v1153_v22  ;;  %v2179_v40 = vpop.eup %2178 }
  0xf1   :  { %v1436_v41 = vunpack.c.l.bf16 %v1087_v61  ;;  %v580_v42 = vpack.c.bf16 %v2863_v15, %v2863_v15  ;;  %v1006_v43 = vadd.f32 1.0, %v942_v20  ;;  %v896_v58 = vpack.c.bf16 %v2175_v1, %v2175_v1  ;;  %v2181_v46 = vpop.eup %2180  ;;  %v455_v20 = vpop.f32.mrf.mxu2 }
  0xf2   :  { %2182 = vrcp.f32 %v1344_v14  ;;  %v1560_v38 = vunpack.c.l.bf16 %v1154_v34  ;;  %v756_v47 = vmul.f32 1.442695, %v674_v32  ;;  %v2872_v49 = vadd.f32 %v2667_v31, %v385_v39 }
  0xf3   :  { %2184 = vrcp.f32 %v1345_v16  ;;  %v1582_v50 = vunpack.c.l.bf16 %v1308_v28  ;;  %v1434_v51 = vpack.c.bf16 %v1431_v25, %v1433_v29  ;;  %v879_v13 = vpack.c.bf16 %v2179_v40, %v2179_v40 }
  0xf4   :  { %2186 = vpow2.f32 %v820_v27  ;;  %v1624_v36 = vmul.f32 %v1560_v38, %v2772_v5  ;;  %v644_v56 = vxor.u32 2147516416, %v580_v42  ;;  %v1070_v3 = vpack.c.bf16 %v1006_v43, %v1006_v43 }
  0xf5   :  { %2188 = vrcp.f32 %v1310_v19  ;;  %v960_v61 = vunpack.c.l.bf16 %v896_v58  ;;  %v897_v0 = vpack.c.bf16 %v2181_v46, %v2181_v46  ;;  %v535_v5 = vpack.c.bf16 %v2872_v49, %v2872_v49 }
  0xf6   :  { %2190 = vrcp.f32 %v1435_v23  ;;  %v1695_v44 = vsel %vm1683_vm2, %v1624_v36, 0.0  ;;  %v1600_v60 = vunpack.c.l.bf16 %v1434_v51  ;;  %v2884_v16 = vadd.f32 %v2667_v31, %v415_v59 }
  0xf7   :  { %2192 = vpow2.f32 %v822_v30  ;;  %v2879_v11 = vadd.f32 %v1695_v44, %v2850_v17  ;;  %v1646_v27 = vmul.f32 %v1582_v50, %v2716_v35  ;;  %v943_v63 = vunpack.c.l.bf16 %v879_v13 }
  0xf8   :  { %v2183_v45 = vpop.eup %2182  ;;  %2194 = vrcp.f32 %v1436_v41  ;;  %v708_v19 = vunpack.c.l.bf16 %v644_v56  ;;  %v1312_v17 = vmul.f32 %v2177_v26, %v2703_v8  ;;  %v1024_v1 = vadd.f32 1.0, %v960_v61  ;;  %v500_v56 = vpop.f32.mrf.mxu3 }
  0xf9   :  { %v2185_v52 = vpop.eup %2184  ;;  %v1347_v55 = vmul.f32 %v2183_v45, %v2703_v8  ;;  %2196 = vpow2.f32 %v756_v47  ;;  %v1316_v28 = vunpack.c.h.bf16 %v1070_v3  ;;  %v1317_v29 = vunpack.c.l.bf16 %v1070_v3 }
  0xfa   :  { %v1349_v6 = vmul.f32 %v2185_v52, %v2705_v9  ;;  %v2187_v7 = vpop.eup %2186  ;;  %v961_v30 = vunpack.c.l.bf16 %v897_v0  ;;  %v599_v34 = vxor.u32 2147516416, %v535_v5  ;;  %v1664_v39 = vmul.f32 %v1600_v60, %v2719_v37  ;;  %v388_v60 = vpop.f32.mrf.mxu0 }
  0xfb   :  { %v2189_v57 = vpop.eup %2188  ;;  %v898_v25 = vpack.c.bf16 %v2187_v7, %v2187_v7  ;;  %v547_v35 = vpack.c.bf16 %v2884_v16, %v2884_v16  ;;  %v2893_v41 = vadd.f32 %v2667_v31, %v455_v20  ;;  %v1007_v43 = vadd.f32 1.0, %v943_v63 }
  0xfc   :  { %v1350_v14 = vpack.c.bf16 %v1347_v55, %v1349_v6  ;;  %v2191_v18 = vpop.eup %2190  ;;  %v1314_v26 = vmul.f32 %v2189_v57, %v2705_v9  ;;  %v824_v38 = vmul.f32 1.442695, %v708_v19  ;;  %v1088_v47 = vpack.c.bf16 %v1024_v1, %v1024_v1 }
  0xfd   :  { %v2193_v22 = vpop.eup %2192  ;;  %v1438_v46 = vmul.f32 %v2191_v18, %v2703_v8  ;;  %v962_v45 = vunpack.c.l.bf16 %v898_v25  ;;  %v1025_v50 = vadd.f32 1.0, %v961_v30  ;;  %v663_v36 = vunpack.c.l.bf16 %v599_v34 }
  0xfe   :  { %v1588_v23 = vunpack.c.l.bf16 %v1350_v14  ;;  %v2195_v32 = vpop.eup %2194  ;;  %v899_v58 = vpack.c.bf16 %v2193_v22, %v2193_v22  ;;  %2198 = vrcp.f32 %v1316_v28  ;;  %v611_v13 = vxor.u32 2147516416, %v547_v35 }
  0xff   :  { %v2197_v42 = vpop.eup %2196  ;;  %v563_v55 = vpack.c.bf16 %v2893_v41, %v2893_v41  ;;  %v1315_v59 = vpack.c.bf16 %v1312_v17, %v1314_v26  ;;  %v1071_v3 = vpack.c.bf16 %v1007_v43, %v1007_v43  ;;  %2200 = vpow2.f32 %v824_v38 }
 0x100   :  { %v1652_v40 = vmul.f32 %v1588_v23, %v2791_v48  ;;  %v1440_v48 = vmul.f32 %v2195_v32, %v2705_v9  ;;  %v866_v52 = vpack.c.bf16 %v2197_v42, %v2197_v42  ;;  %v963_v61 = vunpack.c.l.bf16 %v899_v58 }
 0x101   :  { %v2905_v44 = vsel %vm1683_vm2, %v1646_v27, 0.0  ;;  %2202 = vrcp.f32 %v1317_v29  ;;  %v1442_v6 = vunpack.c.h.bf16 %v1088_v47  ;;  %v1026_v7 = vadd.f32 1.0, %v962_v45 }
 0x102   :  { %v1756_v37 = vsel %vm1683_vm2, %v1652_v40, 0.0  ;;  %3524 = vst [vmem:[#allocation6_spill] sm:$0xff] %v2905_v44  ;;  %v1089_v0 = vpack.c.bf16 %v1025_v50, %v1025_v50  ;;  %v734_v5 = vmul.f32 1.442695, %v663_v36  ;;  %v2908_v57 = vadd.f32 %v2667_v31, %v500_v56  ;;  %v418_v50 = vpop.f32.mrf.mxu1  ;;  %v458_v36 = vpop.f32.mrf.mxu2 }
 0x103   :  { %v2900_v51 = vadd.f32 %v1756_v37, %v2859_v2  ;;  %v1441_v2 = vpack.c.bf16 %v1438_v46, %v1440_v48  ;;  %v1443_v14 = vunpack.c.l.bf16 %v1088_v47  ;;  %v930_v18 = vunpack.c.l.bf16 %v866_v52 }
 0x104   :  { %3525 = vst [vmem:[#allocation7_spill] sm:$0xff] %v2908_v57  ;;  %v675_v63 = vunpack.c.l.bf16 %v611_v13  ;;  %v627_v19 = vxor.u32 2147516416, %v563_v55  ;;  %v2911_v20 = vsel %vm1683_vm2, %v1664_v39, 0.0  ;;  %v1583_v22 = vunpack.c.l.bf16 %v1315_v59  ;;  %v2199_v1 = vpop.eup %2198 }
 0x105   :  { %v1323_v27 = vunpack.c.h.bf16 %v1071_v3  ;;  %v1027_v17 = vadd.f32 1.0, %v963_v61  ;;  %2204 = vrcp.f32 %v1442_v6  ;;  %v1324_v25 = vunpack.c.l.bf16 %v1071_v3  ;;  %v2201_v28 = vpop.eup %2200 }
 0x106   :  { %v1090_v23 = vpack.c.bf16 %v1026_v7, %v1026_v7  ;;  %v2914_v32 = vadd.f32 %v2667_v31, %v388_v60  ;;  %v1601_v29 = vunpack.c.l.bf16 %v1441_v2  ;;  %v1449_v30 = vunpack.c.h.bf16 %v1089_v0 }
 0x107   :  { %2206 = vpow2.f32 %v734_v5  ;;  %v581_v34 = vpack.c.bf16 %v2908_v57, %v2908_v57  ;;  %v2203_v40 = vpop.eup %2202  ;;  %v994_v39 = vadd.f32 1.0, %v930_v18  ;;  %v758_v35 = vmul.f32 1.442695, %v675_v63 }
 0x108   :  { %2208 = vrcp.f32 %v1443_v14  ;;  %v691_v42 = vunpack.c.l.bf16 %v627_v19  ;;  %v2919_v26 = vmul.f32 %v2199_v1, %v2703_v8  ;;  %v1450_v43 = vunpack.c.l.bf16 %v1089_v0  ;;  %v503_v19 = vpop.f32.mrf.mxu3 }
 0x109   :  { %2210 = vrcp.f32 %v1323_v27  ;;  %v1091_v58 = vpack.c.bf16 %v1027_v17, %v1027_v17  ;;  %v1456_v38 = vunpack.c.h.bf16 %v1090_v23  ;;  %v900_v46 = vpack.c.bf16 %v2201_v28, %v2201_v28 }
 0x10a   :  { %2212 = vrcp.f32 %v1324_v25  ;;  %v536_v47 = vpack.c.bf16 %v2914_v32, %v2914_v32  ;;  %v1321_v45 = vmul.f32 %v2203_v40, %v2705_v9  ;;  %v1457_v37 = vunpack.c.l.bf16 %v1090_v23  ;;  %v390_v23 = vpop.f32.mrf.mxu0  ;;  %v2942_v40 = vld [vmem:[%s3505_s2] ss:$0 sm:$0xff] }
 0x10b   :  { %2214 = vrcp.f32 %v1449_v30  ;;  %v645_v48 = vxor.u32 2147516416, %v581_v34  ;;  %v2205_v52 = vpop.eup %2204  ;;  %v1058_v13 = vpack.c.bf16 %v994_v39, %v994_v39  ;;  %v790_v55 = vmul.f32 1.442695, %v691_v42 }
 0x10c   :  { %2216 = vpow2.f32 %v758_v35  ;;  %v2925_v56 = vadd.f32 %v2667_v31, %v418_v50  ;;  %v1647_v3 = vmul.f32 %v1583_v22, %v2741_v4  ;;  %v1665_v61 = vmul.f32 %v1601_v29, %v2750_v24 }
 0x10d   :  { %v2207_v59 = vpop.eup %2206  ;;  %2218 = vrcp.f32 %v1450_v43  ;;  %v1463_v6 = vunpack.c.h.bf16 %v1091_v58  ;;  %v964_v2 = vunpack.c.l.bf16 %v900_v46  ;;  %v600_v0 = vxor.u32 2147516416, %v536_v47 }
 0x10e   :  { %v2209_v7 = vpop.eup %2208  ;;  %2220 = vrcp.f32 %v1456_v38  ;;  %v2930_v5 = vadd.f32 %v2667_v31, %v458_v36  ;;  %v1322_v14 = vpack.c.bf16 %v2919_v26, %v1321_v45  ;;  %v1464_v18 = vunpack.c.l.bf16 %v1091_v58 }
 0x10f   :  { %v2211_v60 = vpop.eup %2210  ;;  %2222 = vrcp.f32 %v1457_v37  ;;  %v709_v63 = vunpack.c.l.bf16 %v645_v48  ;;  %v1232_v4 = vunpack.c.h.bf16 %v1058_v13  ;;  %v855_v22 = vpack.c.bf16 %v2207_v59, %v2207_v59 }
 0x110   :  { %v2213_v27 = vpop.eup %2212  ;;  %2224 = vpow2.f32 %v790_v55  ;;  %v548_v24 = vpack.c.bf16 %v2925_v56, %v2925_v56  ;;  %v1445_v1 = vmul.f32 %v2205_v52, %v2703_v8  ;;  %v1447_v31 = vmul.f32 %v2209_v7, %v2705_v9 }
 0x111   :  { %v2215_v17 = vpop.eup %2214  ;;  %2226 = vrcp.f32 %v1463_v6  ;;  %v1233_v25 = vunpack.c.l.bf16 %v1058_v13  ;;  %v1028_v29 = vadd.f32 1.0, %v964_v2  ;;  %v664_v30 = vunpack.c.l.bf16 %v600_v0 }
 0x112   :  { %v2217_v28 = vpop.eup %2216  ;;  %v564_v34 = vpack.c.bf16 %v2930_v5, %v2930_v5  ;;  %v2945_v39 = vadd.f32 %v2942_v40, %v503_v19  ;;  %v2948_v42 = vsel %vm1683_vm2, %v1647_v3, 0.0  ;;  %v2951_v26 = vsel %vm1683_vm2, %v1665_v61, 0.0 }
 0x113   :  { %v2219_v35 = vpop.eup %2218  ;;  %3527 = vst [vmem:[#allocation9_spill] sm:$0xff] %v2948_v42  ;;  %2228 = vrcp.f32 %v1464_v18  ;;  %v826_v43 = vmul.f32 1.442695, %v709_v63  ;;  %v919_v38 = vunpack.c.l.bf16 %v855_v22  ;;  %v612_v46 = vxor.u32 2147516416, %v548_v24 }
 0x114   :  { %3526 = vst [vmem:[#allocation8_spill] sm:$0xff] %v2945_v39  ;;  %v2221_v58 = vpop.eup %2220  ;;  %2230 = vrcp.f32 %v1232_v4  ;;  %v2954_v47 = vadd.f32 %v2942_v40, %v390_v23  ;;  %v1584_v37 = vunpack.c.l.bf16 %v1322_v14  ;;  %v1448_v48 = vpack.c.bf16 %v1445_v1, %v1447_v31 }
 0x115   :  { %v2223_v45 = vpop.eup %2222  ;;  %2232 = vrcp.f32 %v1233_v25  ;;  %v867_v50 = vpack.c.bf16 %v2217_v28, %v2217_v28  ;;  %v1092_v52 = vpack.c.bf16 %v1028_v29, %v1028_v29  ;;  %v736_v13 = vmul.f32 1.442695, %v664_v30 }
 0x116   :  { %v2225_v36 = vpop.eup %2224  ;;  %v628_v55 = vxor.u32 2147516416, %v564_v34  ;;  %v582_v59 = vpack.c.bf16 %v2945_v39, %v2945_v39  ;;  %v1326_v61 = vmul.f32 %v2211_v60, %v2703_v8  ;;  %v1452_v6 = vmul.f32 %v2215_v17, %v2703_v8 }
 0x117   :  { %v2227_v3 = vpop.eup %2226  ;;  %v1454_v7 = vmul.f32 %v2219_v35, %v2705_v9  ;;  %2234 = vpow2.f32 %v826_v43  ;;  %v1328_v2 = vmul.f32 %v2213_v27, %v2705_v9  ;;  %v983_v0 = vadd.f32 1.0, %v919_v38 }
 0x118   :  { %v676_v14 = vunpack.c.l.bf16 %v612_v46  ;;  %v537_v18 = vpack.c.bf16 %v2954_v47, %v2954_v47  ;;  %v1459_v19 = vmul.f32 %v2221_v58, %v2703_v8  ;;  %v1461_v4 = vmul.f32 %v2223_v45, %v2705_v9 }
 0x119   :  { %v2229_v63 = vpop.eup %2228  ;;  %v931_v22 = vunpack.c.l.bf16 %v867_v50  ;;  %v883_v24 = vpack.c.bf16 %v2225_v36, %v2225_v36  ;;  %v1470_v1 = vunpack.c.h.bf16 %v1092_v52  ;;  %2236 = vpow2.f32 %v736_v13 }
 0x11a   :  { %v2231_v60 = vpop.eup %2230  ;;  %v692_v17 = vunpack.c.l.bf16 %v628_v55  ;;  %v646_v31 = vxor.u32 2147516416, %v582_v59  ;;  %v2967_v27 = vmul.f32 %v1584_v37, %v2768_v53  ;;  %v1602_v23 = vunpack.c.l.bf16 %v1448_v48  ;;  %v420_v53 = vpop.f32.mrf.mxu1 }
 0x11b   :  { %v2233_v25 = vpop.eup %2232  ;;  %v1455_v28 = vpack.c.bf16 %v1452_v6, %v1454_v7  ;;  %v1471_v29 = vunpack.c.l.bf16 %v1092_v52  ;;  %v1329_v30 = vpack.c.bf16 %v1326_v61, %v1328_v2  ;;  %v1047_v34 = vpack.c.bf16 %v983_v0, %v983_v0 }
 0x11c   :  { %3528 = vst [vmem:[#allocation10_spill] sm:$0xff] %v2967_v27  ;;  %v760_v35 = vmul.f32 1.442695, %v676_v14  ;;  %v601_v43 = vxor.u32 2147516416, %v537_v18  ;;  %v1462_v38 = vpack.c.bf16 %v1459_v19, %v1461_v4  ;;  %v1466_v46 = vmul.f32 %v2227_v3, %v2703_v8  ;;  %v460_v18 = vpop.f32.mrf.mxu2 }
 0x11d   :  { %v2235_v58 = vpop.eup %2234  ;;  %v995_v45 = vadd.f32 1.0, %v931_v22  ;;  %v947_v50 = vunpack.c.l.bf16 %v883_v24  ;;  %v1468_v36 = vmul.f32 %v2229_v63, %v2705_v9  ;;  %2238 = vrcp.f32 %v1470_v1 }
 0x11e   :  { %v792_v13 = vmul.f32 1.442695, %v692_v17  ;;  %v710_v55 = vunpack.c.l.bf16 %v646_v31  ;;  %v1603_v37 = vunpack.c.l.bf16 %v1455_v28  ;;  %v1235_v48 = vmul.f32 %v2231_v60, %v2703_v8 }
 0x11f   :  { %v1237_v52 = vmul.f32 %v2233_v25, %v2705_v9  ;;  %2240 = vrcp.f32 %v1471_v29  ;;  %v2237_v59 = vpop.eup %2236  ;;  %v1155_v61 = vunpack.c.h.bf16 %v1047_v34  ;;  %v901_v6 = vpack.c.bf16 %v2235_v58, %v2235_v58 }
 0x120   :  { %2242 = vpow2.f32 %v760_v35  ;;  %v665_v7 = vunpack.c.l.bf16 %v601_v43  ;;  %v1156_v3 = vunpack.c.l.bf16 %v1047_v34  ;;  %v1059_v2 = vpack.c.bf16 %v995_v45, %v995_v45 }
 0x121   :  { %v1011_v0 = vadd.f32 1.0, %v947_v50  ;;  %v2974_v14 = vadd.f32 %v2942_v40, %v420_v53  ;;  %v1604_v63 = vunpack.c.l.bf16 %v1462_v38  ;;  %v1469_v19 = vpack.c.bf16 %v1466_v46, %v1468_v36 }
 0x122   :  { %2244 = vpow2.f32 %v792_v13  ;;  %v828_v4 = vmul.f32 1.442695, %v710_v55  ;;  %v1666_v22 = vmul.f32 %v1602_v23, %v2778_v12  ;;  %v1585_v24 = vunpack.c.l.bf16 %v1329_v30 }
 0x123   :  { %v1238_v60 = vpack.c.bf16 %v1235_v48, %v1237_v52  ;;  %v856_v1 = vpack.c.bf16 %v2237_v59, %v2237_v59  ;;  %v2239_v17 = vpop.eup %2238  ;;  %2246 = vrcp.f32 %v1155_v61  ;;  %v965_v31 = vunpack.c.l.bf16 %v901_v6 }
 0x124   :  { %v738_v25 = vmul.f32 1.442695, %v665_v7  ;;  %v2978_v28 = vadd.f32 %v2942_v40, %v460_v18  ;;  %2248 = vrcp.f32 %v1156_v3  ;;  %v1239_v34 = vunpack.c.h.bf16 %v1059_v2  ;;  %v505_v18 = vpop.f32.mrf.mxu3 }
 0x125   :  { %v2241_v29 = vpop.eup %2240  ;;  %v1075_v35 = vpack.c.bf16 %v1011_v0, %v1011_v0  ;;  %v549_v43 = vpack.c.bf16 %v2974_v14, %v2974_v14  ;;  %v1667_v12 = vmul.f32 %v1603_v37, %v2815_v33  ;;  %v1668_v23 = vmul.f32 %v1604_v63, %v2824_v54  ;;  %v393_v63 = vpop.f32.mrf.mxu0 }
 0x126   :  { %v2243_v58 = vpop.eup %2242  ;;  %v1605_v30 = vunpack.c.l.bf16 %v1469_v19  ;;  %2250 = vpow2.f32 %v828_v4  ;;  %v1572_v38 = vunpack.c.l.bf16 %v1238_v60  ;;  %v1473_v46 = vmul.f32 %v2239_v17, %v2703_v8 }
 0x127   :  { %v1240_v45 = vunpack.c.l.bf16 %v1059_v2  ;;  %v920_v50 = vunpack.c.l.bf16 %v856_v1  ;;  %v1475_v13 = vmul.f32 %v2241_v29, %v2705_v9  ;;  %v1029_v55 = vadd.f32 1.0, %v965_v31 }
 0x128   :  { %v2245_v36 = vpop.eup %2244  ;;  %2252 = vpow2.f32 %v738_v25  ;;  %v565_v53 = vpack.c.bf16 %v2978_v28, %v2978_v28  ;;  %v1351_v48 = vunpack.c.h.bf16 %v1075_v35  ;;  %v868_v33 = vpack.c.bf16 %v2243_v58, %v2243_v58 }
 0x129   :  { %2254 = vrcp.f32 %v1239_v34  ;;  %v613_v37 = vxor.u32 2147516416, %v549_v43  ;;  %v2247_v54 = vpop.eup %2246  ;;  %v2989_v52 = vsel %vm1683_vm2, %v1666_v22, 0.0  ;;  %v2992_v59 = vmul.f32 %v1585_v24, %v2805_v10 }
 0x12a   :  { %v2995_v61 = vsel %vm1683_vm2, %v1667_v12, 0.0  ;;  %v1669_v6 = vmul.f32 %v1605_v30, %v2833_v62  ;;  %v2249_v7 = vpop.eup %2248  ;;  %2256 = vrcp.f32 %v1240_v45  ;;  %v1352_v3 = vunpack.c.l.bf16 %v1075_v35 }
 0x12b   :  { %3529 = vst [vmem:[#allocation11_spill] sm:$0xff] %v2992_v59  ;;  %v984_v2 = vadd.f32 1.0, %v920_v50  ;;  %v884_v0 = vpack.c.bf16 %v2245_v36, %v2245_v36  ;;  %v2999_v4 = vsel %vm1683_vm2, %v1668_v23, 0.0  ;;  %v1636_v22 = vmul.f32 %v1572_v38, %v2839_v21 }
 0x12c   :  { %3530 = vst [vmem:[#allocation12_spill] sm:$0xff] %v2995_v61  ;;  %v2251_v19 = vpop.eup %2250  ;;  %v3002_v10 = vpack.c.bf16 %v1029_v55, %v1029_v55  ;;  %v629_v24 = vxor.u32 2147516416, %v565_v53  ;;  %v1476_v60 = vpack.c.bf16 %v1473_v46, %v1475_v13  ;;  %2258 = vrcp.f32 %v1351_v48  ;;  %v463_v46 = vpop.f32.mrf.mxu2 }
 0x12d   :  { %3531 = vst [vmem:[#allocation13_spill] sm:$0xff] %v2999_v4  ;;  %v932_v1 = vunpack.c.l.bf16 %v868_v33  ;;  %v677_v62 = vunpack.c.l.bf16 %v613_v37  ;;  %v3005_v31 = vsel %vm1683_vm2, %v1669_v6, 0.0  ;;  %v1158_v25 = vmul.f32 %v2247_v54, %v2703_v8  ;;  %v423_v54 = vpop.f32.mrf.mxu1 }
 0x12e   :  { %v2253_v17 = vpop.eup %2252  ;;  %3532 = vst [vmem:[#allocation14_spill] sm:$0xff] %v3005_v31  ;;  %v1160_v29 = vmul.f32 %v2249_v7, %v2705_v9  ;;  %v3010_v34 = vadd.f32 %v2942_v40, %v505_v18  ;;  %2260 = vrcp.f32 %v1352_v3  ;;  %v1048_v21 = vpack.c.bf16 %v984_v2, %v984_v2 }
 0x12f   :  { %v2255_v35 = vpop.eup %2254  ;;  %v948_v43 = vunpack.c.l.bf16 %v884_v0  ;;  %v902_v58 = vpack.c.bf16 %v2251_v19, %v2251_v19  ;;  %v3013_v12 = vsel %vm1683_vm2, %v1636_v22, 0.0  ;;  %v1477_v23 = vunpack.c.h.bf16 %v3002_v10 }
 0x130   :  { %3533 = vst [vmem:[#allocation15_spill] sm:$0xff] %v3010_v34  ;;  %v693_v30 = vunpack.c.l.bf16 %v629_v24  ;;  %v3017_v38 = vadd.f32 %v2942_v40, %v393_v63  ;;  %v2257_v45 = vpop.eup %2256  ;;  %v3019_v50 = vunpack.c.l.bf16 %v1476_v60  ;;  %v996_v36 = vadd.f32 1.0, %v932_v1  ;;  %v395_v1 = vpop.f32.mrf.mxu0 }
 0x131   :  { %v857_v13 = vpack.c.bf16 %v2253_v17, %v2253_v17  ;;  %v762_v55 = vmul.f32 1.442695, %v677_v62  ;;  %v1161_v53 = vpack.c.bf16 %v1158_v25, %v1160_v29  ;;  %v1242_v48 = vmul.f32 %v2255_v35, %v2703_v8 }
 0x132   :  { %v1478_v33 = vunpack.c.l.bf16 %v3002_v10  ;;  %v583_v37 = vpack.c.bf16 %v3010_v34, %v3010_v34  ;;  %v2259_v6 = vpop.eup %2258  ;;  %v1162_v7 = vunpack.c.h.bf16 %v1048_v21  ;;  %v1012_v3 = vadd.f32 1.0, %v948_v43 }
 0x133   :  { %v966_v2 = vunpack.c.l.bf16 %v902_v58  ;;  %v3026_v0 = vadd.f32 %v2942_v40, %v463_v46  ;;  %v1244_v18 = vmul.f32 %v2257_v45, %v2705_v9  ;;  %2262 = vrcp.f32 %v1477_v23 }
 0x134   :  { %v794_v63 = vmul.f32 1.442695, %v693_v30  ;;  %v538_v19 = vpack.c.bf16 %v3017_v38, %v3017_v38  ;;  %v2261_v22 = vpop.eup %2260  ;;  %v1060_v10 = vpack.c.bf16 %v996_v36, %v996_v36  ;;  %v921_v24 = vunpack.c.l.bf16 %v857_v13 }
 0x135   :  { %2264 = vpow2.f32 %v762_v55  ;;  %v3032_v60 = vadd.f32 %v2942_v40, %v423_v54  ;;  %v1561_v62 = vunpack.c.l.bf16 %v1161_v53  ;;  %v1354_v17 = vmul.f32 %v2259_v6, %v2703_v8 }
 0x136   :  { %v1163_v25 = vunpack.c.l.bf16 %v1048_v21  ;;  %v647_v29 = vxor.u32 2147516416, %v583_v37  ;;  %2266 = vrcp.f32 %v1162_v7  ;;  %v1076_v35 = vpack.c.bf16 %v1012_v3, %v1012_v3 }
 0x137   :  { %v1030_v43 = vadd.f32 1.0, %v966_v2  ;;  %v566_v58 = vpack.c.bf16 %v3026_v0, %v3026_v0  ;;  %v1356_v23 = vmul.f32 %v2261_v22, %v2705_v9  ;;  %2268 = vpow2.f32 %v794_v63  ;;  %v425_v22 = vpop.f32.mrf.mxu1 }
 0x138   :  { %v602_v30 = vxor.u32 2147516416, %v538_v19  ;;  %v3039_v46 = vadd.f32 %v2942_v40, %v395_v1  ;;  %v1245_v45 = vpack.c.bf16 %v1242_v48, %v1244_v18  ;;  %v1246_v36 = vunpack.c.h.bf16 %v1060_v10 }
 0x139   :  { %v985_v13 = vadd.f32 1.0, %v921_v24  ;;  %v550_v21 = vpack.c.bf16 %v3032_v60, %v3032_v60  ;;  %v2263_v55 = vpop.eup %2262  ;;  %v1625_v53 = vmul.f32 %v1561_v62, %v2872_v49  ;;  %2270 = vrcp.f32 %v1163_v25 }
 0x13a   :  { %v1247_v37 = vunpack.c.l.bf16 %v1060_v10  ;;  %v711_v54 = vunpack.c.l.bf16 %v647_v29  ;;  %2272 = vrcp.f32 %v1478_v33  ;;  %v1358_v7 = vunpack.c.h.bf16 %v1076_v35 }
 0x13b   :  { %v2265_v6 = vpop.eup %2264  ;;  %v3044_v3 = vpack.c.bf16 %v1030_v43, %v1030_v43  ;;  %v630_v2 = vxor.u32 2147516416, %v566_v58  ;;  %v1357_v63 = vpack.c.bf16 %v1354_v17, %v1356_v23  ;;  %v1359_v19 = vunpack.c.l.bf16 %v1076_v35  ;;  %v508_v43 = vpop.f32.mrf.mxu3 }
 0x13c   :  { %v666_v48 = vunpack.c.l.bf16 %v602_v30  ;;  %v539_v18 = vpack.c.bf16 %v3039_v46, %v3039_v46  ;;  %v2267_v24 = vpop.eup %2266  ;;  %v1573_v1 = vunpack.c.l.bf16 %v1245_v45  ;;  %2274 = vrcp.f32 %v1246_v36 }
 0x13d   :  { %v1049_v49 = vpack.c.bf16 %v985_v13, %v985_v13  ;;  %v614_v62 = vxor.u32 2147516416, %v550_v21  ;;  %v2269_v10 = vpop.eup %2268  ;;  %v3049_v25 = vsel %vm1683_vm2, %v1625_v53, 0.0  ;;  %2276 = vrcp.f32 %v1247_v37 }
 0x13e   :  { %v869_v33 = vpack.c.bf16 %v2265_v6, %v2265_v6  ;;  %v830_v29 = vmul.f32 1.442695, %v711_v54  ;;  %2278 = vrcp.f32 %v1358_v7  ;;  %v1484_v17 = vunpack.c.h.bf16 %v3044_v3 }
 0x13f   :  { %v694_v35 = vunpack.c.l.bf16 %v630_v2  ;;  %v3053_v58 = vadd.f32 %v2942_v40, %v425_v22  ;;  %v2271_v23 = vpop.eup %2270  ;;  %v1589_v30 = vunpack.c.l.bf16 %v1357_v63  ;;  %2280 = vrcp.f32 %v1359_v19 }
 0x140   :  { %v740_v45 = vmul.f32 1.442695, %v666_v48  ;;  %v603_v36 = vxor.u32 2147516416, %v539_v18  ;;  %v2273_v13 = vpop.eup %2272  ;;  %v1165_v21 = vmul.f32 %v2267_v24, %v2703_v8  ;;  %v1169_v53 = vunpack.c.h.bf16 %v1049_v49 }
 0x141   :  { %v885_v37 = vpack.c.bf16 %v2269_v10, %v2269_v10  ;;  %v678_v6 = vunpack.c.l.bf16 %v614_v62  ;;  %v1170_v54 = vunpack.c.l.bf16 %v1049_v49  ;;  %v933_v7 = vunpack.c.l.bf16 %v869_v33 }
 0x142   :  { %2282 = vpow2.f32 %v830_v29  ;;  %v3057_v2 = vadd.f32 %v2942_v40, %v508_v43  ;;  %v2275_v59 = vpop.eup %2274  ;;  %v1167_v22 = vmul.f32 %v2271_v23, %v2705_v9  ;;  %v796_v63 = vmul.f32 1.442695, %v694_v35 }
 0x143   :  { %2284 = vrcp.f32 %v1484_v17  ;;  %v551_v19 = vpack.c.bf16 %v3053_v58, %v3053_v58  ;;  %v2277_v48 = vpop.eup %2276  ;;  %v1637_v18 = vmul.f32 %v1573_v1, %v2884_v16  ;;  %v1485_v24 = vunpack.c.l.bf16 %v3044_v3 }
 0x144   :  { %3534 = vst [vmem:[#allocation16_spill] sm:$0xff] %v3057_v2  ;;  %2286 = vpow2.f32 %v740_v45  ;;  %v667_v49 = vunpack.c.l.bf16 %v603_v36  ;;  %v2279_v62 = vpop.eup %2278  ;;  %v1480_v10 = vmul.f32 %v2263_v55, %v2703_v8  ;;  %v949_v33 = vunpack.c.l.bf16 %v885_v37  ;;  %v465_v45 = vpop.f32.mrf.mxu2 }
 0x145   :  { %2288 = vrcp.f32 %v1169_v53  ;;  %v764_v29 = vmul.f32 1.442695, %v678_v6  ;;  %v2281_v43 = vpop.eup %2280  ;;  %v1482_v17 = vmul.f32 %v2273_v13, %v2705_v9  ;;  %v997_v35 = vadd.f32 1.0, %v933_v7 }
 0x146   :  { %2290 = vrcp.f32 %v1170_v54  ;;  %v584_v23 = vpack.c.bf16 %v3057_v2, %v3057_v2  ;;  %v1653_v16 = vmul.f32 %v1589_v30, %v2893_v41  ;;  %v1168_v1 = vpack.c.bf16 %v1165_v21, %v1167_v22 }
 0x147   :  { %2292 = vpow2.f32 %v796_v63  ;;  %v615_v3 = vxor.u32 2147516416, %v551_v19  ;;  %v1249_v55 = vmul.f32 %v2275_v59, %v2703_v8  ;;  %v1251_v53 = vmul.f32 %v2277_v48, %v2705_v9 }
 0x148   :  { %v2283_v36 = vpop.eup %2282  ;;  %2294 = vrcp.f32 %v1485_v24  ;;  %v742_v37 = vmul.f32 1.442695, %v667_v49  ;;  %v1361_v13 = vmul.f32 %v2279_v62, %v2703_v8  ;;  %v1363_v54 = vmul.f32 %v2281_v43, %v2705_v9 }
 0x149   :  { %v2285_v6 = vpop.eup %2284  ;;  %v1013_v7 = vadd.f32 1.0, %v949_v33  ;;  %2296 = vpow2.f32 %v764_v29  ;;  %v1483_v41 = vpack.c.bf16 %v1480_v10, %v1482_v17  ;;  %v3073_v30 = vpack.c.bf16 %v997_v35, %v997_v35 }
 0x14a   :  { %v2287_v27 = vpop.eup %2286  ;;  %v648_v21 = vxor.u32 2147516416, %v584_v23  ;;  %v3076_v22 = vadd.f32 %v2942_v40, %v465_v45  ;;  %v3080_v63 = vmul.f32 %v3019_v50, %v2863_v15  ;;  %v3084_v19 = vadd.f32 %v3049_v25, %v2879_v11 }
 0x14b   :  { %v2289_v59 = vpop.eup %2288  ;;  %v903_v48 = vpack.c.bf16 %v2283_v36, %v2283_v36  ;;  %v679_v24 = vunpack.c.l.bf16 %v615_v3  ;;  %v3087_v62 = vsel %vm1683_vm2, %v1637_v18, 0.0  ;;  %v1562_v10 = vunpack.c.l.bf16 %v1168_v1 }
 0x14c   :  { %3535 = vst [vmem:[#allocation17_spill] sm:$0xff] %v3080_v63  ;;  %v2291_v49 = vpop.eup %2290  ;;  %v1252_v33 = vpack.c.bf16 %v1249_v55, %v1251_v53  ;;  %2298 = vpow2.f32 %v742_v37  ;;  %v1758_v43 = vsel %vm1683_vm2, %v1653_v16, 0.0  ;;  %v1364_v17 = vpack.c.bf16 %v1361_v13, %v1363_v54 }
 0x14d   :  { %v2293_v29 = vpop.eup %2292  ;;  %v1077_v35 = vpack.c.bf16 %v1013_v7, %v1013_v7  ;;  %v858_v15 = vpack.c.bf16 %v2287_v27, %v2287_v27  ;;  %v3090_v23 = vunpack.c.l.bf16 %v1483_v41  ;;  %v1253_v11 = vunpack.c.h.bf16 %v3073_v30 }
 0x14e   :  { %v2295_v50 = vpop.eup %2294  ;;  %v712_v25 = vunpack.c.l.bf16 %v648_v21  ;;  %v567_v3 = vpack.c.bf16 %v3076_v22, %v3076_v22  ;;  %v1172_v1 = vmul.f32 %v2289_v59, %v2703_v8  ;;  %v1174_v45 = vmul.f32 %v2291_v49, %v2705_v9 }
 0x14f   :  { %3536 = vst [vmem:[#allocation18_spill] sm:$0xff] %v3090_v23  ;;  %v2297_v18 = vpop.eup %2296  ;;  %v967_v36 = vunpack.c.l.bf16 %v903_v48  ;;  %v766_v55 = vmul.f32 1.442695, %v679_v24  ;;  %v1626_v16 = vmul.f32 %v1562_v10, %v2914_v32  ;;  %v1574_v53 = vunpack.c.l.bf16 %v1252_v33  ;;  %v398_v33 = vpop.f32.mrf.mxu0 }
 0x150   :  { %v1487_v27 = vmul.f32 %v2285_v6, %v2703_v8  ;;  %v886_v37 = vpack.c.bf16 %v2293_v29, %v2293_v29  ;;  %v1590_v13 = vunpack.c.l.bf16 %v1364_v17  ;;  %v1489_v54 = vmul.f32 %v2295_v50, %v2705_v9  ;;  %v510_v50 = vpop.f32.mrf.mxu3 }
 0x151   :  { %v1365_v7 = vunpack.c.h.bf16 %v1077_v35  ;;  %v922_v41 = vunpack.c.l.bf16 %v858_v15  ;;  %2300 = vrcp.f32 %v1253_v11  ;;  %v870_v42 = vpack.c.bf16 %v2297_v18, %v2297_v18 }
 0x152   :  { %v2299_v21 = vpop.eup %2298  ;;  %v832_v44 = vmul.f32 1.442695, %v712_v25  ;;  %v631_v59 = vxor.u32 2147516416, %v567_v3  ;;  %v1175_v2 = vpack.c.bf16 %v1172_v1, %v1174_v45  ;;  %v1366_v49 = vunpack.c.l.bf16 %v1077_v35 }
 0x153   :  { %v1031_v48 = vadd.f32 1.0, %v967_v36  ;;  %2302 = vpow2.f32 %v766_v55  ;;  %v1699_v32 = vsel %vm1683_vm2, %v1626_v16, 0.0  ;;  %v1638_v24 = vmul.f32 %v1574_v53, %v2925_v56  ;;  %v468_v56 = vpop.f32.mrf.mxu2 }
 0x154   :  { %v1254_v6 = vunpack.c.l.bf16 %v3073_v30  ;;  %v950_v10 = vunpack.c.l.bf16 %v886_v37  ;;  %v1490_v29 = vpack.c.bf16 %v1487_v27, %v1489_v54  ;;  %2304 = vrcp.f32 %v1365_v7 }
 0x155   :  { %v986_v17 = vadd.f32 1.0, %v922_v41  ;;  %v859_v15 = vpack.c.bf16 %v2299_v21, %v2299_v21  ;;  %v1654_v11 = vmul.f32 %v1590_v13, %v2930_v5  ;;  %v934_v25 = vunpack.c.l.bf16 %v870_v42 }
 0x156   :  { %2306 = vpow2.f32 %v832_v44  ;;  %v695_v35 = vunpack.c.l.bf16 %v631_v59  ;;  %v1563_v3 = vunpack.c.l.bf16 %v1175_v2  ;;  %v1095_v18 = vpack.c.bf16 %v1031_v48, %v1031_v48 }
 0x157   :  { %2308 = vrcp.f32 %v1366_v49  ;;  %v3105_v1 = vadd.f32 %v2942_v40, %v398_v33  ;;  %v2301_v30 = vpop.eup %2300  ;;  %v3108_v45 = vadd.f32 %v1758_v43, %v2900_v51  ;;  %v1014_v36 = vadd.f32 1.0, %v950_v10 }
 0x158   :  { %2310 = vrcp.f32 %v1254_v6  ;;  %v3111_v55 = vadd.f32 %v2942_v40, %v510_v50  ;;  %v3114_v44 = vadd.f32 %v1699_v32, %v3084_v19  ;;  %v3117_v42 = vsel %vm1683_vm2, %v1638_v24, 0.0 }
 0x159   :  { %v2303_v5 = vpop.eup %2302  ;;  %v1050_v2 = vpack.c.bf16 %v986_v17, %v986_v17  ;;  %v923_v16 = vunpack.c.l.bf16 %v859_v15  ;;  %v3119_v53 = vunpack.c.l.bf16 %v1490_v29  ;;  %v998_v27 = vadd.f32 1.0, %v934_v25  ;;  %v428_v29 = vpop.f32.mrf.mxu1 }
 0x15a   :  { %3537 = vst [vmem:[#allocation19_spill] sm:$0xff] %v3111_v55  ;;  %v798_v37 = vmul.f32 1.442695, %v695_v35  ;;  %v3122_v51 = vadd.f32 %v2942_v40, %v468_v56  ;;  %v2305_v43 = vpop.eup %2304  ;;  %v1760_v13 = vsel %vm1683_vm2, %v1654_v11, 0.0  ;;  %v1627_v54 = vmul.f32 %v1563_v3, %v2954_v47 }
 0x15b   :  { %3538 = vst [vmem:[#allocation20_spill] sm:$0xff] %v3119_v53  ;;  %v1491_v7 = vunpack.c.h.bf16 %v1095_v18  ;;  %v540_v19 = vpack.c.bf16 %v3105_v1, %v3105_v1  ;;  %v1256_v21 = vmul.f32 %v2301_v30, %v2703_v8  ;;  %v1078_v59 = vpack.c.bf16 %v1014_v36, %v1014_v36 }
 0x15c   :  { %v2307_v41 = vpop.eup %2306  ;;  %v871_v49 = vpack.c.bf16 %v2303_v5, %v2303_v5  ;;  %v585_v48 = vpack.c.bf16 %v3111_v55, %v3111_v55  ;;  %v1492_v24 = vunpack.c.l.bf16 %v1095_v18  ;;  %v1176_v6 = vunpack.c.h.bf16 %v1050_v2 }
 0x15d   :  { %v2309_v32 = vpop.eup %2308  ;;  %v1177_v10 = vunpack.c.l.bf16 %v1050_v2  ;;  %v987_v33 = vadd.f32 1.0, %v923_v16  ;;  %v1062_v47 = vpack.c.bf16 %v998_v27, %v998_v27  ;;  %2312 = vpow2.f32 %v798_v37 }
 0x15e   :  { %v2311_v17 = vpop.eup %2310  ;;  %v3132_v15 = vadd.f32 %v2942_v40, %v428_v29  ;;  %v568_v50 = vpack.c.bf16 %v3122_v51, %v3122_v51  ;;  %v1368_v11 = vmul.f32 %v2305_v43, %v2703_v8  ;;  %2314 = vrcp.f32 %v1491_v7 }
 0x15f   :  { %v904_v25 = vpack.c.bf16 %v2307_v41, %v2307_v41  ;;  %v604_v35 = vxor.u32 2147516416, %v540_v19  ;;  %v1370_v3 = vmul.f32 %v2309_v32, %v2705_v9  ;;  %v1372_v18 = vunpack.c.h.bf16 %v1078_v59 }
 0x160   :  { %v935_v56 = vunpack.c.l.bf16 %v871_v49  ;;  %v649_v30 = vxor.u32 2147516416, %v585_v48  ;;  %v1258_v36 = vmul.f32 %v2311_v17, %v2705_v9  ;;  %2316 = vrcp.f32 %v1176_v6 }
 0x161   :  { %v1373_v5 = vunpack.c.l.bf16 %v1078_v59  ;;  %v1051_v2 = vpack.c.bf16 %v987_v33, %v987_v33  ;;  %2318 = vrcp.f32 %v1177_v10  ;;  %v1260_v16 = vunpack.c.h.bf16 %v1062_v47 }
 0x162   :  { %v552_v27 = vpack.c.bf16 %v3132_v15, %v3132_v15  ;;  %v632_v37 = vxor.u32 2147516416, %v568_v50  ;;  %2320 = vrcp.f32 %v1492_v24  ;;  %v1261_v43 = vunpack.c.l.bf16 %v1062_v47  ;;  %v513_v50 = vpop.f32.mrf.mxu3 }
 0x163   :  { %v968_v7 = vunpack.c.l.bf16 %v904_v25  ;;  %v668_v19 = vunpack.c.l.bf16 %v604_v35  ;;  %v2313_v41 = vpop.eup %2312  ;;  %v1371_v32 = vpack.c.bf16 %v1368_v11, %v1370_v3  ;;  %2322 = vrcp.f32 %v1372_v18 }
 0x164   :  { %v999_v49 = vadd.f32 1.0, %v935_v56  ;;  %v713_v48 = vunpack.c.l.bf16 %v649_v30  ;;  %v2315_v29 = vpop.eup %2314  ;;  %v1701_v6 = vsel %vm1683_vm2, %v1627_v54, 0.0  ;;  %v1259_v59 = vpack.c.bf16 %v1256_v21, %v1258_v36 }
 0x165   :  { %2324 = vrcp.f32 %v1373_v5  ;;  %v1183_v10 = vunpack.c.h.bf16 %v1051_v2  ;;  %v1184_v33 = vunpack.c.l.bf16 %v1051_v2  ;;  %v616_v17 = vxor.u32 2147516416, %v552_v27  ;;  %v400_v2 = vpop.f32.mrf.mxu0 }
 0x166   :  { %2326 = vrcp.f32 %v1260_v16  ;;  %v696_v55 = vunpack.c.l.bf16 %v632_v37  ;;  %v2317_v24 = vpop.eup %2316  ;;  %v1032_v47 = vadd.f32 1.0, %v968_v7  ;;  %v887_v25 = vpack.c.bf16 %v2313_v41, %v2313_v41 }
 0x167   :  { %2328 = vrcp.f32 %v1261_v43  ;;  %v744_v35 = vmul.f32 1.442695, %v668_v19  ;;  %v2319_v11 = vpop.eup %2318  ;;  %v3143_v3 = vadd.f32 %v1760_v13, %v3108_v45  ;;  %v1591_v18 = vunpack.c.l.bf16 %v1371_v32 }
 0x168   :  { %v1063_v56 = vpack.c.bf16 %v999_v49, %v999_v49  ;;  %v834_v54 = vmul.f32 1.442695, %v713_v48  ;;  %v2321_v21 = vpop.eup %2320  ;;  %v3146_v30 = vadd.f32 %v1701_v6, %v3114_v44  ;;  %v1575_v36 = vunpack.c.l.bf16 %v1259_v59 }
 0x169   :  { %2330 = vrcp.f32 %v1183_v10  ;;  %v3149_v5 = vadd.f32 %v2942_v40, %v513_v50  ;;  %v2323_v16 = vpop.eup %2322  ;;  %v1179_v27 = vmul.f32 %v2317_v24, %v2703_v8  ;;  %v680_v37 = vunpack.c.l.bf16 %v616_v17 }
 0x16a   :  { %2332 = vrcp.f32 %v1184_v33  ;;  %v800_v45 = vmul.f32 1.442695, %v696_v55  ;;  %v1181_v43 = vmul.f32 %v2319_v11, %v2705_v9  ;;  %v1096_v7 = vpack.c.bf16 %v1032_v47, %v1032_v47  ;;  %v470_v11 = vpop.f32.mrf.mxu2 }
 0x16b   :  { %3539 = vst [vmem:[#allocation21_spill] sm:$0xff] %v3149_v5  ;;  %v2325_v13 = vpop.eup %2324  ;;  %v951_v19 = vunpack.c.l.bf16 %v887_v25  ;;  %2334 = vpow2.f32 %v744_v35  ;;  %v1655_v41 = vmul.f32 %v1591_v18, %v2978_v28  ;;  %v1267_v32 = vunpack.c.h.bf16 %v1063_v56 }
 0x16c   :  { %v2327_v44 = vpop.eup %2326  ;;  %2336 = vpow2.f32 %v834_v54  ;;  %v3155_v49 = vadd.f32 %v2942_v40, %v400_v2  ;;  %v1494_v6 = vmul.f32 %v2315_v29, %v2703_v8  ;;  %v1496_v59 = vmul.f32 %v2321_v21, %v2705_v9  ;;  %v430_v21 = vpop.f32.mrf.mxu1 }
 0x16d   :  { %v2329_v48 = vpop.eup %2328  ;;  %v1268_v55 = vunpack.c.l.bf16 %v1063_v56  ;;  %v586_v10 = vpack.c.bf16 %v3149_v5, %v3149_v5  ;;  %v1375_v33 = vmul.f32 %v2323_v16, %v2703_v8  ;;  %v1377_v17 = vmul.f32 %v2325_v13, %v2705_v9 }
 0x16e   :  { %v768_v50 = vmul.f32 1.442695, %v680_v37  ;;  %2338 = vpow2.f32 %v800_v45  ;;  %v1182_v24 = vpack.c.bf16 %v1179_v27, %v1181_v43  ;;  %v1263_v47 = vmul.f32 %v2327_v44, %v2703_v8 }
 0x16f   :  { %v2331_v28 = vpop.eup %2330  ;;  %v1498_v25 = vunpack.c.h.bf16 %v1096_v7  ;;  %v1015_v35 = vadd.f32 1.0, %v951_v19  ;;  %v1265_v18 = vmul.f32 %v2329_v48, %v2705_v9  ;;  %v1499_v56 = vunpack.c.l.bf16 %v1096_v7 }
 0x170   :  { %v2333_v29 = vpop.eup %2332  ;;  %2340 = vrcp.f32 %v1267_v32  ;;  %v541_v54 = vpack.c.bf16 %v3155_v49, %v3155_v49  ;;  %v1639_v16 = vmul.f32 %v1575_v36, %v2974_v14  ;;  %v1762_v37 = vsel %vm1683_vm2, %v1655_v41, 0.0 }
 0x171   :  { %v2335_v2 = vpop.eup %2334  ;;  %2342 = vrcp.f32 %v1268_v55  ;;  %v650_v27 = vxor.u32 2147516416, %v586_v10  ;;  %v1497_v13 = vpack.c.bf16 %v1494_v6, %v1496_v59  ;;  %v1378_v43 = vpack.c.bf16 %v1375_v33, %v1377_v17 }
 0x172   :  { %v2337_v45 = vpop.eup %2336  ;;  %2344 = vpow2.f32 %v768_v50  ;;  %v3170_v19 = vadd.f32 %v2942_v40, %v470_v11  ;;  %v1564_v7 = vunpack.c.l.bf16 %v1182_v24  ;;  %v1079_v44 = vpack.c.bf16 %v1015_v35, %v1015_v35 }
 0x173   :  { %2346 = vrcp.f32 %v1498_v25  ;;  %v3173_v32 = vadd.f32 %v2942_v40, %v430_v21  ;;  %v1266_v5 = vpack.c.bf16 %v1263_v47, %v1265_v18  ;;  %v860_v14 = vpack.c.bf16 %v2335_v2, %v2335_v2  ;;  %v403_v47 = vpop.f32.mrf.mxu0 }
 0x174   :  { %v2339_v48 = vpop.eup %2338  ;;  %2348 = vrcp.f32 %v1499_v56  ;;  %v605_v36 = vxor.u32 2147516416, %v541_v54  ;;  %v1186_v41 = vmul.f32 %v2331_v28, %v2703_v8  ;;  %v1188_v6 = vmul.f32 %v2333_v29, %v2705_v9 }
 0x175   :  { %v905_v59 = vpack.c.bf16 %v2337_v45, %v2337_v45  ;;  %v714_v55 = vunpack.c.l.bf16 %v650_v27  ;;  %v3178_v33 = vsel %vm1683_vm2, %v1639_v16, 0.0  ;;  %v1763_v17 = vadd.f32 %v1762_v37, %v3143_v3 }
 0x176   :  { %v2341_v10 = vpop.eup %2340  ;;  %v1592_v50 = vunpack.c.l.bf16 %v1378_v43  ;;  %v569_v24 = vpack.c.bf16 %v3170_v19, %v3170_v19  ;;  %v3183_v35 = vunpack.c.l.bf16 %v1497_v13  ;;  %v1379_v11 = vunpack.c.h.bf16 %v1079_v44 }
 0x177   :  { %v2343_v25 = vpop.eup %2342  ;;  %v888_v28 = vpack.c.bf16 %v2339_v48, %v2339_v48  ;;  %v553_v29 = vpack.c.bf16 %v3173_v32, %v3173_v32  ;;  %v1628_v56 = vmul.f32 %v1564_v7, %v3017_v38  ;;  %v1380_v54 = vunpack.c.l.bf16 %v1079_v44 }
 0x178   :  { %3540 = vst [vmem:[#allocation22_spill] sm:$0xff] %v3183_v35  ;;  %v2345_v18 = vpop.eup %2344  ;;  %v924_v21 = vunpack.c.l.bf16 %v860_v14  ;;  %v669_v2 = vunpack.c.l.bf16 %v605_v36  ;;  %v1576_v16 = vunpack.c.l.bf16 %v1266_v5  ;;  %v1189_v37 = vpack.c.bf16 %v1186_v41, %v1188_v6  ;;  %v473_v14 = vpop.f32.mrf.mxu2 }
 0x179   :  { %v2347_v3 = vpop.eup %2346  ;;  %v969_v27 = vunpack.c.l.bf16 %v905_v59  ;;  %v836_v45 = vmul.f32 1.442695, %v714_v55  ;;  %v1656_v13 = vmul.f32 %v1592_v50, %v3026_v0  ;;  %v1270_v35 = vmul.f32 %v2341_v10, %v2703_v8 }
 0x17a   :  { %v2349_v43 = vpop.eup %2348  ;;  %v1272_v48 = vmul.f32 %v2343_v25, %v2705_v9  ;;  %v633_v34 = vxor.u32 2147516416, %v569_v24  ;;  %2350 = vrcp.f32 %v1379_v11  ;;  %v872_v31 = vpack.c.bf16 %v2345_v18, %v2345_v18 }
 0x17b   :  { %v952_v53 = vunpack.c.l.bf16 %v888_v28  ;;  %v617_v38 = vxor.u32 2147516416, %v553_v29  ;;  %2352 = vrcp.f32 %v1380_v54  ;;  %v988_v7 = vadd.f32 1.0, %v924_v21  ;;  %v405_v29 = vpop.f32.mrf.mxu0  ;;  %v515_v21 = vpop.f32.mrf.mxu3 }
 0x17c   :  { %v746_v44 = vmul.f32 1.442695, %v669_v2  ;;  %v3192_v5 = vadd.f32 %v2942_v40, %v403_v47  ;;  %v1703_v36 = vsel %vm1683_vm2, %v1628_v56, 0.0  ;;  %v1565_v41 = vunpack.c.l.bf16 %v1189_v37 }
 0x17d   :  { %v1033_v0 = vadd.f32 1.0, %v969_v27  ;;  %2354 = vpow2.f32 %v836_v45  ;;  %v1640_v6 = vmul.f32 %v1576_v16, %v3032_v60  ;;  %v3197_v59 = vmul.f32 %v2347_v3, %v2703_v8 }
 0x17e   :  { %v3200_v55 = vmul.f32 %v2349_v43, %v2705_v9  ;;  %v697_v10 = vunpack.c.l.bf16 %v633_v34  ;;  %v1764_v50 = vsel %vm1683_vm2, %v1656_v13, 0.0  ;;  %v936_v24 = vunpack.c.l.bf16 %v872_v31  ;;  %v3210_v31 = vld [vmem:[%s3505_s2] ss:$0 sm:$0xff] }
 0x17f   :  { %3541 = vst [vmem:[#allocation23_spill] sm:$0xff] %v3197_v59  ;;  %v1016_v40 = vadd.f32 1.0, %v952_v53  ;;  %v681_v47 = vunpack.c.l.bf16 %v617_v38  ;;  %v1273_v25 = vpack.c.bf16 %v1270_v35, %v1272_v48  ;;  %v1052_v11 = vpack.c.bf16 %v988_v7, %v988_v7 }
 0x180   :  { %3542 = vst [vmem:[#allocation24_spill] sm:$0xff] %v3200_v55  ;;  %2356 = vpow2.f32 %v746_v44  ;;  %v542_v28 = vpack.c.bf16 %v3192_v5, %v3192_v5  ;;  %v2351_v60 = vpop.eup %2350  ;;  %v1704_v18 = vadd.f32 %v1703_v36, %v3146_v30  ;;  %v1629_v56 = vmul.f32 %v1565_v41, %v3039_v46 }
 0x181   :  { %v1097_v54 = vpack.c.bf16 %v1033_v0, %v1033_v0  ;;  %v3213_v34 = vadd.f32 %v3210_v31, %v473_v14  ;;  %v2353_v53 = vpop.eup %2352  ;;  %v3216_v35 = vsel %vm1683_vm2, %v1640_v6, 0.0  ;;  %v3218_v2 = vadd.f32 %v1764_v50, %v1763_v17 }
 0x182   :  { %v802_v46 = vmul.f32 1.442695, %v697_v10  ;;  %v1000_v16 = vadd.f32 1.0, %v936_v24  ;;  %v1080_v37 = vpack.c.bf16 %v1016_v40, %v1016_v40  ;;  %v770_v27 = vmul.f32 1.442695, %v681_v47  ;;  %v475_v10 = vpop.f32.mrf.mxu2 }
 0x183   :  { %v2355_v3 = vpop.eup %2354  ;;  %v3223_v45 = vadd.f32 %v3210_v31, %v405_v29  ;;  %v1577_v43 = vunpack.c.l.bf16 %v1273_v25  ;;  %v1190_v13 = vunpack.c.h.bf16 %v1052_v11  ;;  %v3226_v48 = vadd.f32 %v3210_v31, %v515_v21 }
 0x184   :  { %v606_v38 = vxor.u32 2147516416, %v542_v28  ;;  %v1705_v17 = vsel %vm1683_vm2, %v1629_v56, 0.0  ;;  %v1505_v7 = vunpack.c.h.bf16 %v1097_v54  ;;  %v1191_v44 = vunpack.c.l.bf16 %v1052_v11 }
 0x185   :  { %3543 = vst [vmem:[#allocation25_spill] sm:$0xff] %v3226_v48  ;;  %v570_v14 = vpack.c.bf16 %v3213_v34, %v3213_v34  ;;  %v1382_v41 = vmul.f32 %v2351_v60, %v2703_v8  ;;  %v1384_v0 = vmul.f32 %v2353_v53, %v2705_v9  ;;  %v906_v6 = vpack.c.bf16 %v2355_v3, %v2355_v3 }
 0x186   :  { %v2357_v36 = vpop.eup %2356  ;;  %2358 = vpow2.f32 %v802_v46  ;;  %v1064_v50 = vpack.c.bf16 %v1000_v16, %v1000_v16  ;;  %v1386_v24 = vunpack.c.h.bf16 %v1080_v37  ;;  %v543_v40 = vpack.c.bf16 %v3223_v45, %v3223_v45  ;;  %v433_v16 = vpop.f32.mrf.mxu1 }
 0x187   :  { %2360 = vpow2.f32 %v770_v27  ;;  %v1387_v47 = vunpack.c.l.bf16 %v1080_v37  ;;  %v587_v25 = vpack.c.bf16 %v3226_v48, %v3226_v48  ;;  %v670_v11 = vunpack.c.l.bf16 %v606_v38 }
 0x188   :  { %2362 = vrcp.f32 %v1190_v13  ;;  %v1641_v28 = vmul.f32 %v1577_v43, %v3053_v58  ;;  %v861_v29 = vpack.c.bf16 %v2357_v36, %v2357_v36  ;;  %v634_v60 = vxor.u32 2147516416, %v570_v14 }
 0x189   :  { %2364 = vrcp.f32 %v1191_v44  ;;  %v1506_v56 = vunpack.c.l.bf16 %v1097_v54  ;;  %v970_v21 = vunpack.c.l.bf16 %v906_v6  ;;  %v3239_v53 = vadd.f32 %v3210_v31, %v475_v10  ;;  %v408_v10 = vpop.f32.mrf.mxu0 }
 0x18a   :  { %2366 = vrcp.f32 %v1505_v7  ;;  %v1385_v46 = vpack.c.bf16 %v1382_v41, %v1384_v0  ;;  %v1274_v3 = vunpack.c.h.bf16 %v1064_v50  ;;  %v607_v37 = vxor.u32 2147516416, %v543_v40 }
 0x18b   :  { %2368 = vrcp.f32 %v1386_v24  ;;  %v651_v13 = vxor.u32 2147516416, %v587_v25  ;;  %v748_v38 = vmul.f32 1.442695, %v670_v11  ;;  %v3242_v58 = vadd.f32 %v3210_v31, %v433_v16 }
 0x18c   :  { %v2359_v27 = vpop.eup %2358  ;;  %2370 = vrcp.f32 %v1387_v47  ;;  %v3244_v44 = vadd.f32 %v1705_v17, %v1704_v18  ;;  %v1275_v54 = vunpack.c.l.bf16 %v1064_v50  ;;  %v925_v7 = vunpack.c.l.bf16 %v861_v29 }
 0x18d   :  { %3544 = vst [vmem:[#allocation26_spill] sm:$0xff] %v3242_v58  ;;  %v2361_v43 = vpop.eup %2360  ;;  %v698_v14 = vunpack.c.l.bf16 %v634_v60  ;;  %v3247_v41 = vsel %vm1683_vm2, %v1641_v28, 0.0  ;;  %2372 = vrcp.f32 %v1506_v56  ;;  %v1034_v0 = vadd.f32 1.0, %v970_v21  ;;  %v478_v28 = vpop.f32.mrf.mxu2 }
 0x18e   :  { %v2363_v36 = vpop.eup %2362  ;;  %3545 = vst [vmem:[#allocation27_spill] sm:$0xff] %v3247_v41  ;;  %v571_v6 = vpack.c.bf16 %v3239_v53, %v3239_v53  ;;  %v1593_v40 = vunpack.c.l.bf16 %v1385_v46  ;;  %2374 = vrcp.f32 %v1274_v3  ;;  %v889_v47 = vpack.c.bf16 %v2359_v27, %v2359_v27  ;;  %v435_v63 = vpop.f32.mrf.mxu1 }
 0x18f   :  { %v2365_v24 = vpop.eup %2364  ;;  %v671_v25 = vunpack.c.l.bf16 %v607_v37  ;;  %v873_v17 = vpack.c.bf16 %v2361_v43, %v2361_v43  ;;  %v715_v50 = vunpack.c.l.bf16 %v651_v13  ;;  %2376 = vpow2.f32 %v748_v38  ;;  %v3258_v38 = vpop.f32.mrf.mxu3 }
 0x190   :  { %v2367_v18 = vpop.eup %2366  ;;  %v554_v11 = vpack.c.bf16 %v3242_v58, %v3242_v58  ;;  %2378 = vrcp.f32 %v1275_v54  ;;  %v989_v60 = vadd.f32 1.0, %v925_v7  ;;  %v804_v56 = vmul.f32 1.442695, %v698_v14 }
 0x191   :  { %v2369_v29 = vpop.eup %2368  ;;  %v3254_v21 = vadd.f32 %v3210_v31, %v408_v10  ;;  %v1193_v46 = vmul.f32 %v2363_v36, %v2703_v8  ;;  %v1195_v3 = vmul.f32 %v2365_v24, %v2705_v9  ;;  %v1098_v37 = vpack.c.bf16 %v1034_v0, %v1034_v0 }
 0x192   :  { %v2371_v16 = vpop.eup %2370  ;;  %v635_v27 = vxor.u32 2147516416, %v571_v6  ;;  %v953_v13 = vunpack.c.l.bf16 %v889_v47  ;;  %v750_v43 = vmul.f32 1.442695, %v671_v25  ;;  %v3263_v54 = vadd.f32 %v3210_v31, %v478_v28 }
 0x193   :  { %v544_v30 = vpack.c.bf16 %v3254_v21, %v3254_v21  ;;  %v2373_v7 = vpop.eup %2372  ;;  %v3266_v14 = vmul.f32 %v2367_v18, %v2703_v8  ;;  %v937_v10 = vunpack.c.l.bf16 %v873_v17  ;;  %v838_v36 = vmul.f32 1.442695, %v715_v50 }
 0x194   :  { %v618_v48 = vxor.u32 2147516416, %v554_v11  ;;  %v2375_v24 = vpop.eup %2374  ;;  %v1389_v0 = vmul.f32 %v2369_v29, %v2703_v8  ;;  %v1391_v6 = vmul.f32 %v2371_v16, %v2705_v9  ;;  %v1053_v47 = vpack.c.bf16 %v989_v60, %v989_v60 }
 0x195   :  { %2380 = vpow2.f32 %v804_v56  ;;  %v2377_v25 = vpop.eup %2376  ;;  %v1657_v55 = vmul.f32 %v1593_v40, %v3076_v22  ;;  %v1196_v59 = vpack.c.bf16 %v1193_v46, %v1195_v3  ;;  %v1512_v28 = vunpack.c.h.bf16 %v1098_v37 }
 0x196   :  { %v699_v39 = vunpack.c.l.bf16 %v635_v27  ;;  %v2379_v23 = vpop.eup %2378  ;;  %v1017_v57 = vadd.f32 1.0, %v953_v13  ;;  %2382 = vpow2.f32 %v750_v43  ;;  %v608_v18 = vxor.u32 2147516416, %v544_v30 }
 0x197   :  { %v572_v17 = vpack.c.bf16 %v3263_v54, %v3263_v54  ;;  %v1513_v50 = vunpack.c.l.bf16 %v1098_v37  ;;  %v1001_v11 = vadd.f32 1.0, %v937_v10  ;;  %2384 = vpow2.f32 %v838_v36 }
 0x198   :  { %v682_v29 = vunpack.c.l.bf16 %v618_v48  ;;  %v1392_v16 = vpack.c.bf16 %v1389_v0, %v1391_v6  ;;  %v1197_v60 = vunpack.c.h.bf16 %v1053_v47  ;;  %v862_v56 = vpack.c.bf16 %v2377_v25, %v2377_v25 }
 0x199   :  { %v672_v4 = vunpack.c.l.bf16 %v608_v18  ;;  %v1277_v22 = vmul.f32 %v2375_v24, %v2703_v8  ;;  %2386 = vrcp.f32 %v1512_v28  ;;  %v806_v40 = vmul.f32 1.442695, %v699_v39  ;;  %v3278_v24 = vpop.f32.mrf.mxu3 }
 0x19a   :  { %v636_v46 = vxor.u32 2147516416, %v572_v17  ;;  %v1566_v27 = vunpack.c.l.bf16 %v1196_v59  ;;  %v1279_v30 = vmul.f32 %v2379_v23, %v2705_v9  ;;  %v1198_v13 = vunpack.c.l.bf16 %v1053_v47 }
 0x19b   :  { %v2381_v3 = vpop.eup %2380  ;;  %v1081_v43 = vpack.c.bf16 %v1017_v57, %v1017_v57  ;;  %2388 = vrcp.f32 %v1513_v50  ;;  %v1065_v37 = vpack.c.bf16 %v1001_v11, %v1001_v11  ;;  %v772_v10 = vmul.f32 1.442695, %v682_v29 }
 0x19c   :  { %v3276_v48 = vadd.f32 %v3210_v31, %v435_v63  ;;  %v2383_v36 = vpop.eup %2382  ;;  %v1594_v0 = vunpack.c.l.bf16 %v1392_v16  ;;  %2390 = vrcp.f32 %v1197_v60  ;;  %v926_v6 = vunpack.c.l.bf16 %v862_v56 }
 0x19d   :  { %v752_v39 = vmul.f32 1.442695, %v672_v4  ;;  %v2385_v25 = vpop.eup %2384  ;;  %v3281_v59 = vmul.f32 %v2373_v7, %v2705_v9  ;;  %v890_v23 = vpack.c.bf16 %v2381_v3, %v2381_v3  ;;  %2392 = vpow2.f32 %v806_v40  ;;  %v410_v40 = vpop.f32.mrf.mxu0 }
 0x19e   :  { %3546 = vst [vmem:[#allocation28_spill] sm:$0xff] %v3276_v48  ;;  %v700_v57 = vunpack.c.l.bf16 %v636_v46  ;;  %v1766_v47 = vsel %vm1683_vm2, %v1657_v55, 0.0  ;;  %v1630_v28 = vmul.f32 %v1566_v27, %v3105_v1  ;;  %2394 = vrcp.f32 %v1198_v13 }
 0x19f   :  { %v1393_v63 = vunpack.c.h.bf16 %v1081_v43  ;;  %v3285_v18 = vpop.eup %2386  ;;  %v1281_v17 = vunpack.c.h.bf16 %v1065_v37  ;;  %2396 = vpow2.f32 %v772_v10  ;;  %v863_v50 = vpack.c.bf16 %v2383_v36, %v2383_v36 }
 0x1a0   :  { %v555_v4 = vpack.c.bf16 %v3276_v48, %v3276_v48  ;;  %v1280_v11 = vpack.c.bf16 %v1277_v22, %v1279_v30  ;;  %v1658_v7 = vmul.f32 %v1594_v0, %v3122_v51  ;;  %v990_v29 = vadd.f32 1.0, %v926_v6  ;;  %v480_v48 = vpop.f32.mrf.mxu2 }
 0x1a1   :  { %2398 = vpow2.f32 %v752_v39  ;;  %v3290_v16 = vpop.eup %2388  ;;  %v1282_v55 = vunpack.c.l.bf16 %v1065_v37  ;;  %v907_v60 = vpack.c.bf16 %v2385_v25, %v2385_v25  ;;  %v954_v1 = vunpack.c.l.bf16 %v890_v23 }
 0x1a2   :  { %3547 = vst [vmem:[#allocation29_spill] sm:$0xff] %v3290_v16  ;;  %v808_v56 = vmul.f32 1.442695, %v700_v57  ;;  %v2391_v46 = vpop.eup %2390  ;;  %v1767_v3 = vadd.f32 %v1766_v47, %v3218_v2  ;;  %v1394_v27 = vunpack.c.l.bf16 %v1081_v43  ;;  %2400 = vrcp.f32 %v1393_v63 }
 0x1a3   :  { %v3295_v13 = vadd.f32 %v3210_v31, %v3258_v38  ;;  %v2393_v22 = vpop.eup %2392  ;;  %v1707_v51 = vsel %vm1683_vm2, %v1630_v28, 0.0  ;;  %2402 = vrcp.f32 %v1281_v17  ;;  %v927_v30 = vunpack.c.l.bf16 %v863_v50  ;;  %v523_v28 = vpop.f32.mrf.mxu3 }
 0x1a4   :  { %v619_v10 = vxor.u32 2147516416, %v555_v4  ;;  %v2395_v37 = vpop.eup %2394  ;;  %v1768_v36 = vsel %vm1683_vm2, %v1658_v7, 0.0  ;;  %v1054_v0 = vpack.c.bf16 %v990_v29, %v990_v29  ;;  %2404 = vpow2.f32 %v808_v56 }
 0x1a5   :  { %3548 = vst [vmem:[#allocation30_spill] sm:$0xff] %v3295_v13  ;;  %v3300_v6 = vadd.f32 %v3210_v31, %v410_v40  ;;  %v2397_v2 = vpop.eup %2396  ;;  %v3302_v43 = vunpack.c.l.bf16 %v1280_v11  ;;  %2406 = vrcp.f32 %v1282_v55  ;;  %v971_v38 = vunpack.c.l.bf16 %v907_v60 }
 0x1a6   :  { %v1018_v39 = vadd.f32 1.0, %v954_v1  ;;  %v3305_v23 = vadd.f32 %v1707_v51, %v3244_v44  ;;  %2408 = vrcp.f32 %v1394_v27  ;;  %v588_v57 = vpack.c.bf16 %v3295_v13, %v3295_v13 }
 0x1a7   :  { %v2399_v25 = vpop.eup %2398  ;;  %v891_v47 = vpack.c.bf16 %v2393_v22, %v2393_v22  ;;  %v3309_v63 = vadd.f32 %v1768_v36, %v1767_v3  ;;  %v991_v17 = vadd.f32 1.0, %v927_v30  ;;  %v683_v50 = vunpack.c.l.bf16 %v619_v10 }
 0x1a8   :  { %v864_v4 = vpack.c.bf16 %v2399_v25, %v2399_v25  ;;  %v2401_v11 = vpop.eup %2400  ;;  %v3312_v7 = vmul.f32 %v2391_v46, %v2703_v8  ;;  %v1204_v29 = vunpack.c.h.bf16 %v1054_v0  ;;  %v874_v55 = vpack.c.bf16 %v2397_v2, %v2397_v2 }
 0x1a9   :  { %v545_v44 = vpack.c.bf16 %v3300_v6, %v3300_v6  ;;  %v3316_v60 = vpop.eup %2402  ;;  %v3319_v1 = vmul.f32 %v2395_v37, %v2705_v9  ;;  %v3321_v56 = vadd.f32 1.0, %v971_v38  ;;  %v1205_v40 = vunpack.c.l.bf16 %v1054_v0 }
 0x1aa   :  { %v1082_v3 = vpack.c.bf16 %v1018_v39, %v1018_v39  ;;  %v2405_v27 = vpop.eup %2404  ;;  %v652_v22 = vxor.u32 2147516416, %v588_v57  ;;  %v955_v51 = vunpack.c.l.bf16 %v891_v47  ;;  %v928_v30 = vunpack.c.l.bf16 %v864_v4 }
 0x1ab   :  { %v609_v46 = vxor.u32 2147516416, %v545_v44  ;;  %v2407_v10 = vpop.eup %2406  ;;  %v3324_v36 = vmul.f32 %v2401_v11, %v2703_v8  ;;  %v1055_v2 = vpack.c.bf16 %v991_v17, %v991_v17  ;;  %v774_v25 = vmul.f32 1.442695, %v683_v50 }
 0x1ac   :  { %v892_v13 = vpack.c.bf16 %v2405_v27, %v2405_v27  ;;  %v2409_v61 = vpop.eup %2408  ;;  %2410 = vrcp.f32 %v1204_v29  ;;  %v938_v37 = vunpack.c.l.bf16 %v874_v55  ;;  %v3328_v0 = vadd.f32 %v3210_v31, %v3278_v24 }
 0x1ad   :  { %v992_v38 = vadd.f32 1.0, %v928_v30  ;;  %2412 = vrcp.f32 %v1205_v40  ;;  %v1400_v39 = vunpack.c.h.bf16 %v1082_v3  ;;  %v1401_v57 = vunpack.c.l.bf16 %v1082_v3 }
 0x1ae   :  { %3549 = vst [vmem:[#allocation31_spill] sm:$0xff] %v3328_v0  ;;  %v956_v47 = vunpack.c.l.bf16 %v892_v13  ;;  %v1019_v4 = vadd.f32 1.0, %v955_v51  ;;  %v673_v11 = vunpack.c.l.bf16 %v609_v46  ;;  %v3331_v17 = vadd.f32 %v3210_v31, %v480_v48  ;;  %v525_v13 = vpop.f32.mrf.mxu3 }
 0x1af   :  { %v1056_v44 = vpack.c.bf16 %v992_v38, %v992_v38  ;;  %v1398_v50 = vmul.f32 %v2409_v61, %v2705_v9  ;;  %v716_v27 = vunpack.c.l.bf16 %v652_v22  ;;  %v1211_v29 = vunpack.c.h.bf16 %v1055_v2 }
 0x1b0   :  { %2414 = vpow2.f32 %v774_v25  ;;  %v1020_v55 = vadd.f32 1.0, %v956_v47  ;;  %v3335_v24 = vadd.f32 %v3210_v31, %v523_v28  ;;  %v754_v30 = vmul.f32 1.442695, %v673_v11 }
 0x1b1   :  { %v573_v40 = vpack.c.bf16 %v3331_v17, %v3331_v17  ;;  %v1002_v3 = vadd.f32 1.0, %v938_v37  ;;  %2416 = vrcp.f32 %v1400_v39  ;;  %v1212_v51 = vunpack.c.l.bf16 %v1055_v2 }
 0x1b2   :  { %3550 = vst [vmem:[#allocation32_spill] sm:$0xff] %v3335_v24  ;;  %v589_v48 = vpack.c.bf16 %v3328_v0, %v3328_v0  ;;  %v2411_v46 = vpop.eup %2410  ;;  %2418 = vrcp.f32 %v1401_v57  ;;  %v1083_v61 = vpack.c.bf16 %v1019_v4, %v1019_v4  ;;  %v1218_v22 = vunpack.c.h.bf16 %v1056_v44 }
 0x1b3   :  { %v637_v25 = vxor.u32 2147516416, %v573_v40  ;;  %v2413_v38 = vpop.eup %2412  ;;  %v1203_v28 = vpack.c.bf16 %v3312_v7, %v3319_v1  ;;  %2420 = vrcp.f32 %v1211_v29  ;;  %v1219_v47 = vunpack.c.l.bf16 %v1056_v44 }
 0x1b4   :  { %v3344_v11 = vadd.f32 %v3210_v31, %v525_v13  ;;  %v1084_v37 = vpack.c.bf16 %v1020_v55, %v1020_v55  ;;  %v590_v2 = vpack.c.bf16 %v3335_v24, %v3335_v24  ;;  %2422 = vpow2.f32 %v754_v30 }
 0x1b5   :  { %v701_v39 = vunpack.c.l.bf16 %v637_v25  ;;  %v1399_v57 = vpack.c.bf16 %v3324_v36, %v1398_v50  ;;  %v3349_v4 = vpack.c.bf16 %v1002_v3, %v1002_v3  ;;  %v840_v40 = vmul.f32 1.442695, %v716_v27 }
 0x1b6   :  { %3551 = vst [vmem:[#allocation33_spill] sm:$0xff] %v3344_v11  ;;  %v2415_v0 = vpop.eup %2414  ;;  %2424 = vrcp.f32 %v1212_v51  ;;  %v1407_v58 = vunpack.c.h.bf16 %v1083_v61  ;;  %v653_v7 = vxor.u32 2147516416, %v589_v48  ;;  %v3353_v31 = vmul.f32 %v3316_v60, %v2703_v8 }
 0x1b7   :  { %2426 = vrcp.f32 %v1218_v22  ;;  %v810_v1 = vmul.f32 1.442695, %v701_v39  ;;  %v2417_v44 = vpop.eup %2416  ;;  %v1408_v29 = vunpack.c.l.bf16 %v1083_v61  ;;  %v591_v55 = vpack.c.bf16 %v3344_v11, %v3344_v11 }
 0x1b8   :  { %2428 = vrcp.f32 %v1219_v47  ;;  %v2419_v30 = vpop.eup %2418  ;;  %v3358_v36 = vmul.f32 %v2407_v10, %v2705_v9  ;;  %v1414_v50 = vunpack.c.h.bf16 %v1084_v37  ;;  %v654_v27 = vxor.u32 2147516416, %v590_v2 }
 0x1b9   :  { %2430 = vpow2.f32 %v810_v1  ;;  %v2421_v13 = vpop.eup %2420  ;;  %v1567_v3 = vunpack.c.l.bf16 %v1203_v28  ;;  %v1595_v51 = vunpack.c.l.bf16 %v1399_v57  ;;  %v1415_v48 = vunpack.c.l.bf16 %v1084_v37 }
 0x1ba   :  { %2432 = vpow2.f32 %v840_v40  ;;  %v2423_v22 = vpop.eup %2422  ;;  %v1288_v60 = vunpack.c.h.bf16 %v3349_v4  ;;  %v875_v61 = vpack.c.bf16 %v2415_v0, %v2415_v0  ;;  %v717_v25 = vunpack.c.l.bf16 %v653_v7 }
 0x1bb   :  { %2434 = vrcp.f32 %v1407_v58  ;;  %v3363_v39 = vpack.c.bf16 %v3321_v56, %v3321_v56  ;;  %v865_v10 = vpack.c.bf16 %v2423_v22, %v2423_v22  ;;  %v655_v2 = vxor.u32 2147516416, %v591_v55 }
 0x1bc   :  { %v2425_v47 = vpop.eup %2424  ;;  %2436 = vrcp.f32 %v1408_v29  ;;  %v1207_v28 = vmul.f32 %v2411_v46, %v2703_v8  ;;  %v1209_v57 = vmul.f32 %v2413_v38, %v2705_v9  ;;  %v718_v37 = vunpack.c.l.bf16 %v654_v27 }
 0x1bd   :  { %v2427_v1 = vpop.eup %2426  ;;  %2438 = vrcp.f32 %v1414_v50  ;;  %v1631_v0 = vmul.f32 %v1567_v3, %v3155_v49  ;;  %v1659_v58 = vmul.f32 %v1595_v51, %v3170_v19  ;;  %v929_v7 = vunpack.c.l.bf16 %v865_v10 }
 0x1be   :  { %v2429_v40 = vpop.eup %2428  ;;  %2440 = vrcp.f32 %v1415_v48  ;;  %v1214_v56 = vmul.f32 %v2421_v13, %v2703_v8  ;;  %v939_v29 = vunpack.c.l.bf16 %v875_v61  ;;  %v842_v55 = vmul.f32 1.442695, %v717_v25 }
 0x1bf   :  { %v2431_v11 = vpop.eup %2430  ;;  %2442 = vrcp.f32 %v1288_v60  ;;  %v1216_v46 = vmul.f32 %v2425_v47, %v2705_v9  ;;  %v993_v24 = vadd.f32 1.0, %v929_v7  ;;  %v719_v50 = vunpack.c.l.bf16 %v655_v2 }
 0x1c0   :  { %v2433_v22 = vpop.eup %2432  ;;  %v893_v38 = vpack.c.bf16 %v2431_v11, %v2431_v11  ;;  %v1210_v41 = vpack.c.bf16 %v1207_v28, %v1209_v57  ;;  %v1403_v49 = vmul.f32 %v2417_v44, %v2703_v8  ;;  %v1405_v19 = vmul.f32 %v2419_v30, %v2705_v9 }
 0x1c1   :  { %v2435_v27 = vpop.eup %2434  ;;  %v844_v3 = vmul.f32 1.442695, %v718_v37  ;;  %v1221_v48 = vmul.f32 %v2427_v1, %v2703_v8  ;;  %v1223_v13 = vmul.f32 %v2429_v40, %v2705_v9  ;;  %v1057_v60 = vpack.c.bf16 %v993_v24, %v993_v24 }
 0x1c2   :  { %v2437_v51 = vpop.eup %2436  ;;  %v957_v61 = vunpack.c.l.bf16 %v893_v38  ;;  %v1289_v47 = vunpack.c.l.bf16 %v3349_v4  ;;  %v908_v10 = vpack.c.bf16 %v2433_v22, %v2433_v22  ;;  %v1003_v11 = vadd.f32 1.0, %v939_v29 }
 0x1c3   :  { %v2439_v25 = vpop.eup %2438  ;;  %2444 = vpow2.f32 %v842_v55  ;;  %v1217_v28 = vpack.c.bf16 %v1214_v56, %v1216_v46  ;;  %v1225_v57 = vunpack.c.h.bf16 %v1057_v60  ;;  %v1226_v44 = vunpack.c.l.bf16 %v1057_v60 }
 0x1c4   :  { %v2441_v2 = vpop.eup %2440  ;;  %v846_v7 = vmul.f32 1.442695, %v719_v50  ;;  %v1410_v37 = vmul.f32 %v2435_v27, %v2703_v8  ;;  %v1412_v1 = vmul.f32 %v2437_v51, %v2705_v9  ;;  %2446 = vpow2.f32 %v844_v3 }
 0x1c5   :  { %v3376_v30 = vpop.eup %2442  ;;  %v1021_v24 = vadd.f32 1.0, %v957_v61  ;;  %v1568_v40 = vunpack.c.l.bf16 %v1210_v41  ;;  %v1406_v38 = vpack.c.bf16 %v1403_v49, %v1405_v19  ;;  %v1224_v16 = vpack.c.bf16 %v1221_v48, %v1223_v13 }
 0x1c6   :  { %2448 = vrcp.f32 %v1225_v57  ;;  %v1417_v4 = vmul.f32 %v2439_v25, %v2703_v8  ;;  %v1419_v29 = vmul.f32 %v2441_v2, %v2705_v9  ;;  %v1709_v55 = vsel %vm1683_vm2, %v1631_v0, 0.0 }
 0x1c7   :  { %2450 = vrcp.f32 %v1226_v44  ;;  %v1085_v56 = vpack.c.bf16 %v1021_v24, %v1021_v24  ;;  %v1569_v22 = vunpack.c.l.bf16 %v1217_v28  ;;  %v1067_v46 = vpack.c.bf16 %v1003_v11, %v1003_v11 }
 0x1c8   :  { %2452 = vpow2.f32 %v846_v7  ;;  %v972_v27 = vunpack.c.l.bf16 %v908_v10  ;;  %v1413_v51 = vpack.c.bf16 %v1410_v37, %v1412_v1  ;;  %v1632_v41 = vmul.f32 %v1568_v40, %v3192_v5 }
 0x1c9   :  { %v2445_v50 = vpop.eup %2444  ;;  %v1421_v3 = vunpack.c.h.bf16 %v1085_v56  ;;  %v1422_v60 = vunpack.c.l.bf16 %v1085_v56  ;;  %2454 = vrcp.f32 %v1289_v47  ;;  %v1596_v49 = vunpack.c.l.bf16 %v1406_v38 }
 0x1ca   :  { %v1570_v19 = vunpack.c.l.bf16 %v1224_v16  ;;  %v2447_v48 = vpop.eup %2446  ;;  %v1710_v13 = vadd.f32 %v1709_v55, %v3305_v23  ;;  %v1770_v61 = vsel %vm1683_vm2, %v1659_v58, 0.0  ;;  %v1420_v25 = vpack.c.bf16 %v1417_v4, %v1419_v29 }
 0x1cb   :  { %2456 = vrcp.f32 %v1421_v3  ;;  %v1633_v11 = vmul.f32 %v1569_v22, %v3223_v45  ;;  %v1295_v2 = vunpack.c.h.bf16 %v1067_v46  ;;  %v909_v10 = vpack.c.bf16 %v2445_v50, %v2445_v50 }
 0x1cc   :  { %v2449_v0 = vpop.eup %2448  ;;  %2458 = vrcp.f32 %v1422_v60  ;;  %v1036_v57 = vadd.f32 1.0, %v972_v27  ;;  %v1296_v44 = vunpack.c.l.bf16 %v1067_v46  ;;  %v1597_v5 = vunpack.c.l.bf16 %v1413_v51 }
 0x1cd   :  { %v2451_v28 = vpop.eup %2450  ;;  %v1228_v47 = vmul.f32 %v2449_v0, %v2703_v8  ;;  %v1711_v7 = vsel %vm1683_vm2, %v1632_v41, 0.0  ;;  %v1660_v23 = vmul.f32 %v1596_v49, %v3213_v34  ;;  %v1634_v58 = vmul.f32 %v1570_v19, %v3254_v21 }
 0x1ce   :  { %v2453_v16 = vpop.eup %2452  ;;  %v1230_v37 = vmul.f32 %v2451_v28, %v2705_v9  ;;  %v1598_v1 = vunpack.c.l.bf16 %v1420_v25  ;;  %v910_v45 = vpack.c.bf16 %v2447_v48, %v2447_v48  ;;  %v1713_v40 = vsel %vm1683_vm2, %v1633_v11, 0.0 }
 0x1cf   :  { %v2455_v24 = vpop.eup %2454  ;;  %2460 = vrcp.f32 %v1295_v2  ;;  %v973_v38 = vunpack.c.l.bf16 %v909_v10  ;;  %v2513_v29 = vmov 0.0   ;;  %v1712_v55 = vadd.f32 %v1711_v7, %v1710_v13 }
 0x1d0   :  { %v1231_v4 = vpack.c.bf16 %v1228_v47, %v1230_v37  ;;  %28 = vst.msk [vmem:[#allocation2] sm:$0x3] %vm27_vm3, %v2513_v29  ;;  %2462 = vrcp.f32 %v1296_v44  ;;  %v1661_v34 = vmul.f32 %v1597_v5, %v3239_v53  ;;  %v911_v21 = vpack.c.bf16 %v2453_v16, %v2453_v16 }
 0x1d1   :  { %v2457_v56 = vpop.eup %2456  ;;  %v1772_v46 = vsel %vm1683_vm2, %v1660_v23, 0.0  ;;  %v1715_v50 = vsel %vm1683_vm2, %v1634_v58, 0.0  ;;  %v1714_v3 = vadd.f32 %v1713_v40, %v1712_v55  ;;  %v1662_v60 = vmul.f32 %v1598_v1, %v3263_v54 }
 0x1d2   :  { %v2459_v22 = vpop.eup %2458  ;;  %v1571_v27 = vunpack.c.l.bf16 %v1231_v4  ;;  %v1424_v51 = vmul.f32 %v2457_v56, %v2703_v8  ;;  %v974_v41 = vunpack.c.l.bf16 %v910_v45  ;;  %v1287_v19 = vpack.c.bf16 %v3353_v31, %v3358_v36 }
 0x1d3   :  { %v1426_v49 = vmul.f32 %v2459_v22, %v2705_v9  ;;  %v1771_v53 = vadd.f32 %v1770_v61, %v3309_v63  ;;  %v1037_v48 = vadd.f32 1.0, %v973_v38  ;;  %v1774_v25 = vsel %vm1683_vm2, %v1661_v34, 0.0 }
 0x1d4   :  { %v1635_v13 = vmul.f32 %v1571_v27, %v3300_v6  ;;  %v1716_v0 = vadd.f32 %v1715_v50, %v1714_v3  ;;  %v975_v2 = vunpack.c.l.bf16 %v911_v21  ;;  %v1519_v28 = vunpack.c.h.bf16 %v3363_v39 }
 0x1d5   :  { %v1427_v11 = vpack.c.bf16 %v1424_v51, %v1426_v49  ;;  %v2461_v10 = vpop.eup %2460  ;;  %v1773_v54 = vadd.f32 %v1772_v46, %v1771_v53  ;;  %v1100_v44 = vpack.c.bf16 %v1036_v57, %v1036_v57  ;;  %v1776_v31 = vsel %vm1683_vm2, %v1662_v60, 0.0 }
 0x1d6   :  { %v1717_v5 = vsel %vm1683_vm2, %v1635_v13, 0.0  ;;  %v2463_v47 = vpop.eup %2462  ;;  %v1038_v36 = vadd.f32 1.0, %v974_v41  ;;  %v1520_v6 = vunpack.c.l.bf16 %v3363_v39  ;;  %v1291_v16 = vmul.f32 %v3376_v30, %v2703_v8 }
 0x1d7   :  { %v1718_v63 = vadd.f32 %v1717_v5, %v1716_v0  ;;  %v1599_v61 = vunpack.c.l.bf16 %v1427_v11  ;;  %v1293_v7 = vmul.f32 %v2455_v24, %v2705_v9  ;;  %v1775_v23 = vadd.f32 %v1774_v25, %v1773_v54  ;;  %v3555_v11 = vld [vmem:[#allocation12_spill] sm:$0xff] }
 0x1d8   :  { %v1101_v58 = vpack.c.bf16 %v1037_v48, %v1037_v48  ;;  %v1039_v1 = vadd.f32 1.0, %v975_v2  ;;  %v1579_v45 = vunpack.c.l.bf16 %v1287_v19  ;;  %v1298_v40 = vmul.f32 %v2461_v10, %v2703_v8  ;;  %v3552_v48 = vld [vmem:[#allocation29_spill] sm:$0xff]  ;;  %v3556_v5 = vld [vmem:[#allocation28_spill] sm:$0xff] }
 0x1d9   :  { %v1720_v37 = vadd.f32 %v3013_v12, %v1718_v63  ;;  %v1663_v57 = vmul.f32 %v1599_v61, %v3331_v17  ;;  %v1300_v38 = vmul.f32 %v2463_v47, %v2705_v9  ;;  %v1777_v4 = vadd.f32 %v1776_v31, %v1775_v23  ;;  %v3557_v31 = vld [vmem:[#allocation13_spill] sm:$0xff] }
 0x1da   :  { %v1526_v29 = vunpack.c.h.bf16 %v1100_v44  ;;  %v1102_v39 = vpack.c.bf16 %v1038_v36, %v1038_v36  ;;  %2464 = vrcp.f32 %v1519_v28  ;;  %v1294_v24 = vpack.c.bf16 %v1291_v16, %v1293_v7  ;;  %v3558_v61 = vld [vmem:[#allocation17_spill] sm:$0xff]  ;;  %v3559_v16 = vld [vmem:[#allocation7_spill] sm:$0xff]  ;;  %v3560_v7 = vld [vmem:[#allocation18_spill] sm:$0xff] }
 0x1db   :  { %v1722_v56 = vadd.f32 %v3087_v62, %v1720_v37  ;;  %v1778_v30 = vsel %vm1683_vm2, %v1663_v57, 0.0  ;;  %v1527_v55 = vunpack.c.l.bf16 %v1100_v44  ;;  %2466 = vrcp.f32 %v1520_v6  ;;  %v3562_v37 = vld [vmem:[#allocation20_spill] sm:$0xff] }
 0x1dc   :  { %v1779_v34 = vadd.f32 %v1778_v30, %v1777_v4  ;;  %v1533_v12 = vunpack.c.h.bf16 %v1101_v58  ;;  %v1103_v21 = vpack.c.bf16 %v1039_v1, %v1039_v1  ;;  %v1511_v22 = vpack.c.bf16 %v3266_v14, %v3281_v59  ;;  %v3566_v30 = vld [vmem:[#allocation14_spill] sm:$0xff] }
 0x1dd   :  { %v1724_v17 = vadd.f32 %v3117_v42, %v1722_v56  ;;  %v1301_v46 = vpack.c.bf16 %v1298_v40, %v1300_v38  ;;  %v1534_v50 = vunpack.c.l.bf16 %v1101_v58  ;;  %v1642_v62 = vmul.f32 %v3302_v43, %v3132_v15  ;;  %v3561_v58 = vld [vmem:[#allocation8_spill] sm:$0xff]  ;;  %v3563_v40 = vld [vmem:[#allocation23_spill] sm:$0xff] }
 0x1de   :  { %v1781_v27 = vadd.f32 %v2911_v20, %v1779_v34  ;;  %2468 = vrcp.f32 %v1526_v29  ;;  %v1540_v51 = vunpack.c.h.bf16 %v1102_v39  ;;  %v1580_v60 = vunpack.c.l.bf16 %v1294_v24  ;;  %v3564_v38 = vld [vmem:[#allocation24_spill] sm:$0xff]  ;;  %v3567_v34 = vld [vmem:[#allocation15_spill] sm:$0xff] }
 0x1df   :  { %v1726_v3 = vadd.f32 %v3178_v33, %v1724_v17  ;;  %2470 = vrcp.f32 %v1527_v55  ;;  %v1541_v41 = vunpack.c.l.bf16 %v1102_v39  ;;  %v1643_v49 = vmul.f32 %v1579_v45, %v3173_v32 }
 0x1e0   :  { %v1783_v42 = vadd.f32 %v2951_v26, %v1781_v27  ;;  %2472 = vrcp.f32 %v1533_v12  ;;  %v1547_v59 = vunpack.c.h.bf16 %v1103_v21  ;;  %v2465_v19 = vpop.eup %2464  ;;  %v1581_v20 = vunpack.c.l.bf16 %v1301_v46  ;;  %v3553_v26 = vld [vmem:[#allocation27_spill] sm:$0xff]  ;;  %v3568_v12 = vld [vmem:[#allocation22_spill] sm:$0xff] }
 0x1e1   :  { %v1728_v14 = vadd.f32 %v3216_v35, %v1726_v3  ;;  %2474 = vrcp.f32 %v1534_v50  ;;  %v1548_v43 = vunpack.c.l.bf16 %v1103_v21  ;;  %v2467_v53 = vpop.eup %2466  ;;  %v1515_v33 = vmul.f32 %v3285_v18, %v2703_v8  ;;  %v3554_v35 = vld [vmem:[#allocation26_spill] sm:$0xff] }
 0x1e2   :  { %v1785_v15 = vadd.f32 %v2989_v52, %v1783_v42  ;;  %v1517_v13 = vmul.f32 %v3552_v48, %v2705_v9  ;;  %2476 = vrcp.f32 %v1540_v51  ;;  %v1731_v25 = vsel %vm1683_vm2, %v1642_v62, 0.0 }
 0x1e3   :  { %v1730_v32 = vadd.f32 %v3553_v26, %v1728_v14  ;;  %v1644_v0 = vmul.f32 %v1580_v60, %v3554_v35  ;;  %2478 = vrcp.f32 %v1541_v41  ;;  %v1733_v52 = vsel %vm1683_vm2, %v1643_v49, 0.0  ;;  %v3570_v26 = vld [vmem:[#allocation6_spill] sm:$0xff]  ;;  %v3571_v35 = vld [vmem:[#allocation19_spill] sm:$0xff] }
 0x1e4   :  { %v1787_v2 = vadd.f32 %v3555_v11, %v1785_v15  ;;  %v2469_v10 = vpop.eup %2468  ;;  %v1522_v28 = vmul.f32 %v2465_v19, %v2703_v8  ;;  %2480 = vrcp.f32 %v1547_v59  ;;  %v1524_v44 = vmul.f32 %v2467_v53, %v2705_v9  ;;  %v3569_v15 = vld [vmem:[#allocation16_spill] sm:$0xff] }
 0x1e5   :  { %v1732_v54 = vadd.f32 %v1731_v25, %v1730_v32  ;;  %v2471_v18 = vpop.eup %2470  ;;  %v1645_v47 = vmul.f32 %v1581_v20, %v3556_v5  ;;  %2482 = vrcp.f32 %v1548_v43  ;;  %v1792_v6 = vsel %vm1683_vm2, %v3558_v61, 0.0 }
 0x1e6   :  { %v1789_v36 = vadd.f32 %v3557_v31, %v1787_v2  ;;  %v2473_v63 = vpop.eup %2472  ;;  %v1671_v23 = vmul.f32 %v3560_v7, %v3559_v16  ;;  %v1672_v57 = vmul.f32 %v3562_v37, %v3561_v58  ;;  %v3565_v4 = vpack.c.bf16 %v3563_v40, %v3564_v38  ;;  %v2091_v7 = vld [vmem:[%s3506_s3 + $0x8] sm:$0xff]  ;;  %v3576_v37 = vld [vmem:[#allocation25_spill] sm:$0xff] }
 0x1e7   :  { %v1734_v1 = vadd.f32 %v1733_v52, %v1732_v54  ;;  %v2475_v45 = vpop.eup %2474  ;;  %v1518_v39 = vpack.c.bf16 %v1515_v33, %v1517_v13  ;;  %v1735_v56 = vsel %vm1683_vm2, %v1644_v0, 0.0  ;;  %v1673_v17 = vmul.f32 %v3568_v12, %v3567_v34  ;;  %v3572_v52 = vld [vmem:[#allocation9_spill] sm:$0xff]  ;;  %1865 = vmatpush.bf16.msrb.mxu1 %v2091_v7  ;;  %v3578_v34 = vld [vmem:[#allocation31_spill] sm:$0xff] }
 0x1e8   :  { %v1610_v29 = vunpack.c.l.bf16 %v3565_v4  ;;  %v1791_v24 = vadd.f32 %v3566_v30, %v1789_v36  ;;  %v2477_v55 = vpop.eup %2476  ;;  %v1529_v21 = vmul.f32 %v2469_v10, %v2703_v8  ;;  %v1531_v46 = vmul.f32 %v2471_v18, %v2705_v9  ;;  %v3574_v36 = vld [vmem:[#allocation21_spill] sm:$0xff] }
 0x1e9   :  { %v1736_v50 = vadd.f32 %v1735_v56, %v1734_v1  ;;  %v2479_v27 = vpop.eup %2478  ;;  %v1611_v62 = vunpack.c.l.bf16 %v1511_v22  ;;  %v1525_v51 = vpack.c.bf16 %v1522_v28, %v1524_v44  ;;  %v1737_v3 = vsel %vm1683_vm2, %v1645_v47, 0.0  ;;  %v3573_v44 = vld [vmem:[#allocation10_spill] sm:$0xff] }
 0x1ea   :  { %v1793_v60 = vadd.f32 %v1792_v6, %v1791_v24  ;;  %v2481_v41 = vpop.eup %2480  ;;  %v1794_v42 = vsel %vm1683_vm2, %v1671_v23, 0.0  ;;  %v1536_v49 = vmul.f32 %v2473_v63, %v2703_v8  ;;  %v1538_v14 = vmul.f32 %v2475_v45, %v2705_v9  ;;  %v3575_v23 = vld [vmem:[#allocation11_spill] sm:$0xff]  ;;  %v2090_v38 = vld [vmem:[%s3506_s3] sm:$0xff] }
 0x1eb   :  { %v1738_v59 = vadd.f32 %v1737_v3, %v1736_v50  ;;  %v2483_v19 = vpop.eup %2482  ;;  %v1796_v20 = vsel %vm1683_vm2, %v1672_v57, 0.0  ;;  %v1674_v43 = vmul.f32 %v1610_v29, %v3569_v15  ;;  %v1612_v53 = vunpack.c.l.bf16 %v1518_v39  ;;  %v3577_v39 = vld [vmem:[#allocation30_spill] sm:$0xff]  ;;  %1866 = vmatpush.bf16.msrb.mxu1 %v2090_v38 }
 0x1ec   :  { %v1795_v33 = vadd.f32 %v1794_v42, %v1793_v60  ;;  %v1532_v22 = vpack.c.bf16 %v1529_v21, %v1531_v46  ;;  %v1543_v48 = vmul.f32 %v2477_v55, %v2703_v8  ;;  %v1545_v13 = vmul.f32 %v2479_v27, %v2705_v9  ;;  %v3579_v27 = vld [vmem:[#allocation32_spill] sm:$0xff]  ;;  %v3580_v60 = vld [vmem:[#allocation33_spill] sm:$0xff] }
 0x1ed   :  { %v1740_v32 = vadd.f32 %v3570_v26, %v1738_v59  ;;  %v1798_v25 = vsel %vm1683_vm2, %v1673_v17, 0.0  ;;  %v1675_v0 = vmul.f32 %v1611_v62, %v3571_v35  ;;  %v1613_v11 = vunpack.c.l.bf16 %v1525_v51 }
 0x1ee   :  { %v1797_v2 = vadd.f32 %v1796_v20, %v1795_v33  ;;  %v1539_v10 = vpack.c.bf16 %v1536_v49, %v1538_v14  ;;  %v1550_v54 = vmul.f32 %v2481_v41, %v2703_v8  ;;  %v1552_v18 = vmul.f32 %v2483_v19, %v2705_v9 }
 0x1ef   :  { %v1742_v28 = vadd.f32 %v3572_v52, %v1740_v32  ;;  %v1743_v5 = vsel %vm1683_vm2, %v3573_v44, 0.0  ;;  %v1800_v47 = vsel %vm1683_vm2, %v1674_v43, 0.0  ;;  %v1676_v63 = vmul.f32 %v1612_v53, %v3574_v36  ;;  %v1682_v32 = vld [vmem:[#allocation2] sm:$0x3] }
 0x1f0   :  { %v1799_v31 = vadd.f32 %v1798_v25, %v1797_v2  ;;  %v1614_v61 = vunpack.c.l.bf16 %v1532_v22  ;;  %v1546_v6 = vpack.c.bf16 %v1543_v48, %v1545_v13  ;;  %v1745_v8 = vsel %vm1683_vm2, %v3575_v23, 0.0 }
 0x1f1   :  { %v1744_v16 = vadd.f32 %v1743_v5, %v1742_v28  ;;  %v1802_v9 = vsel %vm1683_vm2, %v1675_v0, 0.0  ;;  %v1677_v57 = vmul.f32 %v1613_v11, %v3576_v37  ;;  %v1615_v1 = vunpack.c.l.bf16 %v1539_v10  ;;  %v2099_v28 = vld [vmem:[%s3507_s4] ss:$0 sm:$0xff] }
 0x1f2   :  { %v1801_v58 = vadd.f32 %v1800_v47, %v1799_v31  ;;  %v1553_v45 = vpack.c.bf16 %v1550_v54, %v1552_v18  ;;  %v1804_v29 = vsel %vm1683_vm2, %v1676_v63, 0.0  ;;  %v1678_v56 = vmul.f32 %v1614_v61, %v3577_v39 }
 0x1f3   :  { %v1746_v40 = vadd.f32 %v1745_v8, %v1744_v16  ;;  %v1616_v30 = vunpack.c.l.bf16 %v1546_v6  ;;  %v1806_v55 = vsel %vm1683_vm2, %v1677_v57, 0.0  ;;  %v1679_v12 = vmul.f32 %v1615_v1, %v3578_v34 }
 0x1f4   :  { %v1803_v4 = vadd.f32 %v1802_v9, %v1801_v58  ;;  %v1617_v17 = vunpack.c.l.bf16 %v1553_v45  ;;  %v1808_v50 = vsel %vm1683_vm2, %v1678_v56, 0.0 }
 0x1f5   :  { %v1747_v21 = vrot.slane %v1746_v40, 4  ;;  %v1680_v62 = vmul.f32 %v1616_v30, %v3579_v27  ;;  %v1810_v3 = vsel %vm1683_vm2, %v1679_v12, 0.0 }
 0x1f6   :  { %v1805_v24 = vadd.f32 %v1804_v29, %v1803_v4  ;;  %v1681_v41 = vmul.f32 %v1617_v17, %v3580_v60 }
 0x1f7   :  { %v1748_v42 = vadd.f32 %v1747_v21, %v1746_v40  ;;  %v1812_v14 = vsel %vm1683_vm2, %v1680_v62, 0.0 }
 0x1f8   :  { %v1807_v46 = vadd.f32 %v1806_v55, %v1805_v24  ;;  %v1814_v19 = vsel %vm1683_vm2, %v1681_v41, 0.0 }
 0x1f9   :  { %v1749_v20 = vrot.slane %v1748_v42, 2 }
 0x1fa   :  { %v1809_v51 = vadd.f32 %v1808_v50, %v1807_v46 }
 0x1fb   :  { %v1750_v53 = vadd.f32 %v1749_v20, %v1748_v42 }
 0x1fc   :  { %v1811_v49 = vadd.f32 %v1810_v3, %v1809_v51 }
 0x1fd   :  { %v1751_v48 = vrot.slane %v1750_v53, 1 }
 0x1fe   :  { %v1813_v59 = vadd.f32 %v1812_v14, %v1811_v49 }
 0x1ff   :  { %v1752_v25 = vadd.f32 %v1751_v48, %v1750_v53 }
 0x200   :  { %v1815_v15 = vadd.f32 %v1814_v19, %v1813_v59 }
 0x202   :  { %v1816_v43 = vrot.slane %v1815_v15, 4 }
 0x204   :  { %v1817_v33 = vadd.f32 %v1816_v43, %v1815_v15 }
 0x206   :  { %v1818_v22 = vrot.slane %v1817_v33, 2 }
 0x208   :  { %v1819_v13 = vadd.f32 %v1818_v22, %v1817_v33 }
 0x20a   :  { %v1820_v26 = vrot.slane %v1819_v13, 1 }
 0x20c   :  { %v1821_v35 = vadd.f32 %v1820_v26, %v1819_v13 }
 0x20e   :  { %v1825_v0 = vsel %vm1824_vm4, %v1821_v35, %v1752_v25 }
 0x20f   :  { %v1827_v11 = vadd.f32 %v1825_v0, %v1682_v32 }
 0x211   :  { %1829 = vst.msk [vmem:[#allocation2] sm:$0x3] %vm27_vm3, %v1827_v11 }
 0x218   :  { %v1833_v2 = vld [vmem:[#allocation2] sm:$0x3] }
 0x219   :  { %v1834_v10 = vmul.f32 0.00390625, %v1833_v2 }
 0x21b   :  { %v1835_v52 = vpack.c.bf16 %v1834_v10, %v1834_v10 }
 0x21d   :  { %2057 = vmatmul.msk.bf16.vlgmr.msrb.gmra.mxu1 %vm1683_vm2, %v1835_v52 }
 0x29a   :  { %v1868_v54 = vpop.f32.mrf.mxu1 }
 0x29b   :  { %v1869_v18 = vadd.f32 %v2099_v28, %v1868_v54 }
 0x29d   :  { %1872 = vst [vmem:[#allocation3] sm:$0x3] %v1869_v18 }
 0x29e   :  { %1883 = dma.vmem_to_hbm [thread:$0]  %s1879_s16, 32, %s1881_s19, [#allocation4]  }
 0x2a2   :  { %v1870_v44 = vpop.f32.mrf.mxu1 }
 0x2a3   :  { %2510 = dma.done.wait [#allocation4], 32  }
 0x2a4   :  { %2511 = vsyncadd [#allocation4], 4294967264 }
 0x2a5   :  { %1888 = vsyncpa [#allocation4], 1 }

</bundles_post_ra>
